<compile_context>
chip_gen: v7x
topology: tpu7x:2x2x1
jax: 0.10.0
libtpu: 0.0.40
codegen_flags: <defaults>
</compile_context>

<pallas_src>
import jax
import jax.numpy as jnp
from jax.experimental import pallas as pl
from jax.experimental.pallas import tpu as pltpu


# --------------------------------------------------------------------------- #
# Kernel
# --------------------------------------------------------------------------- #
def lsk_kernel(x_ref, y_ref,
               wa_ref, ba_ref,          # [conv0_s∘conv0 | gate.fc1]  (dim, half+dim)
               wb_ref, bb_ref,          # [conv1_s∘convl | gate.fc2]  (dim, half+dim)
               wsq_ref, bsq_ref,        # conv_squeeze (2,2)/(2,) in SMEM
               wm_ref, bm_ref,          # conv_m (half, dim)
               o_ref):
    half = wm_ref.shape[0]

    xf = x_ref[...]                      # f32 activations (residual path stays f32)
    yf = y_ref[...]
    wdt = wa_ref.dtype                   # MXU operand dtype (bf16 by default)
    xc = xf.astype(wdt)
    yc = yf.astype(wdt)

    # One MXU pass per operand; f32 accumulation.
    pa = jnp.dot(xc, wa_ref[...], preferred_element_type=jnp.float32) + ba_ref[...]
    pb = jnp.dot(yc, wb_ref[...], preferred_element_type=jnp.float32) + bb_ref[...]

    a1 = pa[:, :half]                    # conv0_s(conv0(x))   -- lane-aligned split
    a2 = pb[:, :half]                    # conv1_s(convl(y))
    g = pa[:, half:] + pb[:, half:]      # gate.fc1(x) + gate.fc2(y)

    # mean / max over the concatenated [a1, a2] feature axis -- one reduce each.
    avg_attn = jnp.sum(a1 + a2, axis=1, keepdims=True) * (1.0 / (2 * half))
    max_attn = jnp.max(jnp.maximum(a1, a2), axis=1, keepdims=True)

    # conv_squeeze: Linear(2, 2) + sigmoid, evaluated scalar-wise from SMEM.
    sig0 = jax.nn.sigmoid(avg_attn * wsq_ref[0, 0] + max_attn * wsq_ref[0, 1]
                          + bsq_ref[0])
    sig1 = jax.nn.sigmoid(avg_attn * wsq_ref[1, 0] + max_attn * wsq_ref[1, 1]
                          + bsq_ref[1])

    # attn = a1*sig0 + a2*sig1 ; conv_m (dim//2 -> dim).
    attn_mix = (a1 * sig0 + a2 * sig1).astype(wdt)
    attn = jnp.dot(attn_mix, wm_ref[...],
                   preferred_element_type=jnp.float32) + bm_ref[...]

    # gatedFusion epilogue:  z*x + (1-z)*y + x + y  ==  (1+z)*x + (2-z)*y.
    z = jax.nn.sigmoid(g)
    temp = (1.0 + z) * xf + (2.0 - z) * yf

    o_ref[...] = (attn + temp).astype(o_ref.dtype)


# --------------------------------------------------------------------------- #
# One-time host-side parameter preparation (call once, reuse every forward).
# --------------------------------------------------------------------------- #
def prepare_lsk_params(params, compute_dtype=jnp.bfloat16):
    """params: PyTorch-convention weights (out, in). Returns kernel-ready dict."""
    f32 = jnp.float32
    hp = jax.lax.Precision.HIGHEST
    row = lambda b: jnp.asarray(b, f32).reshape(1, -1)

    W0 = jnp.asarray(params["w0"], f32).T     # (dim, dim)  (in, out)
    Wl = jnp.asarray(params["wl"], f32).T
    W0s = jnp.asarray(params["w0s"], f32).T   # (dim, half)
    W1s = jnp.asarray(params["w1s"], f32).T
    Wf1 = jnp.asarray(params["wf1"], f32).T   # (dim, dim)
    Wf2 = jnp.asarray(params["wf2"], f32).T

    # Fuse back-to-back Linears: conv0 -> conv0_s and convl -> conv1_s.
    w0f = jnp.dot(W0, W0s, precision=hp)                                  # (dim, half)
    w1f = jnp.dot(Wl, W1s, precision=hp)
    b0f = jnp.dot(row(params["b0"]), W0s, precision=hp) + row(params["b0s"])
    b1f = jnp.dot(row(params["bl"]), W1s, precision=hp) + row(params["b1s"])

    # Fold the gate's fc1/fc2 onto the per-operand matmuls (concat along N).
    wa = jnp.concatenate([w0f, Wf1], axis=1)                              # (dim, half+dim)
    wb = jnp.concatenate([w1f, Wf2], axis=1)
    ba = jnp.concatenate([b0f, row(params["bf1"])], axis=1)               # (1, half+dim)
    bb = jnp.concatenate([b1f, row(params["bf2"])], axis=1)

    wm = jnp.asarray(params["wm"], f32).T                                 # (half, dim)
    bm = row(params["bm"])

    cd = compute_dtype
    return {
        "wa": wa.astype(cd), "ba": ba,
        "wb": wb.astype(cd), "bb": bb,
        "wm": wm.astype(cd), "bm": bm,
        "wsq": jnp.asarray(params["wsq"], f32),     # (2, 2)  -> SMEM
        "bsq": jnp.asarray(params["bsq"], f32),     # (2,)    -> SMEM
    }


def _pick_tb(B):
    """Largest batch tile giving >= 4 grid steps (>= 2 pipelined steps per v7x TC)."""
    for cand in (256, 128, 64, 32, 16, 8):
        if B % cand == 0 and B // cand >= 4:
            return cand
    for cand in (256, 128, 64, 32, 16, 8):      # small B: largest legal tile
        if B % cand == 0:
            return cand
    raise ValueError(f"batch {B} must be a multiple of 8")


# --------------------------------------------------------------------------- #
# Forward wrapper (jit this).
# --------------------------------------------------------------------------- #
def lsk_forward(x, y, prep, *, tb=None, out_dtype=None,
                vmem_limit_bytes=48 * 1024 * 1024, weight_buffers=1):
    """x, y: (B, dim).  prep: output of prepare_lsk_params."""
    B, dim = x.shape
    half = prep["wm"].shape[0]
    assert dim == 2 * half, "prepared params do not match input feature dim"
    assert half % 128 == 0, "dim//2 must be a multiple of 128 (lane-aligned slice)"
    wide = half + dim

    if tb is None:
        tb = _pick_tb(B)
    assert B % tb == 0 and tb % 8 == 0
    out_dtype = x.dtype if out_dtype is None else out_dtype

    # Weight/bias blocks: constant index map (DMA'd once) + single-buffered.
    wmode = ({"pipeline_mode": pl.Buffered(weight_buffers)}
             if weight_buffers is not None else {})

    def wspec(shape):
        return pl.BlockSpec(shape, lambda i: (0,) * len(shape), **wmode)

    grid_spec = pltpu.PrefetchScalarGridSpec(
        num_scalar_prefetch=0,
        grid=(B // tb,),
        in_specs=[
            pl.BlockSpec((tb, dim), lambda i: (i, 0)),            # x
            pl.BlockSpec((tb, dim), lambda i: (i, 0)),            # y
            wspec((dim, wide)), wspec((1, wide)),                 # wa, ba
            wspec((dim, wide)), wspec((1, wide)),                 # wb, bb
            pl.BlockSpec(memory_space=pltpu.MemorySpace.SMEM),    # wsq (2,2)
            pl.BlockSpec(memory_space=pltpu.MemorySpace.SMEM),    # bsq (2,)
            wspec((half, dim)), wspec((1, dim)),                  # wm, bm
        ],
        out_specs=pl.BlockSpec((tb, dim), lambda i: (i, 0)),
    )
    return pl.pallas_call(
        lsk_kernel,
        out_shape=jax.ShapeDtypeStruct((B, dim), out_dtype),
        grid_spec=grid_spec,
        compiler_params=pltpu.CompilerParams(
            dimension_semantics=("parallel",),
            vmem_limit_bytes=vmem_limit_bytes),
    )(x, y, prep["wa"], prep["ba"], prep["wb"], prep["bb"],
      prep["wsq"], prep["bsq"], prep["wm"], prep["bm"])


# --------------------------------------------------------------------------- #
# Pure-JAX reference mirroring the PyTorch forward (unfused weights).
# --------------------------------------------------------------------------- #
def ref_forward(x, y, p):
    hp = jax.lax.Precision.HIGHEST
    lin = lambda v, w, b: jnp.dot(v, w.T, precision=hp) + b
    attn1 = lin(x, p["w0"], p["b0"])
    attn2 = lin(y, p["wl"], p["bl"])
    a1 = lin(attn1, p["w0s"], p["b0s"])
    a2 = lin(attn2, p["w1s"], p["b1s"])
    attn = jnp.concatenate([a1, a2], axis=1)
    avg = jnp.mean(attn, axis=1, keepdims=True)
    mx = jnp.max(attn, axis=1, keepdims=True)
    agg = jnp.concatenate([avg, mx], axis=1)
    sig = jax.nn.sigmoid(lin(agg, p["wsq"], p["bsq"]))
    attn = a1 * sig[:, 0:1] + a2 * sig[:, 1:2]
    attn = lin(attn, p["wm"], p["bm"])
    x11 = lin(x, p["wf1"], p["bf1"])
    x22 = lin(y, p["wf2"], p["bf2"])
    z = jax.nn.sigmoid(x11 + x22)
    temp = z * x + (1.0 - z) * y + x + y
    return attn + temp


def init_params(key, dim):
    half = dim // 2
    names = [("w0", dim, dim), ("wl", dim, dim),
             ("w0s", half, dim), ("w1s", half, dim),
             ("wsq", 2, 2), ("wm", dim, half),
             ("wf1", dim, dim), ("wf2", dim, dim)]
    params = {}
    keys = jax.random.split(key, 2 * len(names))
    for idx, (name, out_f, in_f) in enumerate(names):
        bound = 1.0 / float(in_f) ** 0.5
        kw, kb = keys[2 * idx], keys[2 * idx + 1]
        params[name] = jax.random.uniform(kw, (out_f, in_f), jnp.float32, -bound, bound)
        params["b" + name[1:]] = jax.random.uniform(kb, (out_f,), jnp.float32, -bound, bound)
    return params


if __name__ == "__main__":
    # Small synthetic size (real module uses dim=768); B=512 -> tb=128, grid=(4,).
    B, dim = 512, 256
    key = jax.random.PRNGKey(0)
    kx, ky, kp = jax.random.split(key, 3)
    x = jax.random.normal(kx, (B, dim), jnp.float32)
    y = jax.random.normal(ky, (B, dim), jnp.float32)
    params = init_params(kp, dim)

    ref = jax.block_until_ready(ref_forward(x, y, params))
    scale = max(1.0, float(jnp.max(jnp.abs(ref))))

    fwd = jax.jit(lsk_forward)   # jit the wrapper; weight prep stays outside

    # f32-weight path: tight check of the forward-pass semantics.
    prep_f32 = prepare_lsk_params(params, compute_dtype=jnp.float32)
    out_f32 = jax.block_until_ready(fwd(x, y, prep_f32))
    assert out_f32.shape == (B, dim) and out_f32.dtype == jnp.float32
    err_f32 = float(jnp.max(jnp.abs(out_f32 - ref)))
    assert err_f32 < 2e-3 * scale, f"f32 kernel mismatch vs reference: {err_f32}"

    # Default bf16 MXU path (fused weights + operands rounded to bf16 -> looser tol).
    prep_bf16 = prepare_lsk_params(params)   # bf16 weights
    out_bf16 = jax.block_until_ready(fwd(x, y, prep_bf16))
    err_bf16 = float(jnp.max(jnp.abs(out_bf16 - ref)))
    assert err_bf16 < 3e-2 * scale, f"bf16 kernel mismatch vs reference: {err_bf16}"

    print("KERNEL_OK")
</pallas_src>

<mosaic_0001>
module attributes {stable_mosaic.version = 11 : i64} {
  func.func @lsk_kernel(%arg0: i32, %arg1: memref<128x256xf32, #tpu.memory_space<vmem>>, %arg2: memref<128x256xf32, #tpu.memory_space<vmem>>, %arg3: memref<256x384xf32, #tpu.memory_space<vmem>>, %arg4: memref<1x384xf32, #tpu.memory_space<vmem>>, %arg5: memref<256x384xf32, #tpu.memory_space<vmem>>, %arg6: memref<1x384xf32, #tpu.memory_space<vmem>>, %arg7: memref<2x2xf32, #tpu.memory_space<smem>>, %arg8: memref<2xf32, #tpu.memory_space<smem>>, %arg9: memref<128x256xf32, #tpu.memory_space<vmem>>, %arg10: memref<1x256xf32, #tpu.memory_space<vmem>>, %arg11: memref<128x256xf32, #tpu.memory_space<vmem>>) attributes {dimension_semantics = [#tpu.dimension_semantics<parallel>], iteration_bounds = array<i64: 4>, scalar_prefetch = 0 : i64, scratch_operands = 0 : i64, tpu.core_type = #tpu.core_type<tc>, window_params = [{transform_indices = @transform_0, window_bounds = array<i64: 128, 256>}, {transform_indices = @transform_1, window_bounds = array<i64: 128, 256>}, {pipeline_mode = #tpu.pipeline_mode<synchronous>, transform_indices = @transform_2, window_bounds = array<i64: 256, 384>}, {pipeline_mode = #tpu.pipeline_mode<synchronous>, transform_indices = @transform_3, window_bounds = array<i64: 1, 384>}, {pipeline_mode = #tpu.pipeline_mode<synchronous>, transform_indices = @transform_4, window_bounds = array<i64: 256, 384>}, {pipeline_mode = #tpu.pipeline_mode<synchronous>, transform_indices = @transform_5, window_bounds = array<i64: 1, 384>}, {transform_indices = @transform_6, window_bounds = array<i64: 2, 2>}, {transform_indices = @transform_7, window_bounds = array<i64: 2>}, {pipeline_mode = #tpu.pipeline_mode<synchronous>, transform_indices = @transform_8, window_bounds = array<i64: 128, 256>}, {pipeline_mode = #tpu.pipeline_mode<synchronous>, transform_indices = @transform_9, window_bounds = array<i64: 1, 256>}, {transform_indices = @transform_10, window_bounds = array<i64: 128, 256>}]} {
    %c0 = arith.constant 0 : index
    %c0_0 = arith.constant 0 : index
    %0 = vector.load %arg1[%c0, %c0_0] : memref<128x256xf32, #tpu.memory_space<vmem>>, vector<128x256xf32>
    %c0_1 = arith.constant 0 : index
    %c0_2 = arith.constant 0 : index
    %1 = vector.load %arg2[%c0_1, %c0_2] : memref<128x256xf32, #tpu.memory_space<vmem>>, vector<128x256xf32>
    %c0_3 = arith.constant 0 : index
    %c0_4 = arith.constant 0 : index
    %2 = vector.load %arg3[%c0_3, %c0_4] : memref<256x384xf32, #tpu.memory_space<vmem>>, vector<256x384xf32>
    %cst = arith.constant dense<0.000000e+00> : vector<128x384xf32>
    %3 = tpu.matmul %0, %2, %cst {dimension_numbers = #tpu.dot_dimension_numbers<[1], [0], [0], [1], [0, 0, 1, 1], [], []>} : vector<128x256xf32>, vector<256x384xf32>, vector<128x384xf32> -> vector<128x384xf32>
    %c0_5 = arith.constant 0 : index
    %c0_6 = arith.constant 0 : index
    %4 = vector.load %arg4[%c0_5, %c0_6] : memref<1x384xf32, #tpu.memory_space<vmem>>, vector<1x384xf32>
    %5 = vector.broadcast %4 : vector<1x384xf32> to vector<128x384xf32>
    %6 = arith.addf %3, %5 : vector<128x384xf32>
    %c0_7 = arith.constant 0 : index
    %c0_8 = arith.constant 0 : index
    %7 = vector.load %arg5[%c0_7, %c0_8] : memref<256x384xf32, #tpu.memory_space<vmem>>, vector<256x384xf32>
    %cst_9 = arith.constant dense<0.000000e+00> : vector<128x384xf32>
    %8 = tpu.matmul %1, %7, %cst_9 {dimension_numbers = #tpu.dot_dimension_numbers<[1], [0], [0], [1], [0, 0, 1, 1], [], []>} : vector<128x256xf32>, vector<256x384xf32>, vector<128x384xf32> -> vector<128x384xf32>
    %c0_10 = arith.constant 0 : index
    %c0_11 = arith.constant 0 : index
    %9 = vector.load %arg6[%c0_10, %c0_11] : memref<1x384xf32, #tpu.memory_space<vmem>>, vector<1x384xf32>
    %10 = vector.broadcast %9 : vector<1x384xf32> to vector<128x384xf32>
    %11 = arith.addf %8, %10 : vector<128x384xf32>
    %12 = vector.extract_strided_slice %6 {offsets = [0, 0], sizes = [128, 128], strides = [1, 1]} : vector<128x384xf32> to vector<128x128xf32>
    %13 = vector.extract_strided_slice %11 {offsets = [0, 0], sizes = [128, 128], strides = [1, 1]} : vector<128x384xf32> to vector<128x128xf32>
    %14 = vector.extract_strided_slice %6 {offsets = [0, 128], sizes = [128, 256], strides = [1, 1]} : vector<128x384xf32> to vector<128x256xf32>
    %15 = vector.extract_strided_slice %11 {offsets = [0, 128], sizes = [128, 256], strides = [1, 1]} : vector<128x384xf32> to vector<128x256xf32>
    %16 = arith.addf %14, %15 : vector<128x256xf32>
    %17 = arith.addf %12, %13 : vector<128x128xf32>
    %cst_12 = arith.constant dense<0.000000e+00> : vector<128xf32>
    %18 = vector.multi_reduction <add>, %17, %cst_12 [1] : vector<128x128xf32> to vector<128xf32>
    %19 = vector.shape_cast %18 : vector<128xf32> to vector<128x1xf32>
    %cst_13 = arith.constant 3.906250e-03 : f32
    %20 = vector.broadcast %cst_13 : f32 to vector<128x1xf32>
    %21 = arith.mulf %19, %20 : vector<128x1xf32>
    %22 = arith.maximumf %12, %13 : vector<128x128xf32>
    %cst_14 = arith.constant dense<0xFF800000> : vector<128xf32>
    %23 = vector.multi_reduction <maximumf>, %22, %cst_14 [1] : vector<128x128xf32> to vector<128xf32>
    %24 = vector.shape_cast %23 : vector<128xf32> to vector<128x1xf32>
    %c0_15 = arith.constant 0 : index
    %c0_16 = arith.constant 0 : index
    %25 = memref.load %arg7[%c0_15, %c0_16] : memref<2x2xf32, #tpu.memory_space<smem>>
    %26 = vector.broadcast %25 : f32 to vector<128x1xf32>
    %27 = arith.mulf %21, %26 : vector<128x1xf32>
    %c0_17 = arith.constant 0 : index
    %c1 = arith.constant 1 : index
    %28 = memref.load %arg7[%c0_17, %c1] : memref<2x2xf32, #tpu.memory_space<smem>>
    %29 = vector.broadcast %28 : f32 to vector<128x1xf32>
    %30 = arith.mulf %24, %29 : vector<128x1xf32>
    %31 = arith.addf %27, %30 : vector<128x1xf32>
    %c0_18 = arith.constant 0 : index
    %32 = memref.load %arg8[%c0_18] : memref<2xf32, #tpu.memory_space<smem>>
    %33 = vector.broadcast %32 : f32 to vector<128x1xf32>
    %34 = arith.addf %31, %33 : vector<128x1xf32>
    %35 = arith.negf %34 : vector<128x1xf32>
    %36 = math.exp %35 : vector<128x1xf32>
    %cst_19 = arith.constant 1.000000e+00 : f32
    %37 = vector.broadcast %cst_19 : f32 to vector<128x1xf32>
    %38 = arith.addf %37, %36 : vector<128x1xf32>
    %39 = arith.divf %37, %38 : vector<128x1xf32>
    %c1_20 = arith.constant 1 : index
    %c0_21 = arith.constant 0 : index
    %40 = memref.load %arg7[%c1_20, %c0_21] : memref<2x2xf32, #tpu.memory_space<smem>>
    %41 = vector.broadcast %40 : f32 to vector<128x1xf32>
    %42 = arith.mulf %21, %41 : vector<128x1xf32>
    %c1_22 = arith.constant 1 : index
    %c1_23 = arith.constant 1 : index
    %43 = memref.load %arg7[%c1_22, %c1_23] : memref<2x2xf32, #tpu.memory_space<smem>>
    %44 = vector.broadcast %43 : f32 to vector<128x1xf32>
    %45 = arith.mulf %24, %44 : vector<128x1xf32>
    %46 = arith.addf %42, %45 : vector<128x1xf32>
    %c1_24 = arith.constant 1 : index
    %47 = memref.load %arg8[%c1_24] : memref<2xf32, #tpu.memory_space<smem>>
    %48 = vector.broadcast %47 : f32 to vector<128x1xf32>
    %49 = arith.addf %46, %48 : vector<128x1xf32>
    %50 = arith.negf %49 : vector<128x1xf32>
    %51 = math.exp %50 : vector<128x1xf32>
    %cst_25 = arith.constant 1.000000e+00 : f32
    %52 = vector.broadcast %cst_25 : f32 to vector<128x1xf32>
    %53 = arith.addf %52, %51 : vector<128x1xf32>
    %54 = arith.divf %52, %53 : vector<128x1xf32>
    %55 = vector.broadcast %39 : vector<128x1xf32> to vector<128x128xf32>
    %56 = arith.mulf %12, %55 : vector<128x128xf32>
    %57 = vector.broadcast %54 : vector<128x1xf32> to vector<128x128xf32>
    %58 = arith.mulf %13, %57 : vector<128x128xf32>
    %59 = arith.addf %56, %58 : vector<128x128xf32>
    %c0_26 = arith.constant 0 : index
    %c0_27 = arith.constant 0 : index
    %60 = vector.load %arg9[%c0_26, %c0_27] : memref<128x256xf32, #tpu.memory_space<vmem>>, vector<128x256xf32>
    %cst_28 = arith.constant dense<0.000000e+00> : vector<128x256xf32>
    %61 = tpu.matmul %59, %60, %cst_28 {dimension_numbers = #tpu.dot_dimension_numbers<[1], [0], [0], [1], [0, 0, 1, 1], [], []>} : vector<128x128xf32>, vector<128x256xf32>, vector<128x256xf32> -> vector<128x256xf32>
    %c0_29 = arith.constant 0 : index
    %c0_30 = arith.constant 0 : index
    %62 = vector.load %arg10[%c0_29, %c0_30] : memref<1x256xf32, #tpu.memory_space<vmem>>, vector<1x256xf32>
    %63 = vector.broadcast %62 : vector<1x256xf32> to vector<128x256xf32>
    %64 = arith.addf %61, %63 : vector<128x256xf32>
    %65 = arith.negf %16 : vector<128x256xf32>
    %66 = math.exp %65 : vector<128x256xf32>
    %cst_31 = arith.constant 1.000000e+00 : f32
    %67 = vector.broadcast %cst_31 : f32 to vector<128x256xf32>
    %68 = arith.addf %67, %66 : vector<128x256xf32>
    %69 = arith.divf %67, %68 : vector<128x256xf32>
    %cst_32 = arith.constant 1.000000e+00 : f32
    %70 = vector.broadcast %cst_32 : f32 to vector<128x256xf32>
    %71 = arith.addf %70, %69 : vector<128x256xf32>
    %72 = arith.mulf %71, %0 : vector<128x256xf32>
    %cst_33 = arith.constant 2.000000e+00 : f32
    %73 = vector.broadcast %cst_33 : f32 to vector<128x256xf32>
    %74 = arith.subf %73, %69 : vector<128x256xf32>
    %75 = arith.mulf %74, %1 : vector<128x256xf32>
    %76 = arith.addf %72, %75 : vector<128x256xf32>
    %77 = arith.addf %64, %76 : vector<128x256xf32>
    %c0_34 = arith.constant 0 : index
    %c0_35 = arith.constant 0 : index
    %78 = vector.load %arg11[%c0_34, %c0_35] : memref<128x256xf32, #tpu.memory_space<vmem>>, vector<128x256xf32>
    tpu.vector_store %arg11[%c0_34, %c0_35], %77 {strides = array<i32>} : memref<128x256xf32, #tpu.memory_space<vmem>>, vector<128x256xf32>,
    return
  }
  func.func @transform_0(%arg0: i32) -> (i32, i32) {
    %c0_i32 = arith.constant 0 : i32
    %c0_i32_0 = arith.constant 0 : i32
    return %arg0, %c0_i32 : i32, i32
  }
  func.func @transform_1(%arg0: i32) -> (i32, i32) {
    %c0_i32 = arith.constant 0 : i32
    %c0_i32_0 = arith.constant 0 : i32
    return %arg0, %c0_i32 : i32, i32
  }
  func.func @transform_2(%arg0: i32) -> (i32, i32) {
    %c0_i32 = arith.constant 0 : i32
    %c0_i32_0 = arith.constant 0 : i32
    %c0_i32_1 = arith.constant 0 : i32
    return %c0_i32, %c0_i32_0 : i32, i32
  }
  func.func @transform_3(%arg0: i32) -> (i32, i32) {
    %c0_i32 = arith.constant 0 : i32
    %c0_i32_0 = arith.constant 0 : i32
    %c0_i32_1 = arith.constant 0 : i32
    return %c0_i32, %c0_i32_0 : i32, i32
  }
  func.func @transform_4(%arg0: i32) -> (i32, i32) {
    %c0_i32 = arith.constant 0 : i32
    %c0_i32_0 = arith.constant 0 : i32
    %c0_i32_1 = arith.constant 0 : i32
    return %c0_i32, %c0_i32_0 : i32, i32
  }
  func.func @transform_5(%arg0: i32) -> (i32, i32) {
    %c0_i32 = arith.constant 0 : i32
    %c0_i32_0 = arith.constant 0 : i32
    %c0_i32_1 = arith.constant 0 : i32
    return %c0_i32, %c0_i32_0 : i32, i32
  }
  func.func @transform_6(%arg0: i32) -> (i32, i32) {
    %c0_i32 = arith.constant 0 : i32
    %c0_i32_0 = arith.constant 0 : i32
    %c0_i32_1 = arith.constant 0 : i32
    return %c0_i32, %c0_i32_0 : i32, i32
  }
  func.func @transform_7(%arg0: i32) -> i32 {
    %c0_i32 = arith.constant 0 : i32
    %c0_i32_0 = arith.constant 0 : i32
    return %c0_i32 : i32
  }
  func.func @transform_8(%arg0: i32) -> (i32, i32) {
    %c0_i32 = arith.constant 0 : i32
    %c0_i32_0 = arith.constant 0 : i32
    %c0_i32_1 = arith.constant 0 : i32
    return %c0_i32, %c0_i32_0 : i32, i32
  }
  func.func @transform_9(%arg0: i32) -> (i32, i32) {
    %c0_i32 = arith.constant 0 : i32
    %c0_i32_0 = arith.constant 0 : i32
    %c0_i32_1 = arith.constant 0 : i32
    return %c0_i32, %c0_i32_0 : i32, i32
  }
  func.func @transform_10(%arg0: i32) -> (i32, i32) {
    %c0_i32 = arith.constant 0 : i32
    %c0_i32_0 = arith.constant 0 : i32
    return %arg0, %c0_i32 : i32, i32
  }
}

</mosaic_0001>

<bundles_post_ra>
// kernel: lsk_forward.1
= control target key start
LH: loop header
LB: loop body
LE: loop exit
PB: predicated region body
PF: predicated region fallthrough
CT: control target
= control target key end

     0   :  { %s5439_s0 = inlined_call_operand.hbm [shape: f32[512,256], index: 0, kind: input, shape index: {}]   ;;  %s5440_s1 = inlined_call_operand.hbm [shape: f32[512,256], index: 1, kind: input, shape index: {}]   ;;  %s5441_s2 = inlined_call_operand.hbm [shape: f32[256,384], index: 2, kind: input, shape index: {}]   ;;  %s5442_s3 = inlined_call_operand.vmem [shape: f32[1,384], index: 3, kind: input, shape index: {}]   ;;  %s5443_s4 = inlined_call_operand.hbm [shape: f32[256,384], index: 4, kind: input, shape index: {}]   ;;  %s5444_s5 = inlined_call_operand.vmem [shape: f32[1,384], index: 5, kind: input, shape index: {}]   ;;  %s5445_s6 = inlined_call_operand.vmem [shape: f32[2,2], index: 6, kind: input, shape index: {}]   ;;  %s5446_s7 = inlined_call_operand.vmem [shape: f32[2], index: 7, kind: input, shape index: {}]   ;;  %s5447_s8 = inlined_call_operand.hbm [shape: f32[128,256], index: 8, kind: input, shape index: {}]   ;;  %s5448_s9 = inlined_call_operand.vmem [shape: f32[1,256], index: 9, kind: input, shape index: {}]   ;;  %s5449_s10 = inlined_call_operand.hbm [shape: f32[512,256], index: 10, kind: output, shape index: {}]  }
   0x1   :  { %5472 = sst [smem:[#allocation65_spill]] %s5439_s0 }
   0x2   :  { %5473 = sst [smem:[#allocation66_spill]] %s5441_s2 }
   0x3   :  { %5474 = sst [smem:[#allocation67_spill]] %s5443_s4 }
   0x4   :  { %5475 = sst [smem:[#allocation68_spill]] %s5445_s6 }
   0x5   :  { %5476 = sst [smem:[#allocation69_spill]] %s5446_s7 }
   0x6   :  { %5477 = sst [smem:[#allocation70_spill]] %s5447_s8 }
   0x7   :  { %5478 = sst [smem:[#allocation71_spill]] %s5449_s10 }
   0x8   :  { %15 = vsyncpa [#allocation3], 0 }
   0x9   :  { %17 = vsyncpa [#allocation3 + $0x1], 0 }
   0xa   :  { %18 = vsyncpa [#allocation7], 0 }
   0xb   :  { %20 = vsyncpa [#allocation7 + $0x1], 0 }
   0xc   :  { %21 = vsyncpa [#allocation10], 0 }
   0xd   :  { %22 = vsyncpa [#allocation5], 0 }
   0xe   :  { %23 = vsyncpa [#allocation13], 0 }
   0xf   :  { %24 = vsyncpa [#allocation4], 0 }
  0x10   :  { %26 = vsyncpa [#allocation4 + $0x1], 0  ;;  %s3971_s13 = smov 0   ;;  %s3973_s14 = smov 0  }
  0x11   :  { %s3975_s15 = smov 0   ;;  %s3977_s16 = smov 0  }
  0x12 LB: > { %5479 = sst [smem:[#allocation24_spill]] %s3895_s15  ;;  %s3901_s17 = smov [#allocation8]   ;;  %s3899_s16 = sphi %s3977_s16, %s5595_s16   ;;  %s3895_s15 = sphi %s3975_s15, %s5592_s15   ;;  %s3891_s14 = sphi %s3973_s14, %s5594_s14   ;;  %s3887_s13 = sphi %s3971_s13, %s5593_s13  }
  0x13   : > { %s295_s18 = sshll.u32 %s3901_s17, 4  ;;  %s3992_s19 = sadd.s32 4294967295, %s3899_s16   ;;  %s3997_s18 = int_to_ptr.vmem [resolvable:$true] %s295_s18 }
  0x14   : > { %p2702_p0 = scmp.ge.s32.totalorder %s3899_s16, 1  ;;  %p5451_p1 = scmp.eq.s32.totalorder %s3992_s19, 0 }
  0x15   : > { %p283_p2 = scmp.lt.s32.totalorder %s3899_s16, 5  ;;  %s3902_s21 = smov [#allocation9]  }
  0x16   : > { %s311_s22 = sshll.u32 %s3902_s21, 4  ;;  %s5481_s6 = sld [smem:[#allocation68_spill]]  ;;  %s4014_s22 = int_to_ptr.vmem [resolvable:$true] %s311_s22 }
  0x17   : > { %p3999_p3 = pnand %p2702_p0, %p283_p2  ;;  %s5483_s7 = sld [smem:[#allocation69_spill]] }
  0x18   : > { %s5484_s2 = sld [smem:[#allocation66_spill]] }
  0x19   : > { %s5480_s20 = scalar_select %p3999_p3, 1, 0 }
  0x1a   : > { %p3232_p4 = pneg %p3999_p3 }
  0x1c   : > { %s328_s25 = sshll.u32 %s5481_s6, 4  ;;  %p4010_p5 = pnand %p3232_p4, %p5451_p1  ;;  %s4016_s25 = int_to_ptr.vmem [resolvable:$true] %s328_s25 }
  0x1e   : > { %s3635_s12 = scalar_lea.hbm %s5484_s2, 12288  ;;  %p4029_p7 = pneg %p4010_p5 }
  0x1f   : > { %p3636_p6 = scmp.ne.s32.totalorder %s5484_s2, %s3635_s12  ;;  %p3642_p10 = scmp.lt.u32.totalorder %s3635_s12, %s5484_s2 }
  0x21   : > { %p3638_p8 = pnand %p4029_p7, %p3636_p6 }
  0x23   : > { %p3639_p9 = pneg %p3638_p8 }
  0x25   : > { %p3644_p11 = pnand %p3642_p10, %p3639_p9 }
  0x27   : > { %3647 = shalt.err (!%p3644_p11)
}
  0x28   : > { %s3648_s28 = scalar_lea.vmem %s3997_s18, 12288  ;;  %p3656_p2 = scmp.lt.s32.totalorder %s3997_s18, %s3997_s18 }
  0x29   : > { %p3649_p12 = scmp.ne.s32.totalorder %s3997_s18, %s3648_s28  ;;  %p3657_p4 = scmp.lt.s32.totalorder %s3648_s28, %s3648_s28 }
  0x2b   : > { %p3651_p13 = pnand %p3649_p12, %p4029_p7  ;;  %p3658_p6 = por %p3657_p4, %p3656_p2 }
  0x2d   : > { %p3652_p0 = pneg %p3651_p13 }
  0x2f   : > { %p3659_p8 = pnand %p3658_p6, %p3652_p0 }
  0x31   : > { %3662 = shalt.err (!%p3659_p8)
}
  0x32   : > { %s3903_s30 = smov 384   ;;  %s3904_s11 = smov 24  }
  0x33   : > { %3235 = dma.hbm_to_vmem [thread:$0]  (!%p4010_p5), %s5484_s2, 12288, %s3997_s18, [#allocation7], %s3903_s30, %s3903_s30, %s3904_s11  }
  0x34   : > { %s5486_s4 = sld [smem:[#allocation67_spill]] }
  0x3a   : > { %s3663_s27 = scalar_lea.hbm %s5486_s4, 12288 }
  0x3b   : > { %p3664_p9 = scmp.ne.s32.totalorder %s5486_s4, %s3663_s27  ;;  %p3670_p12 = scmp.lt.u32.totalorder %s3663_s27, %s5486_s4 }
  0x3d   : > { %p3666_p10 = pnand %p3664_p9, %p4029_p7 }
  0x3f   : > { %p3667_p11 = pneg %p3666_p10 }
  0x41   : > { %p3672_p13 = pnand %p3670_p12, %p3667_p11 }
  0x43   : > { %3675 = shalt.err (!%p3672_p13)
}
  0x44   : > { %s3676_s18 = scalar_lea.vmem %s4014_s22, 12288  ;;  %p3684_p6 = scmp.lt.s32.totalorder %s4014_s22, %s4014_s22 }
  0x45   : > { %p3677_p0 = scmp.ne.s32.totalorder %s4014_s22, %s3676_s18  ;;  %p3685_p8 = scmp.lt.s32.totalorder %s3676_s18, %s3676_s18 }
  0x47   : > { %p3679_p2 = pnand %p3677_p0, %p4029_p7  ;;  %p3686_p9 = por %p3685_p8, %p3684_p6 }
  0x49   : > { %p3680_p4 = pneg %p3679_p2 }
  0x4b   : > { %p3687_p10 = pnand %p3686_p9, %p3680_p4 }
  0x4d   : > { %3690 = shalt.err (!%p3687_p10)
}
  0x4e   : > { %3238 = dma.hbm_to_vmem [thread:$0]  (!%p4010_p5), %s5486_s4, 12288, %s4014_s22, [#allocation10], %s3903_s30, %s3903_s30, %s3904_s11  }
  0x4f   : > { %s3691_s29 = scalar_lea.vmem %s4016_s25, 32  ;;  %p3699_p0 = scmp.lt.s32.totalorder %s4016_s25, %s4016_s25 }
  0x50   : > { %p3692_p11 = scmp.ne.s32.totalorder %s4016_s25, %s3691_s29  ;;  %p3700_p2 = scmp.lt.s32.totalorder %s3691_s29, %s3691_s29 }
  0x52   : > { %p3694_p12 = pnand %p3692_p11, %p4029_p7  ;;  %p3701_p4 = por %p3700_p2, %p3699_p0 }
  0x54   : > { %p3695_p13 = pneg %p3694_p12 }
  0x56   : > { %p3702_p6 = pnand %p3701_p4, %p3695_p13 }
  0x58   : > { %3705 = shalt.err (!%p3702_p6)
}
  0x59   : > { %s3905_s12 = smov [#allocation11]   ;;  %s5487_s22 = sshll.u32 %s5483_s7, 4  ;;  %s340_s22 = int_to_ptr.vmem [resolvable:$true] %s5487_s22 }
  0x5a   : > { %3241 = dma.vmem_to_smem (!%p4010_p5), %s4016_s25, 32, %s3905_s12, [#allocation5]  }
  0x5b   : > { %s3706_s30 = scalar_lea.vmem %s340_s22, 16  ;;  %p3714_p11 = scmp.lt.s32.totalorder %s340_s22, %s340_s22 }
  0x5c   : > { %p3707_p8 = scmp.ne.s32.totalorder %s340_s22, %s3706_s30  ;;  %p3715_p12 = scmp.lt.s32.totalorder %s3706_s30, %s3706_s30 }
  0x5e   : > { %p3709_p9 = pnand %p3707_p8, %p4029_p7  ;;  %p3716_p13 = por %p3715_p12, %p3714_p11 }
  0x60   : > { %p3710_p10 = pneg %p3709_p9 }
  0x62   : > { %p3717_p0 = pnand %p3716_p13, %p3710_p10 }
  0x64   : > { %3720 = shalt.err (!%p3717_p0)
}
  0x65   : > { %s3906_s11 = smov [#allocation12]   ;;  %s3907_s25 = smov [#allocation14]  }
  0x66   : > { %3244 = dma.vmem_to_smem (!%p4010_p5), %s340_s22, 16, %s3906_s11, [#allocation13]  }
  0x67   : > { %s349_s24 = sshll.u32 %s3907_s25, 4  ;;  %s5488_s8 = sld [smem:[#allocation70_spill]]  ;;  %s350_s24 = int_to_ptr.vmem [resolvable:$true] %s349_s24 }
  0x6d   : > { %s3721_s18 = scalar_lea.hbm %s5488_s8, 4096 }
  0x6e   : > { %p3722_p2 = scmp.ne.s32.totalorder %s5488_s8, %s3721_s18  ;;  %p3728_p8 = scmp.lt.u32.totalorder %s3721_s18, %s5488_s8 }
  0x70   : > { %p3724_p4 = pnand %p3722_p2, %p4029_p7 }
  0x72   : > { %p3725_p6 = pneg %p3724_p4 }
  0x74   : > { %p3730_p9 = pnand %p3728_p8, %p3725_p6 }
  0x76   : > { %3733 = shalt.err (!%p3730_p9)
}
  0x77   : > { %s3734_s17 = scalar_lea.vmem %s350_s24, 4096  ;;  %p3742_p13 = scmp.lt.s32.totalorder %s350_s24, %s350_s24 }
  0x78   : > { %p3735_p10 = scmp.ne.s32.totalorder %s350_s24, %s3734_s17  ;;  %p3743_p0 = scmp.lt.s32.totalorder %s3734_s17, %s3734_s17 }
  0x7a   : > { %p3737_p11 = pnand %p3735_p10, %p4029_p7  ;;  %p3744_p1 = por %p3743_p0, %p3742_p13 }
  0x7c   : > { %p3738_p12 = pneg %p3737_p11 }
  0x7e   : > { %p3745_p3 = pnand %p3744_p1, %p3738_p12 }
  0x80   : > { %3748 = shalt.err (!%p3745_p3)
}
  0x81   : > { %s5453_s21 = smov 256   ;;  %s5455_s23 = smov 16  }
  0x82   : > { %3247 = dma.hbm_to_vmem [thread:$0]  (!%p4010_p5), %s5488_s8, 4096, %s350_s24, [#allocation10], %s5453_s21, %s5453_s21, %s5455_s23  }
  0x83   : > { %s2701_s11 = sadd.s32 4294967294, %s3899_s16   ;;  %s4113_s25 = sadd.s32 1, %s3899_s16  }
  0x84   : > { %s39_s27 = sadd.s32 1, %s3895_s15  ;;  %s36_s28 = ssub.s32 %s3899_s16, %s4113_s25 }
  0x85   : > { %p46_p1 = scmp.ne.s32.totalorder %s3895_s15, %s3891_s14  ;;  %p37_p3 = scmp.eq.s32.totalorder %s36_s28, 0 }
  0x86   : > { %p47_p7 = scmp.eq.s32.totalorder %s3899_s16, 0  ;;  %p52_p2 = scmp.ne.s32.totalorder %s3891_s14, %s3887_s13 }
  0x87   : > { %p270_p4 = scmp.eq.s32.totalorder %s3992_s19, 3  ;;  %p5490_p8 = scmp.eq.s32.totalorder %s3992_s19, 0 }
  0x88   : > { %s4125_s26 = scalar_select %p37_p3, %s3895_s15, %s39_s27  }
  0x89   : > { %p48_p6 = por %p47_p7, %p46_p1  ;;  %p4129_p9 = por %p5490_p8, %p52_p2 }
  0x8a   : > { %5489 = sst [smem:[#allocation25_spill]] %s4125_s26  ;;  %p4133_p5 = por %p270_p4, %p46_p1 }
  0x8b   : > { %p276_p10 = scmp.eq.s32.totalorder %s2701_s11, 3  ;;  %p3264_p11 = scmp.lt.s32.totalorder %s3899_s16, 4 }
  0x8c   : > { %s5492_s24 = scalar_select %p4133_p5, 1, 0 }
  0x8d   : > { %s366_s6 = sand.u32 1, %s3895_s15   ;;  %p4139_p12 = por %p276_p10, %p52_p2 }
  0x8e   : > { %s4143_s29 = sshll.u32 %s366_s6, 8  ;;  %s2801_s12 = sshll.u32 %s3899_s16, 12 }
  0x8f   : > { %s5493_s10 = scalar_select %p4139_p12, 1, 0 }
  0x90   : > { %s5494_s0 = sld [smem:[#allocation65_spill]]  ;;  %s370_s11 = scalar_lea.vmem [#allocation2], %s4143_s29 }
  0x91   : > { %s378_s27 = sshll.u32 %s370_s11, 4  ;;  %p4152_p13 = pnand %p3264_p11, %p48_p6  ;;  %s4156_s27 = int_to_ptr.vmem [resolvable:$true] %s378_s27 }
  0x92   : > { %s4161_s17 = scalar_lea.hbm %s5440_s1, %s2801_s12  ;;  %s4163_s22 = scalar_lea.sflag [#allocation3], %s366_s6 }
  0x93   : > { %p3751_p1 = pneg %p4152_p13 }
  0x96   : > { %s4149_s30 = scalar_lea.hbm %s5494_s0, %s2801_s12  ;;  %s3754_s7 = scalar_lea.hbm %s5494_s0, 16384 }
  0x97   : > { %s3749_s2 = scalar_lea.hbm %s4149_s30, 4096  ;;  %p3755_p2 = scmp.lt.u32.totalorder %s4149_s30, %s5494_s0 }
  0x98   : > { %p3750_p0 = scmp.ne.s32.totalorder %s4149_s30, %s3749_s2  ;;  %p3756_p4 = scmp.lt.u32.totalorder %s3754_s7, %s3749_s2 }
  0x99   : > { %p3758_p8 = scmp.lt.u32.totalorder %s3749_s2, %s4149_s30 }
  0x9a   : > { %p3752_p3 = pnand %p3751_p1, %p3750_p0  ;;  %p3757_p6 = por %p3756_p4, %p3755_p2 }
  0x9c   : > { %p3753_p7 = pneg %p3752_p3  ;;  %p3759_p10 = por %p3758_p8, %p3757_p6 }
  0x9e   : > { %p3760_p11 = pnand %p3759_p10, %p3753_p7 }
  0xa0   : > { %3763 = shalt.err (!%p3760_p11)
}
  0xa1   : > { %s3764_s21 = scalar_lea.vmem %s4156_s27, 4096  ;;  %s3910_s4 = smov [#allocation2]  }
  0xa2   : > { %p3765_p0 = scmp.ne.s32.totalorder %s4156_s27, %s3764_s21  ;;  %s3769_s23 = sshll.u32 %s3910_s4, 4  ;;  %s3770_s23 = int_to_ptr.vmem [resolvable:$false] %s3769_s23 }
  0xa3   : > { %s3771_s8 = scalar_lea.vmem %s3770_s23, 8192  ;;  %p3772_p5 = scmp.lt.s32.totalorder %s4156_s27, %s3770_s23 }
  0xa4   : > { %p3767_p3 = pnand %p3765_p0, %p3751_p1  ;;  %p3773_p2 = scmp.lt.s32.totalorder %s3771_s8, %s3764_s21 }
  0xa6   : > { %p3768_p12 = pneg %p3767_p3  ;;  %p3774_p4 = por %p3773_p2, %p3772_p5 }
  0xa8   : > { %p3775_p6 = pnand %p3774_p4, %p3768_p12 }
  0xaa   : > { %3778 = shalt.err (!%p3775_p6)
}
  0xab   : > { %s5496_s2 = smov 16   ;;  %s5497_s7 = smov 256  }
  0xac   : > { %3251 = dma.hbm_to_vmem [thread:$0]  (!%p4152_p13), %s4149_s30, 4096, %s4156_s27, %s4163_s22, %s5497_s7, %s5497_s7, %s5496_s2  }
  0xad   : > { %s392_s26 = scalar_lea.vmem [#allocation6], %s4143_s29  ;;  %s388_s12 = sand.u32 1, %s3899_s16  }
  0xae   : > { %s400_s6 = sshll.u32 %s392_s26, 4  ;;  %s4198_s11 = scalar_lea.sflag [#allocation7], %s388_s12  ;;  %s4196_s6 = int_to_ptr.vmem [resolvable:$true] %s400_s6 }
  0xaf   : > { %s3779_s21 = scalar_lea.hbm %s4161_s17, 4096  ;;  %s3784_s8 = scalar_lea.hbm %s5440_s1, 16384 }
  0xb0   : > { %p3780_p5 = scmp.ne.s32.totalorder %s4161_s17, %s3779_s21  ;;  %p3785_p8 = scmp.lt.u32.totalorder %s4161_s17, %s5440_s1 }
  0xb1   : > { %p3786_p10 = scmp.lt.u32.totalorder %s3784_s8, %s3779_s21  ;;  %p3788_p0 = scmp.lt.u32.totalorder %s3779_s21, %s4161_s17 }
  0xb2   : > { %p3782_p12 = pnand %p3780_p5, %p3751_p1 }
  0xb3   : > { %p3787_p11 = por %p3786_p10, %p3785_p8 }
  0xb4   : > { %p3783_p7 = pneg %p3782_p12 }
  0xb5   : > { %p3789_p3 = por %p3788_p0, %p3787_p11 }
  0xb7   : > { %p3790_p2 = pnand %p3789_p3, %p3783_p7 }
  0xb9   : > { %3793 = shalt.err (!%p3790_p2)
}
  0xba   : > { %s3794_s29 = scalar_lea.vmem %s4196_s6, 4096  ;;  %s3911_s30 = smov [#allocation6]  }
  0xbb   : > { %p3795_p4 = scmp.ne.s32.totalorder %s4196_s6, %s3794_s29  ;;  %s3799_s27 = sshll.u32 %s3911_s30, 4  ;;  %s3800_s27 = int_to_ptr.vmem [resolvable:$false] %s3799_s27 }
  0xbc   : > { %s3801_s0 = scalar_lea.vmem %s3800_s27, 8192  ;;  %p3802_p12 = scmp.lt.s32.totalorder %s4196_s6, %s3800_s27 }
  0xbd   : > { %p3797_p6 = pnand %p3795_p4, %p3751_p1  ;;  %p3803_p8 = scmp.lt.s32.totalorder %s3801_s0, %s3794_s29 }
  0xbf   : > { %p3798_p5 = pneg %p3797_p6  ;;  %p3804_p10 = por %p3803_p8, %p3802_p12 }
  0xc1   : > { %p3805_p11 = pnand %p3804_p10, %p3798_p5 }
  0xc3   : > { %3808 = shalt.err (!%p3805_p11)
}
  0xc4   : > { %3254 = dma.hbm_to_vmem [thread:$0]  (!%p4152_p13), %s4161_s17, 4096, %s4196_s6, %s4198_s11, %s5497_s7, %s5497_s7, %s5496_s2  }
  0xc5   : > { %p5498_p1 = scmp.ne.s32.totalorder %s5480_s20, 0 }
  0xc7   : > { %412 = sbr.rel (%p5498_p1) target bundleno = 1045 (0x415), region = 60 }
  0xce   : > { %s4230_s15 = sand.u32 1, %s3891_s14  }
  0xcf   : > { %s4233_s22 = sshll.u32 %s4230_s15, 8  ;;  %s415_s28 = scalar_lea.sflag [#allocation3], %s4230_s15 }
  0xd0   : > { %s4237_s26 = scalar_lea.vmem [#allocation2], %s4233_s22 }
  0xd1   : > { %3854 = dma.done.wait (%p4129_p9), %s415_s28, 4096  }
  0xd2   : > { %3856 = vsyncadd (%p4129_p9), %s415_s28, 4294963200  ;;  %s423_s20 = sand.u32 1, %s3992_s19   ;;  %s4245_s2 = scalar_lea.vmem [#allocation6], %s4233_s22 }
  0xd3   : > { %s424_s17 = scalar_lea.sflag [#allocation7], %s423_s20 }
  0xd4   : > { %3858 = dma.done.wait (%p4129_p9), %s424_s17, 4096  }
  0xd5   : > { %3860 = vsyncadd (%p4129_p9), %s424_s17, 4294963200  ;;  %p5499_p13 = scmp.eq.s32.totalorder %s3992_s19, 0 }
  0xd7   : > { %3862 = dma.done.wait (%p5499_p13), [#allocation7], 12288   ;;  %p5500_p7 = pmov %p5499_p13 }
  0xd9   : > { %3864 = vsyncadd (%p5500_p7), [#allocation7], 4294955008  ;;  %p5501_p0 = pmov %p5500_p7 }
  0xdb   : > { %3866 = dma.done.wait (%p5501_p0), [#allocation10], 12288   ;;  %p5502_p3 = pmov %p5501_p0 }
  0xdc   : > { %p5503_p2 = pmov %p5501_p0 }
  0xdd   : > { %3868 = vsyncadd (%p5502_p3), [#allocation10], 4294955008 }
  0xde   : > { %3870 = dma.done.wait (%p5503_p2), [#allocation5], 32   ;;  %p5504_p4 = pmov %p5501_p0 }
  0xdf   : > { %p5505_p9 = pmov %p5501_p0 }
  0xe0   : > { %3872 = vsyncadd (%p5504_p4), [#allocation5], 4294967264 }
  0xe1   : > { %3874 = dma.done.wait (%p5505_p9), [#allocation13], 16   ;;  %p5506_p6 = pmov %p5501_p0 }
  0xe2   : > { %p5507_p5 = pmov %p5501_p0 }
  0xe3   : > { %3876 = vsyncadd (%p5506_p6), [#allocation13], 4294967280 }
  0xe4   : > { %3878 = dma.done.wait (%p5507_p5), [#allocation10], 4096   ;;  %p5508_p12 = pmov %p5501_p0 }
  0xe6   : > { %3880 = vsyncadd (%p5508_p12), [#allocation10], 4294963200 }
  0xe7   : > { %452 = sfence }
  0xe8   : > { %v558_v0 = vld [vmem:[#allocation8 + $0x8] sm:$0xff]  ;;  %v561_v1 = vld [vmem:[#allocation8 + $0x20] sm:$0xff]  ;;  %v607_v2 = vld [vmem:[#allocation8 + $0x190] sm:$0xff]  ;;  %s1539_s11 = sld [smem:[#allocation11]]  ;;  %s2726_s4 = sld [smem:[#allocation11 + $0x1]] }
  0xe9   : > { %v2966_v3 = vpack.c.bf16 %v561_v1, %v558_v0  ;;  %v610_v4 = vld [vmem:[#allocation8 + $0x1a8] sm:$0xff]  ;;  %v557_v5 = vld [vmem:[#allocation8] sm:$0xff]  ;;  %v560_v6 = vld [vmem:[#allocation8 + $0x18] sm:$0xff]  ;;  %s2743_s21 = sld [smem:[#allocation11 + $0x80]]  ;;  %s2744_s23 = sld [smem:[#allocation11 + $0x81]] }
  0xea   : > { %v3030_v7 = vpack.c.bf16 %v610_v4, %v607_v2  ;;  %v2968_v8 = vpack.c.bf16 %v560_v6, %v557_v5  ;;  %v559_v9 = vld [vmem:[#allocation8 + $0x10] sm:$0xff]  ;;  %v562_v10 = vld [vmem:[#allocation8 + $0x28] sm:$0xff]  ;;  %v564_v11 = vld [vmem:[#allocation8 + $0x38] sm:$0xff]  ;;  %s1591_s8 = sld [smem:[#allocation12]]  ;;  %s2745_s29 = sld [smem:[#allocation12 + $0x1]] }
  0xeb   : > { %2967 = vmatprep.subr.bf16.mxu0 %v2966_v3  ;;  %v3032_v12 = vpack.c.bf16 %v562_v10, %v559_v9  ;;  %v567_v13 = vld [vmem:[#allocation8 + $0x50] sm:$0xff]  ;;  %v613_v14 = vld [vmem:[#allocation8 + $0x1c0] sm:$0xff]  ;;  %v616_v15 = vld [vmem:[#allocation8 + $0x1d8] sm:$0xff]  ;;  %s5179_s0 = scalar_lea.vmem [#allocation15], %s4233_s22  ;;  %s2805_s22 = sshll.u32 %s3992_s19, 12 }
  0xec   : > { %3031 = vmatprep.subr.bf16.mxu1 %v3030_v7  ;;  %2969 = vmatpush1.bf16.msra.mxu0 %v2968_v8  ;;  %v2970_v16 = vpack.c.bf16 %v567_v13, %v564_v11  ;;  %v3034_v17 = vpack.c.bf16 %v616_v15, %v613_v14  ;;  %v563_v18 = vld [vmem:[#allocation8 + $0x30] sm:$0xff]  ;;  %v566_v19 = vld [vmem:[#allocation8 + $0x48] sm:$0xff]  ;;  %v565_v20 = vld [vmem:[#allocation8 + $0x40] sm:$0xff]  ;;  %s2555_s28 = sshll.u32 %s5179_s0, 4  ;;  %s5588_s17 = sld [smem:[#allocation71_spill]]  ;;  %s5394_s28 = int_to_ptr.vmem [resolvable:$true] %s2555_s28 }
  0xed   : > { %3033 = vmatpush3.bf16.msra.mxu1 %v3032_v12  ;;  %v2972_v21 = vpack.c.bf16 %v566_v19, %v563_v18  ;;  %v568_v22 = vld [vmem:[#allocation8 + $0x58] sm:$0xff]  ;;  %v570_v23 = vld [vmem:[#allocation8 + $0x68] sm:$0xff]  ;;  %v573_v24 = vld [vmem:[#allocation8 + $0x80] sm:$0xff]  ;;  %s2541_s19 = scalar_lea.sflag [#allocation4], %s4230_s15  ;;  %s3809_s18 = scalar_lea.vmem %s5394_s28, 4096 }
  0xee   : > { %2971 = vmatprep.subr.bf16.mxu0 %v2970_v16  ;;  %3035 = vmatprep.subr.bf16.mxu1 %v3034_v17  ;;  %v3036_v25 = vpack.c.bf16 %v568_v22, %v565_v20  ;;  %v2974_v26 = vpack.c.bf16 %v573_v24, %v570_v23  ;;  %v619_v27 = vld [vmem:[#allocation8 + $0x1f0] sm:$0xff]  ;;  %v622_v28 = vld [vmem:[#allocation8 + $0x208] sm:$0xff]  ;;  %v569_v29 = vld [vmem:[#allocation8 + $0x60] sm:$0xff]  ;;  %p3810_p8 = scmp.ne.s32.totalorder %s5394_s28, %s3809_s18  ;;  %p5589_p10 = scmp.ne.s32.totalorder %s5492_s24, 0 }
  0xef   : > { %v3038_v30 = vpack.c.bf16 %v622_v28, %v619_v27  ;;  %v572_v31 = vld [vmem:[#allocation8 + $0x78] sm:$0xff]  ;;  %v571_v32 = vld [vmem:[#allocation8 + $0x70] sm:$0xff]  ;;  %v574_v33 = vld [vmem:[#allocation8 + $0x88] sm:$0xff]  ;;  %s3913_s7 = smov [#allocation15]  }
  0xf0   : > { %2973 = vmatpush1.bf16.msra.mxu0 %v2972_v21  ;;  %v2976_v34 = vpack.c.bf16 %v572_v31, %v569_v29  ;;  %v576_v35 = vld [vmem:[#allocation8 + $0x98] sm:$0xff]  ;;  %v579_v36 = vld [vmem:[#allocation8 + $0xb0] sm:$0xff]  ;;  %v625_v37 = vld [vmem:[#allocation8 + $0x220] sm:$0xff]  ;;  %v3040_v38 = vpack.c.bf16 %v574_v33, %v571_v32  ;;  %p3811_p11 = pnand %p3810_p8, %p5589_p10  ;;  %s3813_s6 = sshll.u32 %s3913_s7, 4  ;;  %s3814_s6 = int_to_ptr.vmem [resolvable:$false] %s3813_s6 }
  0xf1   : > { %3037 = vmatpush3.bf16.msra.mxu1 %v3036_v25  ;;  %2975 = vmatprep.subr.bf16.mxu0 %v2974_v26  ;;  %v2978_v39 = vpack.c.bf16 %v579_v36, %v576_v35  ;;  %v628_v40 = vld [vmem:[#allocation8 + $0x238] sm:$0xff]  ;;  %v575_v41 = vld [vmem:[#allocation8 + $0x90] sm:$0xff]  ;;  %v578_v42 = vld [vmem:[#allocation8 + $0xa8] sm:$0xff]  ;;  %s3815_s12 = scalar_lea.vmem %s3814_s6, 8192  ;;  %p3816_p13 = scmp.lt.s32.totalorder %s5394_s28, %s3814_s6 }
  0xf2   : > { %3039 = vmatprep.subr.bf16.mxu1 %v3038_v30  ;;  %v3042_v43 = vpack.c.bf16 %v628_v40, %v625_v37  ;;  %v577_v44 = vld [vmem:[#allocation8 + $0xa0] sm:$0xff]  ;;  %v580_v45 = vld [vmem:[#allocation8 + $0xb8] sm:$0xff]  ;;  %v582_v46 = vld [vmem:[#allocation8 + $0xc8] sm:$0xff]  ;;  %v2980_v50 = vpack.c.bf16 %v578_v42, %v575_v41  ;;  %p3812_p1 = pneg %p3811_p11  ;;  %p3817_p7 = scmp.lt.s32.totalorder %s3815_s12, %s3809_s18 }
  0xf3   : > { %v585_v47 = vld [vmem:[#allocation8 + $0xe0] sm:$0xff]  ;;  %v631_v48 = vld [vmem:[#allocation8 + $0x250] sm:$0xff]  ;;  %v634_v49 = vld [vmem:[#allocation8 + $0x268] sm:$0xff]  ;;  %v3044_v51 = vpack.c.bf16 %v580_v45, %v577_v44 }
  0xf4   : > { %2977 = vmatpush1.bf16.msra.mxu0 %v2976_v34  ;;  %v2982_v52 = vpack.c.bf16 %v585_v47, %v582_v46  ;;  %v581_v53 = vld [vmem:[#allocation8 + $0xc0] sm:$0xff]  ;;  %v584_v54 = vld [vmem:[#allocation8 + $0xd8] sm:$0xff]  ;;  %v583_v55 = vld [vmem:[#allocation8 + $0xd0] sm:$0xff]  ;;  %v3046_v56 = vpack.c.bf16 %v634_v49, %v631_v48  ;;  %p3818_p0 = por %p3817_p7, %p3816_p13 }
  0xf5   : > { %3041 = vmatpush3.bf16.msra.mxu1 %v3040_v38  ;;  %2979 = vmatprep.subr.bf16.mxu0 %v2978_v39  ;;  %v586_v57 = vld [vmem:[#allocation8 + $0xe8] sm:$0xff]  ;;  %v588_v58 = vld [vmem:[#allocation8 + $0xf8] sm:$0xff]  ;;  %v591_v59 = vld [vmem:[#allocation8 + $0x110] sm:$0xff]  ;;  %v2984_v62 = vpack.c.bf16 %v584_v54, %v581_v53 }
  0xf6   : > { %3043 = vmatprep.subr.bf16.mxu1 %v3042_v43  ;;  %v637_v60 = vld [vmem:[#allocation8 + $0x280] sm:$0xff]  ;;  %v640_v61 = vld [vmem:[#allocation8 + $0x298] sm:$0xff]  ;;  %v3048_v63 = vpack.c.bf16 %v586_v57, %v583_v55  ;;  %v2986_v0 = vpack.c.bf16 %v591_v59, %v588_v58  ;;  %v587_v1 = vld [vmem:[#allocation8 + $0xf0] sm:$0xff]  ;;  %p3819_p3 = pnand %p3818_p0, %p3812_p1 }
  0xf7   : > { %v590_v2 = vld [vmem:[#allocation8 + $0x108] sm:$0xff]  ;;  %v589_v3 = vld [vmem:[#allocation8 + $0x100] sm:$0xff]  ;;  %v3050_v4 = vpack.c.bf16 %v640_v61, %v637_v60  ;;  %v592_v5 = vld [vmem:[#allocation8 + $0x118] sm:$0xff] }
  0xf8   : > { %2981 = vmatpush1.bf16.msra.mxu0 %v2980_v50  ;;  %v594_v6 = vld [vmem:[#allocation8 + $0x128] sm:$0xff]  ;;  %v597_v7 = vld [vmem:[#allocation8 + $0x140] sm:$0xff]  ;;  %v643_v8 = vld [vmem:[#allocation8 + $0x2b0] sm:$0xff]  ;;  %v2988_v10 = vpack.c.bf16 %v590_v2, %v587_v1  ;;  %v3052_v12 = vpack.c.bf16 %v592_v5, %v589_v3 }
  0xf9   : > { %3045 = vmatpush3.bf16.msra.mxu1 %v3044_v51  ;;  %2983 = vmatprep.subr.bf16.mxu0 %v2982_v52  ;;  %v646_v9 = vld [vmem:[#allocation8 + $0x2c8] sm:$0xff]  ;;  %v593_v11 = vld [vmem:[#allocation8 + $0x120] sm:$0xff]  ;;  %v2990_v13 = vpack.c.bf16 %v597_v7, %v594_v6  ;;  %v596_v14 = vld [vmem:[#allocation8 + $0x138] sm:$0xff] }
  0xfa   : > { %3047 = vmatprep.subr.bf16.mxu1 %v3046_v56  ;;  %v595_v15 = vld [vmem:[#allocation8 + $0x130] sm:$0xff]  ;;  %v494_v16 = vld [vmem:[%s4237_s26 + $0x8] sm:$0xff]  ;;  %v3054_v17 = vpack.c.bf16 %v646_v9, %v643_v8  ;;  %v600_v19 = vld [vmem:[#allocation8 + $0x158] sm:$0xff]  ;;  %v2992_v23 = vpack.c.bf16 %v596_v14, %v593_v11 }
  0xfb   : > { %v598_v18 = vld [vmem:[#allocation8 + $0x148] sm:$0xff]  ;;  %v603_v20 = vld [vmem:[#allocation8 + $0x170] sm:$0xff]  ;;  %895 = vmatprep.mubr.f32.mxu1 %v494_v16  ;;  %v649_v21 = vld [vmem:[#allocation8 + $0x2e0] sm:$0xff]  ;;  %734 = vmatprep.mubr.f32.mxu0 %v494_v16 }
  0xfc   : > { %2985 = vmatpush1.bf16.msra.mxu0 %v2984_v62  ;;  %v652_v22 = vld [vmem:[#allocation8 + $0x2f8] sm:$0xff]  ;;  %v3056_v24 = vpack.c.bf16 %v598_v18, %v595_v15  ;;  %v2994_v25 = vpack.c.bf16 %v603_v20, %v600_v19  ;;  %v599_v26 = vld [vmem:[#allocation8 + $0x150] sm:$0xff]  ;;  %v602_v27 = vld [vmem:[#allocation8 + $0x168] sm:$0xff] }
  0xfd   : > { %3049 = vmatpush3.bf16.msra.mxu1 %v3048_v63  ;;  %2987 = vmatprep.subr.bf16.mxu0 %v2986_v0  ;;  %v601_v28 = vld [vmem:[#allocation8 + $0x160] sm:$0xff]  ;;  %v3058_v29 = vpack.c.bf16 %v652_v22, %v649_v21  ;;  %v604_v30 = vld [vmem:[#allocation8 + $0x178] sm:$0xff]  ;;  %v606_v31 = vld [vmem:[#allocation8 + $0x188] sm:$0xff]  ;;  %v2996_v35 = vpack.c.bf16 %v602_v27, %v599_v26 }
  0xfe   : > { %3051 = vmatprep.subr.bf16.mxu1 %v3050_v4  ;;  %v609_v32 = vld [vmem:[#allocation8 + $0x1a0] sm:$0xff]  ;;  %v977_v33 = vld [vmem:[#allocation9 + $0x8] sm:$0xff]  ;;  %v3060_v36 = vpack.c.bf16 %v604_v30, %v601_v28  ;;  %v608_v39 = vld [vmem:[#allocation8 + $0x198] sm:$0xff] }
  0xff   : > { %v980_v34 = vld [vmem:[#allocation9 + $0x20] sm:$0xff]  ;;  %v2998_v37 = vpack.c.bf16 %v609_v32, %v606_v31  ;;  %v979_v42 = vld [vmem:[#allocation9 + $0x18] sm:$0xff]  ;;  %v615_v44 = vld [vmem:[#allocation8 + $0x1d0] sm:$0xff] }
 0x100   : > { %2989 = vmatpush1.bf16.msra.mxu0 %v2988_v10  ;;  %v605_v38 = vld [vmem:[#allocation8 + $0x180] sm:$0xff]  ;;  %v3062_v40 = vpack.c.bf16 %v980_v34, %v977_v33  ;;  %v612_v43 = vld [vmem:[#allocation8 + $0x1b8] sm:$0xff]  ;;  %v986_v46 = vld [vmem:[#allocation9 + $0x50] sm:$0xff] }
 0x101   : > { %3053 = vmatpush3.bf16.msra.mxu1 %v3052_v12  ;;  %2991 = vmatprep.subr.bf16.mxu0 %v2990_v13  ;;  %v976_v41 = vld [vmem:[#allocation9] sm:$0xff]  ;;  %v983_v45 = vld [vmem:[#allocation9 + $0x38] sm:$0xff]  ;;  %v3000_v48 = vpack.c.bf16 %v608_v39, %v605_v38  ;;  %v611_v51 = vld [vmem:[#allocation8 + $0x1b0] sm:$0xff]  ;;  %v3002_v53 = vpack.c.bf16 %v615_v44, %v612_v43 }
 0x102   : > { %3055 = vmatprep.subr.bf16.mxu1 %v3054_v17  ;;  %v4273_v47 = vld [vmem:[%s4237_s26] sm:$0xff]  ;;  %v3064_v49 = vpack.c.bf16 %v979_v42, %v976_v41  ;;  %v4276_v50 = vld [vmem:[%s4237_s26 + $0x18] sm:$0xff]  ;;  %v614_v52 = vld [vmem:[#allocation8 + $0x1c8] sm:$0xff]  ;;  %v3066_v54 = vpack.c.bf16 %v986_v46, %v983_v45 }
 0x103   : > { %v982_v55 = vld [vmem:[#allocation9 + $0x30] sm:$0xff]  ;;  %v985_v56 = vld [vmem:[#allocation9 + $0x48] sm:$0xff]  ;;  %v621_v58 = vld [vmem:[#allocation8 + $0x200] sm:$0xff]  ;;  %v3004_v62 = vpack.c.bf16 %v614_v52, %v611_v51 }
 0x104   : > { %2993 = vmatpush1.bf16.msra.mxu0 %v2992_v23  ;;  %v618_v57 = vld [vmem:[#allocation8 + $0x1e8] sm:$0xff]  ;;  %v992_v60 = vld [vmem:[#allocation9 + $0x80] sm:$0xff]  ;;  %v4280_v61 = vld [vmem:[%s4237_s26 + $0x10] sm:$0xff]  ;;  %v3068_v63 = vpack.c.bf16 %v985_v56, %v982_v55 }
 0x105   : > { %3057 = vmatpush3.bf16.msra.mxu1 %v3056_v24  ;;  %2995 = vmatprep.subr.bf16.mxu0 %v2994_v25  ;;  %v989_v59 = vld [vmem:[#allocation9 + $0x68] sm:$0xff]  ;;  %v617_v1 = vld [vmem:[#allocation8 + $0x1e0] sm:$0xff]  ;;  %v620_v2 = vld [vmem:[#allocation8 + $0x1f8] sm:$0xff]  ;;  %v3006_v3 = vpack.c.bf16 %v621_v58, %v618_v57 }
 0x106   : > { %3059 = vmatprep.subr.bf16.mxu1 %v3058_v29  ;;  %v4284_v0 = vld [vmem:[%s4237_s26 + $0x28] sm:$0xff]  ;;  %v3070_v4 = vpack.c.bf16 %v992_v60, %v989_v59  ;;  %v988_v5 = vld [vmem:[#allocation9 + $0x60] sm:$0xff]  ;;  %v991_v6 = vld [vmem:[#allocation9 + $0x78] sm:$0xff]  ;;  %v3008_v12 = vpack.c.bf16 %v620_v2, %v617_v1 }
 0x107   : > { %v624_v7 = vld [vmem:[#allocation8 + $0x218] sm:$0xff]  ;;  %v627_v8 = vld [vmem:[#allocation8 + $0x230] sm:$0xff]  ;;  %v4288_v11 = vld [vmem:[%s4237_s26 + $0x20] sm:$0xff]  ;;  %v3072_v13 = vpack.c.bf16 %v991_v6, %v988_v5 }
 0x108   : > { %2997 = vmatpush1.bf16.msra.mxu0 %v2996_v35  ;;  %v995_v9 = vld [vmem:[#allocation9 + $0x98] sm:$0xff]  ;;  %v998_v10 = vld [vmem:[#allocation9 + $0xb0] sm:$0xff]  ;;  %v626_v16 = vld [vmem:[#allocation8 + $0x228] sm:$0xff]  ;;  %v3010_v17 = vpack.c.bf16 %v627_v8, %v624_v7 }
 0x109   : > { %3061 = vmatpush3.bf16.msra.mxu1 %v3060_v36  ;;  %2999 = vmatprep.subr.bf16.mxu0 %v2998_v37  ;;  %v4292_v14 = vld [vmem:[%s4237_s26 + $0x38] sm:$0xff]  ;;  %v623_v15 = vld [vmem:[#allocation8 + $0x210] sm:$0xff]  ;;  %v3074_v18 = vpack.c.bf16 %v998_v10, %v995_v9  ;;  %v997_v20 = vld [vmem:[#allocation9 + $0xa8] sm:$0xff] }
 0x10a   : > { %3063 = vmatprep.subr.bf16.mxu1 %v3062_v40  ;;  %v994_v19 = vld [vmem:[#allocation9 + $0x90] sm:$0xff]  ;;  %v630_v21 = vld [vmem:[#allocation8 + $0x248] sm:$0xff]  ;;  %v633_v22 = vld [vmem:[#allocation8 + $0x260] sm:$0xff]  ;;  %v3012_v26 = vpack.c.bf16 %v626_v16, %v623_v15 }
 0x10b   : > { %v1001_v23 = vld [vmem:[#allocation9 + $0xc8] sm:$0xff]  ;;  %v1004_v24 = vld [vmem:[#allocation9 + $0xe0] sm:$0xff]  ;;  %v4296_v25 = vld [vmem:[%s4237_s26 + $0x30] sm:$0xff]  ;;  %v3076_v27 = vpack.c.bf16 %v997_v20, %v994_v19  ;;  %v3014_v31 = vpack.c.bf16 %v633_v22, %v630_v21 }
 0x10c   : > { %896 = vmatmul.mubr.f32.vlgmr.msra.gmra.mrb[0].mxu1 %v4273_v47  ;;  %3001 = vmatpush1.bf16.msra.mxu0 %v3000_v48  ;;  %v4300_v28 = vld [vmem:[%s4237_s26 + $0x48] sm:$0xff]  ;;  %v629_v29 = vld [vmem:[#allocation8 + $0x240] sm:$0xff]  ;;  %v632_v30 = vld [vmem:[#allocation8 + $0x258] sm:$0xff]  ;;  %v3078_v32 = vpack.c.bf16 %v1004_v24, %v1001_v23 }
 0x10d   : > { %3065 = vmatpush1.bf16.msra.mxu1 %v3064_v49  ;;  %900 = vmatprep.mubr.f32.mxu1 %v4276_v50  ;;  %v1000_v33 = vld [vmem:[#allocation9 + $0xc0] sm:$0xff]  ;;  %v1003_v34 = vld [vmem:[#allocation9 + $0xd8] sm:$0xff]  ;;  %v639_v36 = vld [vmem:[#allocation8 + $0x290] sm:$0xff]  ;;  %v3016_v40 = vpack.c.bf16 %v632_v30, %v629_v29 }
 0x10e   : > { %3003 = vmatprep.subr.bf16.mxu0 %v3002_v53  ;;  %3067 = vmatprep.subr.bf16.mxu1 %v3066_v54  ;;  %v636_v35 = vld [vmem:[#allocation8 + $0x278] sm:$0xff]  ;;  %v1010_v38 = vld [vmem:[#allocation9 + $0x110] sm:$0xff]  ;;  %v4304_v39 = vld [vmem:[%s4237_s26 + $0x40] sm:$0xff]  ;;  %v3080_v41 = vpack.c.bf16 %v1003_v34, %v1000_v33 }
 0x10f   : > { %v1007_v37 = vld [vmem:[#allocation9 + $0xf8] sm:$0xff]  ;;  %v635_v43 = vld [vmem:[#allocation8 + $0x270] sm:$0xff]  ;;  %v638_v44 = vld [vmem:[#allocation8 + $0x288] sm:$0xff]  ;;  %v3018_v45 = vpack.c.bf16 %v639_v36, %v636_v35 }
 0x110   : > { %901 = vmatmul.mubr.f32.gmra.mrb[2].mxu1 %v4280_v61  ;;  %3005 = vmatpush1.bf16.msra.mxu0 %v3004_v62  ;;  %v4308_v42 = vld [vmem:[%s4237_s26 + $0x58] sm:$0xff]  ;;  %v3082_v46 = vpack.c.bf16 %v1010_v38, %v1007_v37  ;;  %v1006_v48 = vld [vmem:[#allocation9 + $0xf0] sm:$0xff]  ;;  %v1009_v49 = vld [vmem:[#allocation9 + $0x108] sm:$0xff]  ;;  %v3020_v56 = vpack.c.bf16 %v638_v44, %v635_v43 }
 0x111   : > { %3069 = vmatpush1.bf16.msra.mxu1 %v3068_v63  ;;  %905 = vmatprep.mubr.f32.mxu1 %v4284_v0  ;;  %v642_v51 = vld [vmem:[#allocation8 + $0x2a8] sm:$0xff]  ;;  %v645_v52 = vld [vmem:[#allocation8 + $0x2c0] sm:$0xff]  ;;  %v4312_v55 = vld [vmem:[%s4237_s26 + $0x50] sm:$0xff]  ;;  %v3084_v57 = vpack.c.bf16 %v1009_v49, %v1006_v48 }
 0x112   : > { %3007 = vmatprep.subr.bf16.mxu0 %v3006_v3  ;;  %3071 = vmatprep.subr.bf16.mxu1 %v3070_v4  ;;  %v1013_v53 = vld [vmem:[#allocation9 + $0x128] sm:$0xff]  ;;  %v1016_v54 = vld [vmem:[#allocation9 + $0x140] sm:$0xff]  ;;  %v644_v60 = vld [vmem:[#allocation8 + $0x2b8] sm:$0xff]  ;;  %v3022_v62 = vpack.c.bf16 %v645_v52, %v642_v51 }
 0x113   : > { %v4316_v58 = vld [vmem:[%s4237_s26 + $0x68] sm:$0xff]  ;;  %v641_v59 = vld [vmem:[#allocation8 + $0x2a0] sm:$0xff]  ;;  %v3086_v63 = vpack.c.bf16 %v1016_v54, %v1013_v53  ;;  %v1015_v2 = vld [vmem:[#allocation9 + $0x138] sm:$0xff] }
 0x114   : > { %906 = vmatmul.mubr.f32.gmra.mrb[4].mxu1 %v4288_v11  ;;  %3009 = vmatpush1.bf16.msra.mxu0 %v3008_v12  ;;  %v1012_v1 = vld [vmem:[#allocation9 + $0x120] sm:$0xff]  ;;  %v648_v3 = vld [vmem:[#allocation8 + $0x2d8] sm:$0xff]  ;;  %v651_v4 = vld [vmem:[#allocation8 + $0x2f0] sm:$0xff]  ;;  %v3024_v7 = vpack.c.bf16 %v644_v60, %v641_v59 }
 0x115   : > { %3073 = vmatpush1.bf16.msra.mxu1 %v3072_v13  ;;  %910 = vmatprep.mubr.f32.mxu1 %v4292_v14  ;;  %v1019_v5 = vld [vmem:[#allocation9 + $0x158] sm:$0xff]  ;;  %v1022_v6 = vld [vmem:[#allocation9 + $0x170] sm:$0xff]  ;;  %v4321_v8 = vld [vmem:[%s4237_s26 + $0x60] sm:$0xff]  ;;  %v3088_v9 = vpack.c.bf16 %v1015_v2, %v1012_v1  ;;  %v3026_v15 = vpack.c.bf16 %v651_v4, %v648_v3 }
 0x116   : > { %3011 = vmatprep.subr.bf16.mxu0 %v3010_v17  ;;  %3075 = vmatprep.subr.bf16.mxu1 %v3074_v18  ;;  %v647_v10 = vld [vmem:[#allocation8 + $0x2d0] sm:$0xff]  ;;  %v650_v12 = vld [vmem:[#allocation8 + $0x2e8] sm:$0xff]  ;;  %v4324_v13 = vld [vmem:[%s4237_s26 + $0x78] sm:$0xff]  ;;  %v3090_v16 = vpack.c.bf16 %v1022_v6, %v1019_v5 }
 0x117   : > { %v1018_v17 = vld [vmem:[#allocation9 + $0x150] sm:$0xff]  ;;  %v1021_v18 = vld [vmem:[#allocation9 + $0x168] sm:$0xff]  ;;  %v1028_v20 = vld [vmem:[#allocation9 + $0x1a0] sm:$0xff]  ;;  %v3028_v21 = vpack.c.bf16 %v650_v12, %v647_v10 }
 0x118   : > { %911 = vmatmul.mubr.f32.gmra.mrb[6].mxu1 %v4296_v25  ;;  %3013 = vmatpush1.bf16.msra.mxu0 %v3012_v26  ;;  %v1025_v19 = vld [vmem:[#allocation9 + $0x188] sm:$0xff]  ;;  %v4329_v22 = vld [vmem:[%s4237_s26 + $0x70] sm:$0xff]  ;;  %v3092_v23 = vpack.c.bf16 %v1021_v18, %v1018_v17  ;;  %v1027_v29 = vld [vmem:[#allocation9 + $0x198] sm:$0xff] }
 0x119   : > { %3077 = vmatpush1.bf16.msra.mxu1 %v3076_v27  ;;  %915 = vmatprep.mubr.f32.mxu1 %v4300_v28  ;;  %v4332_v24 = vld [vmem:[%s4237_s26 + $0x88] sm:$0xff]  ;;  %v3094_v26 = vpack.c.bf16 %v1028_v20, %v1025_v19  ;;  %v1024_v27 = vld [vmem:[#allocation9 + $0x180] sm:$0xff]  ;;  %v1031_v30 = vld [vmem:[#allocation9 + $0x1b8] sm:$0xff] }
 0x11a   : > { %3015 = vmatprep.subr.bf16.mxu0 %v3014_v31  ;;  %3079 = vmatprep.subr.bf16.mxu1 %v3078_v32  ;;  %v1034_v31 = vld [vmem:[#allocation9 + $0x1d0] sm:$0xff]  ;;  %v4337_v33 = vld [vmem:[%s4237_s26 + $0x80] sm:$0xff]  ;;  %v3096_v34 = vpack.c.bf16 %v1027_v29, %v1024_v27  ;;  %v4340_v35 = vld [vmem:[%s4237_s26 + $0x98] sm:$0xff] }
 0x11b   : > { %v1026_v32 = vld [vmem:[#allocation9 + $0x190] sm:$0xff]  ;;  %v1029_v36 = vld [vmem:[#allocation9 + $0x1a8] sm:$0xff]  ;;  %v3098_v37 = vpack.c.bf16 %v1034_v31, %v1031_v30  ;;  %v1040_v44 = vld [vmem:[#allocation9 + $0x200] sm:$0xff] }
 0x11c   : > { %916 = vmatmul.mubr.f32.gmra.mrb[8].mxu1 %v4304_v39  ;;  %3017 = vmatpush1.bf16.msra.mxu0 %v3016_v40  ;;  %v1030_v38 = vld [vmem:[#allocation9 + $0x1b0] sm:$0xff]  ;;  %v1033_v40 = vld [vmem:[#allocation9 + $0x1c8] sm:$0xff]  ;;  %v3126_v43 = vpack.c.bf16 %v1029_v36, %v1026_v32  ;;  %v1032_v48 = vld [vmem:[#allocation9 + $0x1c0] sm:$0xff] }
 0x11d   : > { %3081 = vmatpush1.bf16.msra.mxu1 %v3080_v41  ;;  %920 = vmatprep.mubr.f32.mxu1 %v4308_v42  ;;  %v1037_v41 = vld [vmem:[#allocation9 + $0x1e8] sm:$0xff]  ;;  %v1035_v49 = vld [vmem:[#allocation9 + $0x1d8] sm:$0xff]  ;;  %v4347_v51 = vld [vmem:[%s4237_s26 + $0x90] sm:$0xff]  ;;  %v3100_v52 = vpack.c.bf16 %v1033_v40, %v1030_v38 }
 0x11e   : > { %3019 = vmatprep.subr.bf16.mxu0 %v3018_v45  ;;  %3083 = vmatprep.subr.bf16.mxu1 %v3082_v46  ;;  %v978_v45 = vld [vmem:[#allocation9 + $0x10] sm:$0xff]  ;;  %v981_v46 = vld [vmem:[#allocation9 + $0x28] sm:$0xff]  ;;  %v3102_v54 = vpack.c.bf16 %v1040_v44, %v1037_v41  ;;  %v3130_v60 = vpack.c.bf16 %v1035_v49, %v1032_v48  ;;  %v4357_v3 = vld [vmem:[%s4237_s26 + $0xa0] sm:$0xff] }
 0x11f   : > { %v4350_v53 = vld [vmem:[%s4237_s26 + $0xa8] sm:$0xff]  ;;  %v3128_v59 = vpack.c.bf16 %v981_v46, %v978_v45  ;;  %v1038_v1 = vld [vmem:[#allocation9 + $0x1f0] sm:$0xff]  ;;  %v4360_v5 = vld [vmem:[%s4237_s26 + $0xb8] sm:$0xff] }
 0x120   : > { %921 = vmatmul.mubr.f32.gmra.mrb[10].mxu1 %v4312_v55  ;;  %3021 = vmatpush1.bf16.msra.mxu0 %v3020_v56  ;;  %v1039_v56 = vld [vmem:[#allocation9 + $0x1f8] sm:$0xff]  ;;  %v1041_v2 = vld [vmem:[#allocation9 + $0x208] sm:$0xff]  ;;  %v1042_v6 = vld [vmem:[#allocation9 + $0x210] sm:$0xff] }
 0x121   : > { %3085 = vmatpush1.bf16.msra.mxu1 %v3084_v57  ;;  %925 = vmatprep.mubr.f32.mxu1 %v4316_v58  ;;  %v1043_v57 = vld [vmem:[#allocation9 + $0x218] sm:$0xff]  ;;  %v3134_v12 = vpack.c.bf16 %v1041_v2, %v1038_v1  ;;  %v1044_v17 = vld [vmem:[#allocation9 + $0x220] sm:$0xff]  ;;  %v4367_v19 = vld [vmem:[%s4237_s26 + $0xb0] sm:$0xff] }
 0x122   : > { %3023 = vmatprep.subr.bf16.mxu0 %v3022_v62  ;;  %3087 = vmatprep.subr.bf16.mxu1 %v3086_v63  ;;  %v984_v62 = vld [vmem:[#allocation9 + $0x40] sm:$0xff]  ;;  %v987_v63 = vld [vmem:[#allocation9 + $0x58] sm:$0xff]  ;;  %v1053_v36 = vld [vmem:[#allocation9 + $0x268] sm:$0xff] }
 0x123   : > { %v3132_v10 = vpack.c.bf16 %v987_v63, %v984_v62  ;;  %v1047_v18 = vld [vmem:[#allocation9 + $0x238] sm:$0xff]  ;;  %v996_v31 = vld [vmem:[#allocation9 + $0xa0] sm:$0xff]  ;;  %v1054_v41 = vld [vmem:[#allocation9 + $0x270] sm:$0xff] }
 0x124   : > { %926 = vmatmul.mubr.f32.gmra.mrb[12].mxu1 %v4321_v8  ;;  %3025 = vmatpush1.bf16.msra.mxu0 %v3024_v7  ;;  %v1045_v7 = vld [vmem:[#allocation9 + $0x228] sm:$0xff]  ;;  %v1055_v27 = vld [vmem:[#allocation9 + $0x278] sm:$0xff]  ;;  %v3138_v30 = vpack.c.bf16 %v1047_v18, %v1044_v17  ;;  %v1002_v48 = vld [vmem:[#allocation9 + $0xd0] sm:$0xff] }
 0x125   : > { %3089 = vmatpush1.bf16.msra.mxu1 %v3088_v9  ;;  %930 = vmatprep.mubr.f32.mxu1 %v4324_v13  ;;  %v1049_v9 = vld [vmem:[#allocation9 + $0x248] sm:$0xff]  ;;  %v3108_v20 = vpack.c.bf16 %v1045_v7, %v1042_v6  ;;  %v999_v32 = vld [vmem:[#allocation9 + $0xb8] sm:$0xff]  ;;  %v1008_v1 = vld [vmem:[#allocation9 + $0x100] sm:$0xff] }
 0x126   : > { %3027 = vmatprep.subr.bf16.mxu0 %v3026_v15  ;;  %3091 = vmatprep.subr.bf16.mxu1 %v3090_v16  ;;  %v990_v15 = vld [vmem:[#allocation9 + $0x70] sm:$0xff]  ;;  %v993_v16 = vld [vmem:[#allocation9 + $0x88] sm:$0xff]  ;;  %v4380_v40 = vld [vmem:[%s4237_s26 + $0xd8] sm:$0xff]  ;;  %v3140_v45 = vpack.c.bf16 %v999_v32, %v996_v31 }
 0x127   : > { %v3136_v29 = vpack.c.bf16 %v993_v16, %v990_v15  ;;  %v1061_v44 = vld [vmem:[#allocation9 + $0x2a8] sm:$0xff]  ;;  %v1011_v2 = vld [vmem:[#allocation9 + $0x118] sm:$0xff]  ;;  %v4397_v6 = vld [vmem:[%s4237_s26 + $0xe0] sm:$0xff] }
 0x128   : > { %931 = vmatmul.mubr.f32.gmra.mrb[14].mxu1 %v4329_v22  ;;  %3029 = vmatpush1.bf16.msra.mxu0 %v3028_v21  ;;  %v4370_v21 = vld [vmem:[%s4237_s26 + $0xc8] sm:$0xff]  ;;  %v1014_v15 = vld [vmem:[#allocation9 + $0x130] sm:$0xff]  ;;  %v1068_v17 = vld [vmem:[#allocation9 + $0x2e0] sm:$0xff] }
 0x129   : > { %3093 = vmatpush1.bf16.msra.mxu1 %v3092_v23  ;;  %935 = vmatprep.mubr.f32.mxu1 %v4332_v24  ;;  %v1048_v23 = vld [vmem:[#allocation9 + $0x240] sm:$0xff]  ;;  %v1005_v49 = vld [vmem:[#allocation9 + $0xe8] sm:$0xff]  ;;  %v1071_v18 = vld [vmem:[#allocation9 + $0x2f8] sm:$0xff] }
 0x12a   : > { %3095 = vmatprep.subr.bf16.mxu1 %v3094_v26  ;;  %3127 = vmatprep.subr.bf16.mxu0 %v3126_v43  ;;  %v1051_v26 = vld [vmem:[#allocation9 + $0x258] sm:$0xff]  ;;  %v1057_v43 = vld [vmem:[#allocation9 + $0x288] sm:$0xff]  ;;  %v3144_v62 = vpack.c.bf16 %v1005_v49, %v1002_v48  ;;  %v529_v31 = vld [vmem:[%s4245_s2 + $0x20] sm:$0xff] }
 0x12b   : > { %735 = vmatmul.mubr.f32.vlgmr.msra.gmra.mrb[0].mxu0 %v4273_v47  ;;  %v1036_v47 = vld [vmem:[#allocation9 + $0x1e0] sm:$0xff]  ;;  %v3112_v38 = vpack.c.bf16 %v1051_v26, %v1048_v23  ;;  %v1017_v16 = vld [vmem:[#allocation9 + $0x148] sm:$0xff]  ;;  %v3154_v26 = vpack.c.bf16 %v1071_v18, %v1068_v17  ;;  %v548_v48 = vld [vmem:[%s4245_s2 + $0xb8] sm:$0xff] }
 0x12c   : > { %936 = vmatmul.mubr.f32.gmra.mrb[16].mxu1 %v4337_v33  ;;  %740 = vmatprep.mubr.f32.mxu0 %v4276_v50  ;;  %v1046_v50 = vld [vmem:[#allocation9 + $0x230] sm:$0xff]  ;;  %v3104_v4 = vpack.c.bf16 %v1039_v56, %v1036_v47  ;;  %v3116_v56 = vpack.c.bf16 %v1057_v43, %v1054_v41  ;;  %v3152_v23 = vpack.c.bf16 %v1017_v16, %v1014_v15  ;;  %v534_v32 = vld [vmem:[%s4245_s2 + $0x48] sm:$0xff]  ;;  %v541_v43 = vld [vmem:[%s4245_s2 + $0x80] sm:$0xff] }
 0x12d   : > { %3097 = vmatpush1.bf16.msra.mxu1 %v3096_v34  ;;  %940 = vmatprep.mubr.f32.mxu1 %v4340_v35  ;;  %v1050_v34 = vld [vmem:[#allocation9 + $0x250] sm:$0xff]  ;;  %v542_v41 = vld [vmem:[%s4245_s2 + $0x88] sm:$0xff] }
 0x12e   : > { %3099 = vmatprep.subr.bf16.mxu1 %v3098_v37  ;;  %3129 = vmatpush3.bf16.msra.mxu0 %v3128_v59  ;;  %v4377_v37 = vld [vmem:[%s4237_s26 + $0xc0] sm:$0xff]  ;;  %v3142_v46 = vpack.c.bf16 %v1053_v36, %v1050_v34  ;;  %v4387_v47 = vld [vmem:[%s4237_s26 + $0xd0] sm:$0xff] }
 0x12f   : > { %741 = vmatmul.mubr.f32.gmra.mrb[2].mxu0 %v4280_v61  ;;  %v3106_v61 = vpack.c.bf16 %v1046_v50, %v1043_v57  ;;  %3131 = vmatprep.subr.bf16.mxu0 %v3130_v60  ;;  %v4390_v57 = vld [vmem:[%s4237_s26 + $0xe8] sm:$0xff]  ;;  %v1060_v59 = vld [vmem:[#allocation9 + $0x2a0] sm:$0xff]  ;;  %v1063_v50 = vld [vmem:[#allocation9 + $0x2b8] sm:$0xff] }
 0x130   : > { %941 = vmatmul.mubr.f32.gmra.mrb[18].mxu1 %v4347_v51  ;;  %746 = vmatprep.mubr.f32.mxu0 %v4284_v0  ;;  %v1052_v0 = vld [vmem:[#allocation9 + $0x260] sm:$0xff]  ;;  %v1067_v60 = vld [vmem:[#allocation9 + $0x2d8] sm:$0xff]  ;;  %v3120_v7 = vpack.c.bf16 %v1063_v50, %v1060_v59  ;;  %v547_v49 = vld [vmem:[%s4245_s2 + $0xb0] sm:$0xff] }
 0x131   : > { %3101 = vmatpush1.bf16.msra.mxu1 %v3100_v52  ;;  %945 = vmatprep.mubr.f32.mxu1 %v4350_v53  ;;  %v1056_v52 = vld [vmem:[#allocation9 + $0x280] sm:$0xff]  ;;  %v556_v59 = vld [vmem:[%s4245_s2 + $0xf8] sm:$0xff]  ;;  %v555_v50 = vld [vmem:[%s4245_s2 + $0xf0] sm:$0xff] }
 0x132   : > { %3103 = vmatprep.subr.bf16.mxu1 %v3102_v54  ;;  %3133 = vmatpush3.bf16.msra.mxu0 %v3132_v10  ;;  %v1059_v54 = vld [vmem:[#allocation9 + $0x298] sm:$0xff]  ;;  %v1066_v10 = vld [vmem:[#allocation9 + $0x2d0] sm:$0xff] }
 0x133   : > { %747 = vmatmul.mubr.f32.gmra.mrb[4].mxu0 %v4288_v11  ;;  %v3110_v11 = vpack.c.bf16 %v1052_v0, %v1049_v9  ;;  %3135 = vmatprep.subr.bf16.mxu0 %v3134_v12  ;;  %v3146_v63 = vpack.c.bf16 %v1059_v54, %v1056_v52  ;;  %v4400_v9 = vld [vmem:[%s4237_s26 + $0xf8] sm:$0xff]  ;;  %v1069_v0 = vld [vmem:[#allocation9 + $0x2e8] sm:$0xff]  ;;  %v3148_v12 = vpack.c.bf16 %v1011_v2, %v1008_v1  ;;  %v549_v54 = vld [vmem:[%s4245_s2 + $0xc0] sm:$0xff] }
 0x134   : > { %946 = vmatmul.mubr.f32.gmra.mrb[20].mxu1 %v4357_v3  ;;  %752 = vmatprep.mubr.f32.mxu0 %v4292_v14  ;;  %v1058_v14 = vld [vmem:[#allocation9 + $0x290] sm:$0xff]  ;;  %v550_v52 = vld [vmem:[%s4245_s2 + $0xc8] sm:$0xff] }
 0x135   : > { %3105 = vmatpush1.bf16.msra.mxu1 %v3104_v4  ;;  %950 = vmatprep.mubr.f32.mxu1 %v4360_v5  ;;  %v1062_v4 = vld [vmem:[#allocation9 + $0x2b0] sm:$0xff] }
 0x136   : > { %3107 = vmatprep.subr.bf16.mxu1 %v3106_v61  ;;  %3137 = vmatpush3.bf16.msra.mxu0 %v3136_v29  ;;  %v1065_v61 = vld [vmem:[#allocation9 + $0x2c8] sm:$0xff]  ;;  %v525_v29 = vld [vmem:[%s4245_s2] sm:$0xff] }
 0x137   : > { %753 = vmatmul.mubr.f32.gmra.mrb[6].mxu0 %v4296_v25  ;;  %v3114_v25 = vpack.c.bf16 %v1058_v14, %v1055_v27  ;;  %3139 = vmatprep.subr.bf16.mxu0 %v3138_v30  ;;  %v1023_v27 = vld [vmem:[#allocation9 + $0x178] sm:$0xff] }
 0x138   : > { %951 = vmatmul.mubr.f32.gmra.mrb[22].mxu1 %v4367_v19  ;;  %758 = vmatprep.mubr.f32.mxu0 %v4300_v28  ;;  %v1064_v28 = vld [vmem:[#allocation9 + $0x2c0] sm:$0xff]  ;;  %v528_v14 = vld [vmem:[%s4245_s2 + $0x18] sm:$0xff] }
 0x139   : > { %3109 = vmatpush1.bf16.msra.mxu1 %v3108_v20  ;;  %955 = vmatprep.mubr.f32.mxu1 %v4370_v21  ;;  %v4407_v20 = vld [vmem:[%s4237_s26 + $0xf0] sm:$0xff] }
 0x13a   : > { %3111 = vmatprep.subr.bf16.mxu1 %v3110_v11  ;;  %3141 = vmatpush3.bf16.msra.mxu0 %v3140_v45  ;;  %v3124_v11 = vpack.c.bf16 %v1069_v0, %v1066_v10  ;;  %v543_v45 = vld [vmem:[%s4245_s2 + $0x90] sm:$0xff] }
 0x13b   : > { %759 = vmatmul.mubr.f32.gmra.mrb[8].mxu0 %v4304_v39  ;;  %v3118_v39 = vpack.c.bf16 %v1064_v28, %v1061_v44  ;;  %3143 = vmatprep.subr.bf16.mxu0 %v3142_v46  ;;  %v544_v44 = vld [vmem:[%s4245_s2 + $0x98] sm:$0xff]  ;;  %v546_v28 = vld [vmem:[%s4245_s2 + $0xa8] sm:$0xff]  ;;  %v545_v46 = vld [vmem:[%s4245_s2 + $0xa0] sm:$0xff] }
 0x13c   : > { %956 = vmatmul.mubr.f32.gmra.mrb[24].mxu1 %v4377_v37  ;;  %764 = vmatprep.mubr.f32.mxu0 %v4308_v42  ;;  %v1070_v42 = vld [vmem:[#allocation9 + $0x2f0] sm:$0xff] }
 0x13d   : > { %3113 = vmatpush1.bf16.msra.mxu1 %v3112_v38  ;;  %960 = vmatprep.mubr.f32.mxu1 %v4380_v40 }
 0x13e   : > { %3115 = vmatprep.subr.bf16.mxu1 %v3114_v25  ;;  %3145 = vmatpush3.bf16.msra.mxu0 %v3144_v62  ;;  %v539_v25 = vld [vmem:[%s4245_s2 + $0x70] sm:$0xff]  ;;  %v4482_v62 = vld [vmem:[%s5444_s5] sm:$0x7] }
 0x13f   : > { %765 = vmatmul.mubr.f32.gmra.mrb[10].mxu0 %v4312_v55  ;;  %v3122_v55 = vpack.c.bf16 %v1070_v42, %v1067_v60  ;;  %3147 = vmatprep.subr.bf16.mxu0 %v3146_v63 }
 0x140   : > { %961 = vmatmul.mubr.f32.gmra.mrb[26].mxu1 %v4387_v47  ;;  %770 = vmatprep.mubr.f32.mxu0 %v4316_v58  ;;  %v3150_v58 = vpack.c.bf16 %v1065_v61, %v1062_v4 }
 0x141   : > { %3117 = vmatpush1.bf16.msra.mxu1 %v3116_v56  ;;  %965 = vmatprep.mubr.f32.mxu1 %v4390_v57  ;;  %v551_v56 = vld [vmem:[%s4245_s2 + $0xd0] sm:$0xff] }
 0x142   : > { %3119 = vmatprep.subr.bf16.mxu1 %v3118_v39  ;;  %3149 = vmatpush3.bf16.msra.mxu0 %v3148_v12  ;;  %v553_v39 = vld [vmem:[%s4245_s2 + $0xe0] sm:$0xff] }
 0x143   : > { %771 = vmatmul.mubr.f32.gmra.mrb[12].mxu0 %v4321_v8  ;;  %v4410_v8 = vld [vmem:[%s4245_s2 + $0x8] sm:$0xff]  ;;  %3151 = vmatprep.subr.bf16.mxu0 %v3150_v58 }
 0x144   : > { %966 = vmatmul.mubr.f32.gmra.mrb[28].mxu1 %v4397_v6  ;;  %776 = vmatprep.mubr.f32.mxu0 %v4324_v13  ;;  %v1020_v13 = vld [vmem:[#allocation9 + $0x160] sm:$0xff] }
 0x145   : > { %3121 = vmatpush1.bf16.msra.mxu1 %v3120_v7  ;;  %970 = vmatprep.mubr.f32.mxu1 %v4400_v9  ;;  %v3156_v30 = vpack.c.bf16 %v1023_v27, %v1020_v13 }
 0x146   : > { %3123 = vmatprep.subr.bf16.mxu1 %v3122_v55  ;;  %3153 = vmatpush3.bf16.msra.mxu0 %v3152_v23 }
 0x147   : > { %777 = vmatmul.mubr.f32.gmra.mrb[14].mxu0 %v4329_v22  ;;  %3155 = vmatprep.subr.bf16.mxu0 %v3154_v26  ;;  %v527_v22 = vld [vmem:[%s4245_s2 + $0x10] sm:$0xff] }
 0x148   : > { %971 = vmatmul.mubr.f32.gmra.mrb[30].mxu1 %v4407_v20  ;;  %782 = vmatprep.mubr.f32.mxu0 %v4332_v24  ;;  %v530_v24 = vld [vmem:[%s4245_s2 + $0x28] sm:$0xff] }
 0x149   : > { %3125 = vmatpush1.bf16.msra.mxu1 %v3124_v11  ;;  %1153 = vmatprep.mubr.f32.mxu1 %v4410_v8 }
 0x14a   : > { %3157 = vmatpush3.bf16.msra.mxu0 %v3156_v30 }
 0x14b   : > { %783 = vmatmul.mubr.f32.gmra.mrb[16].mxu0 %v4337_v33  ;;  %v532_v33 = vld [vmem:[%s4245_s2 + $0x38] sm:$0xff] }
 0x14c   : > { %1154 = vmatmul.mubr.f32.vlgmr.msra.gmra.mrb[32].mxu1 %v525_v29  ;;  %788 = vmatprep.mubr.f32.mxu0 %v4340_v35  ;;  %v531_v35 = vld [vmem:[%s4245_s2 + $0x30] sm:$0xff] }
 0x14d   : > { %1159 = vmatprep.mubr.f32.mxu1 %v528_v14 }
 0x14f   : > { %789 = vmatmul.mubr.f32.gmra.mrb[18].mxu0 %v4347_v51  ;;  %v533_v51 = vld [vmem:[%s4245_s2 + $0x40] sm:$0xff] }
 0x150   : > { %1160 = vmatmul.mubr.f32.gmra.mrb[34].mxu1 %v527_v22  ;;  %794 = vmatprep.mubr.f32.mxu0 %v4350_v53  ;;  %v536_v53 = vld [vmem:[%s4245_s2 + $0x58] sm:$0xff] }
 0x151   : > { %1165 = vmatprep.mubr.f32.mxu1 %v530_v24 }
 0x153   : > { %795 = vmatmul.mubr.f32.gmra.mrb[20].mxu0 %v4357_v3  ;;  %v655_v3 = vlaneseq }
 0x154   : > { %1166 = vmatmul.mubr.f32.gmra.mrb[36].mxu1 %v529_v31  ;;  %800 = vmatprep.mubr.f32.mxu0 %v4360_v5  ;;  %v535_v5 = vld [vmem:[%s4245_s2 + $0x50] sm:$0xff] }
 0x155   : > { %1171 = vmatprep.mubr.f32.mxu1 %v532_v33  ;;  %v4437_v34 = vshrl.u32 %v655_v3, 7 }
 0x157   : > { %801 = vmatmul.mubr.f32.gmra.mrb[22].mxu0 %v4367_v19  ;;  %v538_v19 = vld [vmem:[%s4245_s2 + $0x68] sm:$0xff]  ;;  %v665_v36 = vsub.s32 2, %v4437_v34  ;;  %v4477_v60 = vsub.s32 1, %v4437_v34 }
 0x158   : > { %1172 = vmatmul.mubr.f32.gmra.mrb[38].mxu1 %v531_v35  ;;  %806 = vmatprep.mubr.f32.mxu0 %v4370_v21  ;;  %v4444_v21 = vld [vmem:[%s5442_s3] sm:$0x7] }
 0x159   : > { %1177 = vmatprep.mubr.f32.mxu1 %v534_v32  ;;  %v4452_v38 = vrot.slane %v4444_v21, %v665_v36  ;;  %5509 = vst [vmem:[#allocation26_spill] sm:$0xff] %v4477_v60  ;;  %v4486_v42 = vrot.slane %v4444_v21, %v4477_v60  ;;  %v4490_v63 = vrot.slane %v4482_v62, %v4477_v60 }
 0x15a   : > { %v4495_v1 = vrot.slane %v4482_v62, %v665_v36 }
 0x15b   : > { %807 = vmatmul.mubr.f32.gmra.mrb[24].mxu0 %v4377_v37  ;;  %v537_v37 = vld [vmem:[%s4245_s2 + $0x60] sm:$0xff] }
 0x15c   : > { %1178 = vmatmul.mubr.f32.gmra.mrb[40].mxu1 %v533_v51  ;;  %812 = vmatprep.mubr.f32.mxu0 %v4380_v40  ;;  %v540_v40 = vld [vmem:[%s4245_s2 + $0x78] sm:$0xff] }
 0x15d   : > { %1183 = vmatprep.mubr.f32.mxu1 %v536_v53 }
 0x15f   : > { %813 = vmatmul.mubr.f32.gmra.mrb[26].mxu0 %v4387_v47  ;;  %v552_v47 = vld [vmem:[%s4245_s2 + $0xd8] sm:$0xff] }
 0x160   : > { %1184 = vmatmul.mubr.f32.gmra.mrb[42].mxu1 %v535_v5  ;;  %818 = vmatprep.mubr.f32.mxu0 %v4390_v57  ;;  %v554_v57 = vld [vmem:[%s4245_s2 + $0xe8] sm:$0xff] }
 0x161   : > { %1189 = vmatprep.mubr.f32.mxu1 %v538_v19 }
 0x163   : > { %819 = vmatmul.mubr.f32.gmra.mrb[28].mxu0 %v4397_v6 }
 0x164   : > { %1190 = vmatmul.mubr.f32.gmra.mrb[44].mxu1 %v537_v37  ;;  %824 = vmatprep.mubr.f32.mxu0 %v4400_v9 }
 0x165   : > { %1195 = vmatprep.mubr.f32.mxu1 %v540_v40 }
 0x167   : > { %825 = vmatmul.mubr.f32.gmra.mrb[30].mxu0 %v4407_v20 }
 0x168   : > { %1196 = vmatmul.mubr.f32.gmra.mrb[46].mxu1 %v539_v25  ;;  %1314 = vmatprep.mubr.f32.mxu0 %v4410_v8 }
 0x169   : > { %1201 = vmatprep.mubr.f32.mxu1 %v542_v41 }
 0x16b   : > { %1315 = vmatmul.mubr.f32.vlgmr.msra.gmra.mrb[32].mxu0 %v525_v29 }
 0x16c   : > { %1202 = vmatmul.mubr.f32.gmra.mrb[48].mxu1 %v541_v43  ;;  %1319 = vmatprep.mubr.f32.mxu0 %v528_v14 }
 0x16d   : > { %1207 = vmatprep.mubr.f32.mxu1 %v544_v44 }
 0x16f   : > { %1320 = vmatmul.mubr.f32.gmra.mrb[34].mxu0 %v527_v22 }
 0x170   : > { %1208 = vmatmul.mubr.f32.gmra.mrb[50].mxu1 %v543_v45  ;;  %1324 = vmatprep.mubr.f32.mxu0 %v530_v24 }
 0x171   : > { %1213 = vmatprep.mubr.f32.mxu1 %v546_v28 }
 0x173   : > { %1325 = vmatmul.mubr.f32.gmra.mrb[36].mxu0 %v529_v31 }
 0x174   : > { %1214 = vmatmul.mubr.f32.gmra.mrb[52].mxu1 %v545_v46  ;;  %1329 = vmatprep.mubr.f32.mxu0 %v532_v33 }
 0x175   : > { %1219 = vmatprep.mubr.f32.mxu1 %v548_v48 }
 0x177   : > { %1330 = vmatmul.mubr.f32.gmra.mrb[38].mxu0 %v531_v35 }
 0x178   : > { %1220 = vmatmul.mubr.f32.gmra.mrb[54].mxu1 %v547_v49  ;;  %1334 = vmatprep.mubr.f32.mxu0 %v534_v32 }
 0x179   : > { %1225 = vmatprep.mubr.f32.mxu1 %v550_v52 }
 0x17b   : > { %1335 = vmatmul.mubr.f32.gmra.mrb[40].mxu0 %v533_v51 }
 0x17c   : > { %1339 = vmatprep.mubr.f32.mxu0 %v536_v53  ;;  %1226 = vmatmul.mubr.f32.gmra.mrb[56].mxu1 %v549_v54 }
 0x17d   : > { %1231 = vmatprep.mubr.f32.mxu1 %v552_v47 }
 0x17f   : > { %1340 = vmatmul.mubr.f32.gmra.mrb[42].mxu0 %v535_v5 }
 0x180   : > { %1344 = vmatprep.mubr.f32.mxu0 %v538_v19  ;;  %1232 = vmatmul.mubr.f32.gmra.mrb[58].mxu1 %v551_v56 }
 0x181   : > { %1237 = vmatprep.mubr.f32.mxu1 %v554_v57 }
 0x183   : > { %1345 = vmatmul.mubr.f32.gmra.mrb[44].mxu0 %v537_v37 }
 0x184   : > { %1349 = vmatprep.mubr.f32.mxu0 %v540_v40  ;;  %1238 = vmatmul.mubr.f32.gmra.mrb[60].mxu1 %v553_v39 }
 0x185   : > { %1243 = vmatprep.mubr.f32.mxu1 %v556_v59 }
 0x187   : > { %1350 = vmatmul.mubr.f32.gmra.mrb[46].mxu0 %v539_v25 }
 0x188   : > { %1354 = vmatprep.mubr.f32.mxu0 %v542_v41  ;;  %1244 = vmatmul.mubr.f32.gmra.mrb[62].mxu1 %v555_v50 }
 0x18b   : > { %1355 = vmatmul.mubr.f32.gmra.mrb[48].mxu0 %v541_v43 }
 0x18c   : > { %1359 = vmatprep.mubr.f32.mxu0 %v544_v44 }
 0x18f   : > { %1360 = vmatmul.mubr.f32.gmra.mrb[50].mxu0 %v543_v45 }
 0x190   : > { %1364 = vmatprep.mubr.f32.mxu0 %v546_v28 }
 0x193   : > { %1365 = vmatmul.mubr.f32.gmra.mrb[52].mxu0 %v545_v46 }
 0x194   : > { %1369 = vmatprep.mubr.f32.mxu0 %v548_v48 }
 0x197   : > { %1370 = vmatmul.mubr.f32.gmra.mrb[54].mxu0 %v547_v49 }
 0x198   : > { %1374 = vmatprep.mubr.f32.mxu0 %v550_v52 }
 0x19b   : > { %1375 = vmatmul.mubr.f32.gmra.mrb[56].mxu0 %v549_v54 }
 0x19c   : > { %1379 = vmatprep.mubr.f32.mxu0 %v552_v47 }
 0x19f   : > { %1380 = vmatmul.mubr.f32.gmra.mrb[58].mxu0 %v551_v56 }
 0x1a0   : > { %1384 = vmatprep.mubr.f32.mxu0 %v554_v57 }
 0x1a3   : > { %1385 = vmatmul.mubr.f32.gmra.mrb[60].mxu0 %v553_v39 }
 0x1a4   : > { %1389 = vmatprep.mubr.f32.mxu0 %v556_v59 }
 0x1a7   : > { %1390 = vmatmul.mubr.f32.gmra.mrb[62].mxu0 %v555_v50 }
 0x1df   : > { %v2838_v2 = vpop.f32.mrb[0].mxu1 }
 0x1e0   : > { %v2839_v4 = vpop.f32.mrb[1].mxu1 }
 0x1e1   : > { %v2840_v61 = vadd.f32 %v2839_v4, %v2838_v2 }
 0x1e3   : > { %v4498_v6 = vadd.f32 %v2840_v61, %v4452_v38  ;;  %v2841_v7 = vpop.f32.mrb[2].mxu1 }
 0x1e4   : > { %v2842_v9 = vpop.f32.mrb[3].mxu1 }
 0x1e5   : > { %v2843_v55 = vadd.f32 %v2842_v9, %v2841_v7 }
 0x1e7   : > { %v4501_v10 = vadd.f32 %v2843_v55, %v4452_v38  ;;  %v2844_v0 = vpop.f32.mrb[4].mxu1 }
 0x1e8   : > { %v2845_v12 = vpop.f32.mrb[5].mxu1 }
 0x1e9   : > { %v2846_v58 = vadd.f32 %v2845_v12, %v2844_v0 }
 0x1eb   : > { %v4504_v15 = vadd.f32 %v2846_v58, %v4452_v38  ;;  %v2847_v16 = vpop.f32.mrb[6].mxu1 }
 0x1ec   : > { %v2848_v17 = vpop.f32.mrb[7].mxu1 }
 0x1ed   : > { %v2849_v18 = vadd.f32 %v2848_v17, %v2847_v16 }
 0x1ef   : > { %v4507_v20 = vadd.f32 %v2849_v18, %v4452_v38  ;;  %v2850_v11 = vpop.f32.mrb[8].mxu1 }
 0x1f0   : > { %v2851_v8 = vpop.f32.mrb[9].mxu1 }
 0x1f1   : > { %v2852_v23 = vadd.f32 %v2851_v8, %v2850_v11 }
 0x1f3   : > { %v4510_v26 = vadd.f32 %v2852_v23, %v4452_v38  ;;  %v2853_v13 = vpop.f32.mrb[10].mxu1 }
 0x1f4   : > { %v2854_v27 = vpop.f32.mrb[11].mxu1 }
 0x1f5   : > { %v2855_v29 = vadd.f32 %v2854_v27, %v2853_v13 }
 0x1f7   : > { %v4513_v14 = vadd.f32 %v2855_v29, %v4452_v38  ;;  %v2856_v30 = vpop.f32.mrb[12].mxu1  ;;  %v4565_v29 = vsub.s32 0, %v4437_v34 }
 0x1f8   : > { %v2857_v22 = vpop.f32.mrb[13].mxu1 }
 0x1f9   : > { %v2858_v24 = vadd.f32 %v2857_v22, %v2856_v30  ;;  %5510 = vst [vmem:[#allocation27_spill] sm:$0xff] %v4565_v29 }
 0x1fb   : > { %v4516_v31 = vadd.f32 %v2858_v24, %v4452_v38  ;;  %v2859_v33 = vpop.f32.mrb[14].mxu1 }
 0x1fc   : > { %v2860_v35 = vpop.f32.mrb[15].mxu1 }
 0x1fd   : > { %v2861_v32 = vadd.f32 %v2860_v35, %v2859_v33 }
 0x1fe   : > { %v736_v51 = vpop.f32.mrb[0].mxu0 }
 0x1ff   : > { %v4519_v53 = vadd.f32 %v2861_v32, %v4452_v38  ;;  %v2862_v3 = vpop.f32.mrb[16].mxu1  ;;  %v738_v5 = vpop.f32.mrb[1].mxu0 }
 0x200   : > { %v2863_v19 = vpop.f32.mrb[17].mxu1  ;;  %v4522_v36 = vadd.f32 %v738_v5, %v4486_v42  ;;  %v4577_v5 = vrot.slane %v4444_v21, %v4565_v29 }
 0x201   : > { %v2864_v37 = vadd.f32 %v2863_v19, %v2862_v3 }
 0x202   : > { %v4524_v40 = vpop.f32.mrb[2].mxu0 }
 0x203   : > { %v4527_v25 = vadd.f32 %v2864_v37, %v4452_v38  ;;  %v2865_v41 = vpop.f32.mrb[18].mxu1  ;;  %v744_v43 = vpop.f32.mrb[3].mxu0 }
 0x204   : > { %v2866_v44 = vpop.f32.mrb[19].mxu1  ;;  %v4530_v45 = vadd.f32 %v744_v43, %v4486_v42 }
 0x205   : > { %v2867_v28 = vadd.f32 %v2866_v44, %v2865_v41  ;;  %v4586_v44 = vrot.slane %v4482_v62, %v4565_v29 }
 0x206   : > { %v4532_v46 = vpop.f32.mrb[4].mxu0 }
 0x207   : > { %v4535_v48 = vadd.f32 %v2867_v28, %v4452_v38  ;;  %v2868_v49 = vpop.f32.mrb[20].mxu1  ;;  %v750_v52 = vpop.f32.mrb[5].mxu0 }
 0x208   : > { %v2869_v54 = vpop.f32.mrb[21].mxu1  ;;  %v4538_v47 = vadd.f32 %v750_v52, %v4486_v42  ;;  %v4592_v52 = vadd.f32 %v736_v51, %v4577_v5 }
 0x209   : > { %v2870_v56 = vadd.f32 %v2869_v54, %v2868_v49 }
 0x20a   : > { %v4540_v57 = vpop.f32.mrb[6].mxu0 }
 0x20b   : > { %v4543_v39 = vadd.f32 %v2870_v56, %v4452_v38  ;;  %v2871_v59 = vpop.f32.mrb[22].mxu1  ;;  %v756_v50 = vpop.f32.mrb[7].mxu0 }
 0x20c   : > { %v2872_v2 = vpop.f32.mrb[23].mxu1  ;;  %v4546_v4 = vadd.f32 %v756_v50, %v4486_v42 }
 0x20d   : > { %v2873_v61 = vadd.f32 %v2872_v2, %v2871_v59 }
 0x20e   : > { %v4548_v7 = vpop.f32.mrb[8].mxu0 }
 0x20f   : > { %v4551_v9 = vadd.f32 %v2873_v61, %v4452_v38  ;;  %v2874_v55 = vpop.f32.mrb[24].mxu1  ;;  %v762_v0 = vpop.f32.mrb[9].mxu0 }
 0x210   : > { %v2875_v12 = vpop.f32.mrb[25].mxu1  ;;  %v4554_v58 = vadd.f32 %v762_v0, %v4486_v42 }
 0x211   : > { %v2876_v16 = vadd.f32 %v2875_v12, %v2874_v55 }
 0x212   : > { %v4556_v17 = vpop.f32.mrb[10].mxu0 }
 0x213   : > { %v4559_v18 = vadd.f32 %v2876_v16, %v4452_v38  ;;  %v2877_v11 = vpop.f32.mrb[26].mxu1  ;;  %v768_v8 = vpop.f32.mrb[11].mxu0 }
 0x214   : > { %v2878_v23 = vpop.f32.mrb[27].mxu1  ;;  %v4562_v13 = vadd.f32 %v768_v8, %v4486_v42 }
 0x215   : > { %v2879_v27 = vadd.f32 %v2878_v23, %v2877_v11  ;;  %v4619_v23 = vadd.f32 %v4524_v40, %v4577_v5 }
 0x216   : > { %v4567_v30 = vpop.f32.mrb[12].mxu0 }
 0x217   : > { %v4570_v22 = vadd.f32 %v2879_v27, %v4452_v38  ;;  %v2880_v24 = vpop.f32.mrb[28].mxu1  ;;  %v774_v33 = vpop.f32.mrb[13].mxu0  ;;  %v4686_v60 = vadd.f32 %v4567_v30, %v4577_v5 }
 0x218   : > { %v2881_v35 = vpop.f32.mrb[29].mxu1  ;;  %v4573_v32 = vadd.f32 %v774_v33, %v4486_v42 }
 0x219   : > { %v2882_v3 = vadd.f32 %v2881_v35, %v2880_v24 }
 0x21a   : > { %v4579_v19 = vpop.f32.mrb[14].mxu0 }
 0x21b   : > { %v4582_v34 = vadd.f32 %v2882_v3, %v4452_v38  ;;  %v2883_v37 = vpop.f32.mrb[30].mxu1  ;;  %v780_v41 = vpop.f32.mrb[15].mxu0 }
 0x21c   : > { %v2884_v43 = vpop.f32.mrb[31].mxu1  ;;  %v4589_v28 = vadd.f32 %v780_v41, %v4486_v42 }
 0x21d   : > { %v2885_v49 = vadd.f32 %v2884_v43, %v2883_v37 }
 0x21e   : > { %v4594_v21 = vpop.f32.mrb[16].mxu0 }
 0x21f   : > { %v4597_v54 = vadd.f32 %v2885_v49, %v4452_v38  ;;  %v1155_v56 = vpop.f32.mrb[32].mxu1  ;;  %v786_v59 = vpop.f32.mrb[17].mxu0 }
 0x220   : > { %v4600_v50 = vadd.f32 %v1155_v56, %v4586_v44  ;;  %v1157_v2 = vpop.f32.mrb[33].mxu1  ;;  %v4603_v62 = vadd.f32 %v786_v59, %v4486_v42 }
 0x221   : > { %v1158_v61 = vadd.f32 %v1157_v2, %v4490_v63 }
 0x222   : > { %5511 = vst [vmem:[#allocation28_spill] sm:$0xff] %v4600_v50  ;;  %v1427_v51 = vadd.f32 %v4600_v50, %v4592_v52  ;;  %v4608_v55 = vpop.f32.mrb[18].mxu0 }
 0x223   : > { %v4611_v0 = vadd.f32 %v1158_v61, %v4522_v36  ;;  %v1161_v38 = vpop.f32.mrb[34].mxu1  ;;  %v792_v12 = vpop.f32.mrb[19].mxu0  ;;  %v1491_v36 = vmax.f32 %v4592_v52, %v4600_v50 }
 0x224   : > { %v1163_v16 = vpop.f32.mrb[35].mxu1  ;;  %1443 = vadd.xlane.f32.xlu0 %v1427_v51  ;;  %v4614_v11 = vadd.f32 %v792_v12, %v4486_v42  ;;  %v4622_v27 = vadd.f32 %v1161_v38, %v4586_v44  ;;  %v4652_v38 = vadd.f32 %v4548_v7, %v4577_v5  ;;  %v4668_v7 = vadd.f32 %v4556_v17, %v4577_v5 }
 0x225   : > { %5512 = vst [vmem:[#allocation29_spill] sm:$0xff] %v4611_v0  ;;  %v1164_v8 = vadd.f32 %v1163_v16, %v4490_v63 }
 0x226   : > { %v4626_v24 = vpop.f32.mrb[20].mxu0  ;;  %v1428_v43 = vadd.f32 %v4622_v27, %v4619_v23  ;;  %5515 = vst [vmem:[#allocation32_spill] sm:$0xff] %v4652_v38  ;;  %5518 = vst [vmem:[#allocation35_spill] sm:$0xff] %v4668_v7 }
 0x227   : > { %v4629_v33 = vadd.f32 %v1164_v8, %v4530_v45  ;;  %v4631_v35 = vpop.f32.mrb[36].mxu1  ;;  %v798_v3 = vpop.f32.mrb[21].mxu0 }
 0x228   : > { %v1169_v37 = vpop.f32.mrb[37].mxu1  ;;  %1507 = vmax.xlane.f32.xlu0 %v1491_v36  ;;  %v4634_v41 = vadd.f32 %v798_v3, %v4486_v42 }
 0x229   : > { %5513 = vst [vmem:[#allocation30_spill] sm:$0xff] %v4629_v33  ;;  %v1170_v40 = vadd.f32 %v1169_v37, %v4490_v63  ;;  %v1922_v33 = vld [vmem:[#allocation14 + $0x18] sm:$0xff] }
 0x22a   : > { %v4639_v49 = vpop.f32.mrb[22].mxu0 }
 0x22b   : > { %v4642_v56 = vadd.f32 %v1170_v40, %v4538_v47  ;;  %v4644_v45 = vpop.f32.mrb[38].mxu1  ;;  %v804_v59 = vpop.f32.mrb[23].mxu0 }
 0x22c   : > { %v1175_v2 = vpop.f32.mrb[39].mxu1  ;;  %1445 = vadd.xlane.f32.xlu0 %v1428_v43  ;;  %v4647_v61 = vadd.f32 %v804_v59, %v4486_v42 }
 0x22d   : > { %5514 = vst [vmem:[#allocation31_spill] sm:$0xff] %v4642_v56  ;;  %v1176_v51 = vadd.f32 %v1175_v2, %v4490_v63  ;;  %v1920_v56 = vld [vmem:[#allocation14 + $0x8] sm:$0xff] }
 0x22e   : > { %v4654_v12 = vpop.f32.mrb[24].mxu0 }
 0x22f   : > { %v4657_v16 = vadd.f32 %v1176_v51, %v4546_v4  ;;  %v1179_v47 = vpop.f32.mrb[40].mxu1  ;;  %v810_v8 = vpop.f32.mrb[25].mxu0 }
 0x230   : > { %v4660_v36 = vadd.f32 %v1179_v47, %v4586_v44  ;;  %v1181_v3 = vpop.f32.mrb[41].mxu1  ;;  %v4663_v37 = vadd.f32 %v810_v8, %v4486_v42 }
 0x231   : > { %5516 = vst [vmem:[#allocation33_spill] sm:$0xff] %v4657_v16  ;;  %v1182_v40 = vadd.f32 %v1181_v3, %v4490_v63 }
 0x232   : > { %5517 = vst [vmem:[#allocation34_spill] sm:$0xff] %v4660_v36  ;;  %v1431_v43 = vadd.f32 %v4660_v36, %v4652_v38  ;;  %v4672_v4 = vpop.f32.mrb[26].mxu0 }
 0x233   : > { %v4675_v59 = vadd.f32 %v1182_v40, %v4554_v58  ;;  %v1185_v2 = vpop.f32.mrb[42].mxu1  ;;  %v816_v51 = vpop.f32.mrb[27].mxu0  ;;  %v1495_v40 = vmax.f32 %v4652_v38, %v4660_v36 }
 0x234   : > { %v4678_v47 = vadd.f32 %v1185_v2, %v4586_v44  ;;  %v1187_v8 = vpop.f32.mrb[43].mxu1  ;;  %1451 = vadd.xlane.f32.xlu0 %v1431_v43  ;;  %v4681_v3 = vadd.f32 %v816_v51, %v4486_v42 }
 0x235   : > { %5519 = vst [vmem:[#allocation36_spill] sm:$0xff] %v4675_v59  ;;  %v1188_v17 = vadd.f32 %v1187_v8, %v4490_v63 }
 0x236   : > { %5520 = vst [vmem:[#allocation37_spill] sm:$0xff] %v4678_v47  ;;  %v1432_v58 = vadd.f32 %v4678_v47, %v4668_v7  ;;  %v820_v29 = vpop.f32.mrb[28].mxu0 }
 0x237   : > { %v4693_v2 = vadd.f32 %v1188_v17, %v4562_v13  ;;  %v1191_v43 = vpop.f32.mrb[44].mxu1  ;;  %v4696_v51 = vadd.f32 %v820_v29, %v4577_v5  ;;  %v822_v59 = vpop.f32.mrb[29].mxu0  ;;  %v1919_v13 = vld [vmem:[#allocation14] sm:$0xff]  ;;  %v1921_v17 = vld [vmem:[#allocation14 + $0x10] sm:$0xff]  ;;  %v4707_v29 = vadd.f32 %v4579_v19, %v4577_v5 }
 0x238   : > { %v4699_v8 = vadd.f32 %v1191_v43, %v4586_v44  ;;  %1453 = vadd.xlane.f32.xlu1 %v1432_v58  ;;  %1515 = vmax.xlane.f32.xlu0 %v1495_v40  ;;  %v1193_v30 = vpop.f32.mrb[45].mxu1  ;;  %v4702_v16 = vadd.f32 %v822_v59, %v4486_v42  ;;  %v1496_v43 = vmax.f32 %v4668_v7, %v4678_v47 }
 0x239   : > { %5521 = vst [vmem:[#allocation38_spill] sm:$0xff] %v4693_v2  ;;  %v1194_v0 = vadd.f32 %v1193_v30, %v4490_v63  ;;  %5523 = vst [vmem:[#allocation40_spill] sm:$0xff] %v4707_v29  ;;  %v3158_v2 = vpack.c.bf16 %v1922_v33, %v1920_v56  ;;  %v3160_v50 = vpack.c.bf16 %v1921_v17, %v1919_v13  ;;  %v1923_v13 = vld [vmem:[#allocation14 + $0x20] sm:$0xff]  ;;  %v1925_v17 = vld [vmem:[#allocation14 + $0x30] sm:$0xff] }
 0x23a   : > { %5522 = vst [vmem:[#allocation39_spill] sm:$0xff] %v4699_v8  ;;  %v1433_v58 = vadd.f32 %v4699_v8, %v4686_v60  ;;  %v826_v40 = vpop.f32.mrb[30].mxu0  ;;  %v1497_v33 = vmax.f32 %v4686_v60, %v4699_v8  ;;  %v1928_v8 = vld [vmem:[#allocation14 + $0x48] sm:$0xff] }
 0x23b   : > { %v4714_v59 = vadd.f32 %v1194_v0, %v4573_v32  ;;  %v1197_v36 = vpop.f32.mrb[46].mxu1  ;;  %v4717_v30 = vadd.f32 %v826_v40, %v4577_v5  ;;  %v828_v38 = vpop.f32.mrb[31].mxu0  ;;  %v1924_v32 = vld [vmem:[#allocation14 + $0x28] sm:$0xff]  ;;  %v1926_v0 = vld [vmem:[#allocation14 + $0x38] sm:$0xff]  ;;  %3159 = vmatprep.subr.bf16.mxu0 %v3158_v2  ;;  %3190 = vmatprep.subr.bf16.mxu1 %v3158_v2 }
 0x23c   : > { %v4720_v19 = vadd.f32 %v1197_v36, %v4586_v44  ;;  %1517 = vmax.xlane.f32.xlu1 %v1496_v43  ;;  %1455 = vadd.xlane.f32.xlu0 %v1433_v58  ;;  %v4723_v47 = vadd.f32 %v828_v38, %v4486_v42  ;;  %v1199_v7 = vpop.f32.mrb[47].mxu1  ;;  %v3162_v40 = vpack.c.bf16 %v1926_v0, %v1924_v32 }
 0x23d   : > { %5524 = vst [vmem:[#allocation41_spill] sm:$0xff] %v4714_v59  ;;  %v1200_v56 = vadd.f32 %v1199_v7, %v4490_v63  ;;  %v4730_v36 = vadd.f32 %v4594_v21, %v4577_v5  ;;  %3161 = vmatpush1.bf16.msra.mxu0 %v3160_v50  ;;  %3198 = vmatpush1.bf16.msra.mxu1 %v3160_v50  ;;  %v1930_v50 = vld [vmem:[#allocation14 + $0x58] sm:$0xff] }
 0x23e   : > { %5525 = vst [vmem:[#allocation42_spill] sm:$0xff] %v4720_v19  ;;  %v2918_v43 = vpop.f32.mrb[32].mxu0  ;;  %v1434_v42 = vadd.f32 %v4720_v19, %v4707_v29  ;;  %v3164_v38 = vpack.c.bf16 %v1925_v17, %v1923_v13  ;;  %3163 = vmatprep.subr.bf16.mxu0 %v3162_v40  ;;  %3191 = vmatprep.subr.bf16.mxu1 %v3162_v40  ;;  %v1929_v17 = vld [vmem:[#allocation14 + $0x50] sm:$0xff] }
 0x23f   : > { %v4735_v58 = vadd.f32 %v1200_v56, %v4589_v28  ;;  %v1203_v7 = vpop.f32.mrb[48].mxu1  ;;  %v2919_v59 = vpop.f32.mrb[33].mxu0  ;;  %v1498_v0 = vmax.f32 %v4707_v29, %v4720_v19  ;;  %v3166_v28 = vpack.c.bf16 %v1930_v50, %v1928_v8  ;;  %v1927_v56 = vld [vmem:[#allocation14 + $0x40] sm:$0xff]  ;;  %v4745_v40 = vadd.f32 %v4608_v55, %v4577_v5 }
 0x240   : > { %v4738_v2 = vadd.f32 %v1203_v7, %v4586_v44  ;;  %v2920_v32 = vadd.f32 %v2919_v59, %v2918_v43  ;;  %1519 = vmax.xlane.f32.xlu1 %v1497_v33  ;;  %1457 = vadd.xlane.f32.xlu0 %v1434_v42  ;;  %v1205_v21 = vpop.f32.mrb[49].mxu1  ;;  %v3168_v50 = vpack.c.bf16 %v1929_v17, %v1927_v56  ;;  %v1931_v29 = vld [vmem:[#allocation14 + $0x60] sm:$0xff] }
 0x241   : > { %5526 = vst [vmem:[#allocation43_spill] sm:$0xff] %v4735_v58  ;;  %v1206_v13 = vadd.f32 %v1205_v21, %v4490_v63  ;;  %3165 = vmatpush1.bf16.msra.mxu0 %v3164_v38  ;;  %3199 = vmatpush1.bf16.msra.mxu1 %v3164_v38 }
 0x242   : > { %5527 = vst [vmem:[#allocation44_spill] sm:$0xff] %v4738_v2  ;;  %v1317_v7 = vadd.f32 %v2920_v32, %v4495_v1  ;;  %v2921_v59 = vpop.f32.mrb[34].mxu0  ;;  %v1435_v33 = vadd.f32 %v4738_v2, %v4730_v36  ;;  %v1499_v8 = vmax.f32 %v4730_v36, %v4738_v2  ;;  %3167 = vmatprep.subr.bf16.mxu0 %v3166_v28  ;;  %v1933_v2 = vld [vmem:[#allocation14 + $0x70] sm:$0xff] }
 0x243   : > { %v4751_v43 = vadd.f32 %v1206_v13, %v4603_v62  ;;  %v1209_v42 = vpop.f32.mrb[50].mxu1  ;;  %v2922_v21 = vpop.f32.mrb[35].mxu0  ;;  %3192 = vmatprep.subr.bf16.mxu1 %v3166_v28  ;;  %v1932_v62 = vld [vmem:[#allocation14 + $0x68] sm:$0xff]  ;;  %v1934_v13 = vld [vmem:[#allocation14 + $0x78] sm:$0xff]  ;;  %v4764_v28 = vadd.f32 %v4626_v24, %v4577_v5 }
 0x244   : > { %v4756_v55 = vadd.f32 %v1317_v7, %v4498_v6  ;;  %v4759_v32 = vadd.f32 %v1209_v42, %v4586_v44  ;;  %v2923_v58 = vadd.f32 %v2922_v21, %v2921_v59  ;;  %1521 = vmax.xlane.f32.xlu1 %v1498_v0  ;;  %1459 = vadd.xlane.f32.xlu0 %v1435_v33  ;;  %v1211_v38 = vpop.f32.mrb[51].mxu1 }
 0x245   : > { %5528 = vst [vmem:[#allocation45_spill] sm:$0xff] %v4751_v43  ;;  %v1212_v43 = vadd.f32 %v1211_v38, %v4490_v63  ;;  %v3170_v19 = vpack.c.bf16 %v1934_v13, %v1932_v62  ;;  %3169 = vmatpush1.bf16.msra.mxu0 %v3168_v50  ;;  %3200 = vmatpush1.bf16.msra.mxu1 %v3168_v50  ;;  %v1935_v13 = vld [vmem:[#allocation14 + $0x80] sm:$0xff] }
 0x246   : > { %v1322_v6 = vadd.f32 %v2923_v58, %v4495_v1  ;;  %v2924_v56 = vpop.f32.mrb[36].mxu0  ;;  %v1436_v17 = vadd.f32 %v4759_v32, %v4745_v40  ;;  %v1500_v33 = vmax.f32 %v4745_v40, %v4759_v32  ;;  %v3172_v42 = vpack.c.bf16 %v1933_v2, %v1931_v29 }
 0x247   : > { %v4770_v0 = vadd.f32 %v1212_v43, %v4614_v11  ;;  %v1215_v7 = vpop.f32.mrb[52].mxu1  ;;  %v2925_v59 = vpop.f32.mrb[37].mxu0  ;;  %3171 = vmatprep.subr.bf16.mxu0 %v3170_v19  ;;  %3193 = vmatprep.subr.bf16.mxu1 %v3170_v19  ;;  %v1936_v11 = vld [vmem:[#allocation14 + $0x88] sm:$0xff]  ;;  %v1938_v43 = vld [vmem:[#allocation14 + $0x98] sm:$0xff]  ;;  %v4783_v29 = vadd.f32 %v4639_v49, %v4577_v5 }
 0x248   : > { %v4775_v24 = vadd.f32 %v1322_v6, %v4501_v10  ;;  %v4778_v58 = vadd.f32 %v1215_v7, %v4586_v44  ;;  %v2926_v21 = vadd.f32 %v2925_v59, %v2924_v56  ;;  %1523 = vmax.xlane.f32.xlu1 %v1499_v8  ;;  %1461 = vadd.xlane.f32.xlu0 %v1436_v17  ;;  %v1217_v50 = vpop.f32.mrb[53].mxu1 }
 0x249   : > { %5529 = vst [vmem:[#allocation46_spill] sm:$0xff] %v4770_v0  ;;  %v1218_v38 = vadd.f32 %v1217_v50, %v4490_v63  ;;  %v3174_v62 = vpack.c.bf16 %v1938_v43, %v1936_v11  ;;  %v1937_v0 = vld [vmem:[#allocation14 + $0x90] sm:$0xff]  ;;  %3173 = vmatpush1.bf16.msra.mxu0 %v3172_v42  ;;  %3201 = vmatpush1.bf16.msra.mxu1 %v3172_v42  ;;  %v1942_v50 = vld [vmem:[#allocation14 + $0xb8] sm:$0xff] }
 0x24a   : > { %v1327_v10 = vadd.f32 %v2926_v21, %v4495_v1  ;;  %v2927_v19 = vpop.f32.mrb[38].mxu0  ;;  %v1437_v2 = vadd.f32 %v4778_v58, %v4764_v28  ;;  %v1501_v17 = vmax.f32 %v4764_v28, %v4778_v58  ;;  %v3176_v7 = vpack.c.bf16 %v1937_v0, %v1935_v13 }
 0x24b   : > { %v4789_v8 = vadd.f32 %v1218_v38, %v4634_v41  ;;  %v1221_v6 = vpop.f32.mrb[54].mxu1  ;;  %v2928_v56 = vpop.f32.mrb[39].mxu0  ;;  %3175 = vmatprep.subr.bf16.mxu0 %v3174_v62  ;;  %3194 = vmatprep.subr.bf16.mxu1 %v3174_v62  ;;  %v1940_v41 = vld [vmem:[#allocation14 + $0xa8] sm:$0xff]  ;;  %v1939_v38 = vld [vmem:[#allocation14 + $0xa0] sm:$0xff]  ;;  %v4802_v0 = vadd.f32 %v4654_v12, %v4577_v5 }
 0x24c   : > { %v4794_v49 = vadd.f32 %v1327_v10, %v4504_v15  ;;  %v4797_v59 = vadd.f32 %v1221_v6, %v4586_v44  ;;  %v2929_v21 = vadd.f32 %v2928_v56, %v2927_v19  ;;  %1525 = vmax.xlane.f32.xlu1 %v1500_v33  ;;  %1463 = vadd.xlane.f32.xlu0 %v1437_v2  ;;  %v1223_v42 = vpop.f32.mrb[55].mxu1 }
 0x24d   : > { %5530 = vst [vmem:[#allocation47_spill] sm:$0xff] %v4789_v8  ;;  %v1224_v11 = vadd.f32 %v1223_v42, %v4490_v63  ;;  %v3178_v43 = vpack.c.bf16 %v1942_v50, %v1940_v41  ;;  %v1941_v8 = vld [vmem:[#allocation14 + $0xb0] sm:$0xff]  ;;  %3177 = vmatpush1.bf16.msra.mxu0 %v3176_v7  ;;  %3202 = vmatpush1.bf16.msra.mxu1 %v3176_v7  ;;  %v1944_v50 = vld [vmem:[#allocation14 + $0xc8] sm:$0xff] }
 0x24e   : > { %5531 = vst [vmem:[#allocation48_spill] sm:$0xff] %v4794_v49  ;;  %v1332_v15 = vadd.f32 %v2929_v21, %v4495_v1  ;;  %v2930_v62 = vpop.f32.mrb[40].mxu0  ;;  %v1438_v13 = vadd.f32 %v4797_v59, %v4783_v29  ;;  %v1502_v2 = vmax.f32 %v4783_v29, %v4797_v59  ;;  %v3180_v6 = vpack.c.bf16 %v1941_v8, %v1939_v38 }
 0x24f   : > { %v4808_v33 = vadd.f32 %v1224_v11, %v4647_v61  ;;  %v2931_v10 = vpop.f32.mrb[41].mxu0  ;;  %v1227_v19 = vpop.f32.mrb[56].mxu1  ;;  %3179 = vmatprep.subr.bf16.mxu0 %v3178_v43  ;;  %3195 = vmatprep.subr.bf16.mxu1 %v3178_v43  ;;  %v4820_v61 = vadd.f32 %v4532_v46, %v4577_v5  ;;  %v4825_v8 = vadd.f32 %v4631_v35, %v4586_v44  ;;  %v1946_v11 = vld [vmem:[#allocation14 + $0xd8] sm:$0xff] }
 0x250   : > { %v4813_v12 = vadd.f32 %v1332_v15, %v4507_v20  ;;  %v2932_v56 = vadd.f32 %v2931_v10, %v2930_v62  ;;  %1527 = vmax.xlane.f32.xlu1 %v1501_v17  ;;  %1465 = vadd.xlane.f32.xlu0 %v1438_v13  ;;  %v4816_v21 = vadd.f32 %v1227_v19, %v4586_v44  ;;  %v1229_v7 = vpop.f32.mrb[57].mxu1 }
 0x251   : > { %5532 = vst [vmem:[#allocation49_spill] sm:$0xff] %v4808_v33  ;;  %v1230_v42 = vadd.f32 %v1229_v7, %v4490_v63  ;;  %v1492_v17 = vmax.f32 %v4619_v23, %v4622_v27  ;;  %3181 = vmatpush1.bf16.msra.mxu0 %v3180_v6  ;;  %3203 = vmatpush1.bf16.msra.mxu1 %v3180_v6  ;;  %v5551_v33 = vld [vmem:[#allocation34_spill] sm:$0xff] }
 0x252   : > { %5533 = vst [vmem:[#allocation50_spill] sm:$0xff] %v4813_v12  ;;  %v1337_v20 = vadd.f32 %v2932_v56, %v4495_v1  ;;  %v2933_v41 = vpop.f32.mrb[42].mxu0  ;;  %v3182_v15 = vpack.c.bf16 %v1946_v11, %v1944_v50  ;;  %v1439_v13 = vadd.f32 %v4816_v21, %v4802_v0  ;;  %v1429_v56 = vadd.f32 %v4825_v8, %v4820_v61 }
 0x253   : > { %v4831_v43 = vadd.f32 %v1230_v42, %v4663_v37  ;;  %v2934_v46 = vpop.f32.mrb[43].mxu0  ;;  %v1233_v38 = vpop.f32.mrb[58].mxu1  ;;  %v4857_v11 = vadd.f32 %v4540_v57, %v4577_v5 }
 0x254   : > { %v4834_v62 = vadd.f32 %v1337_v20, %v4510_v26  ;;  %v2935_v35 = vadd.f32 %v2934_v46, %v2933_v41  ;;  %1529 = vmax.xlane.f32.xlu1 %v1502_v2  ;;  %1509 = vmax.xlane.f32.xlu0 %v1492_v17  ;;  %v1235_v10 = vpop.f32.mrb[59].mxu1  ;;  %v4844_v26 = vadd.f32 %v4672_v4, %v4577_v5 }
 0x255   : > { %5534 = vst [vmem:[#allocation51_spill] sm:$0xff] %v4831_v43  ;;  %v1236_v19 = vadd.f32 %v1235_v10, %v4490_v63  ;;  %3183 = vmatprep.subr.bf16.mxu0 %v3182_v15  ;;  %3196 = vmatprep.subr.bf16.mxu1 %v3182_v15  ;;  %v4853_v17 = vadd.f32 %v1233_v38, %v4586_v44 }
 0x256   : > { %v1342_v37 = vadd.f32 %v2935_v35, %v4495_v1  ;;  %v2936_v6 = vpop.f32.mrb[44].mxu0  ;;  %v1503_v38 = vmax.f32 %v4802_v0, %v4816_v21  ;;  %v1493_v35 = vmax.f32 %v4820_v61, %v4825_v8 }
 0x257   : > { %v2937_v2 = vpop.f32.mrb[45].mxu0  ;;  %v4847_v7 = vadd.f32 %v1236_v19, %v4681_v3  ;;  %v1239_v42 = vpop.f32.mrb[60].mxu1 }
 0x258   : > { %v4850_v20 = vadd.f32 %v1342_v37, %v4513_v14  ;;  %v2938_v41 = vadd.f32 %v2937_v2, %v2936_v6  ;;  %1467 = vadd.xlane.f32.xlu1 %v1439_v13  ;;  %1447 = vadd.xlane.f32.xlu0 %v1429_v56  ;;  %v1241_v50 = vpop.f32.mrb[61].mxu1  ;;  %v4860_v4 = vadd.f32 %v1239_v42, %v4586_v44  ;;  %v1943_v2 = vld [vmem:[#allocation14 + $0xc0] sm:$0xff] }
 0x259   : > { %5535 = vst [vmem:[#allocation52_spill] sm:$0xff] %v4847_v7  ;;  %v1242_v3 = vadd.f32 %v1241_v50, %v4490_v63  ;;  %v4865_v14 = vadd.f32 %v4644_v45, %v4586_v44  ;;  %v1440_v45 = vadd.f32 %v4853_v17, %v4844_v26  ;;  %v1948_v50 = vld [vmem:[#allocation14 + $0xe8] sm:$0xff] }
 0x25a   : > { %v1347_v46 = vadd.f32 %v2938_v41, %v4495_v1  ;;  %v2939_v15 = vpop.f32.mrb[46].mxu0  ;;  %v1945_v41 = vld [vmem:[#allocation14 + $0xd0] sm:$0xff] }
 0x25b   : > { %v2940_v57 = vpop.f32.mrb[47].mxu0  ;;  %v4873_v5 = vadd.f32 %v1242_v3, %v4702_v16  ;;  %v1245_v13 = vpop.f32.mrb[62].mxu1  ;;  %v1950_v3 = vld [vmem:[#allocation14 + $0xf8] sm:$0xff] }
 0x25c   : > { %v4876_v10 = vadd.f32 %v1347_v46, %v4516_v31  ;;  %v2941_v19 = vadd.f32 %v2940_v57, %v2939_v15  ;;  %1531 = vmax.xlane.f32.xlu1 %v1503_v38  ;;  %1511 = vmax.xlane.f32.xlu0 %v1493_v35  ;;  %v1247_v37 = vpop.f32.mrb[63].mxu1  ;;  %v4881_v6 = vadd.f32 %v1245_v13, %v4586_v44  ;;  %v1949_v35 = vld [vmem:[#allocation14 + $0xf0] sm:$0xff] }
 0x25d   : > { %5536 = vst [vmem:[#allocation53_spill] sm:$0xff] %v4873_v5  ;;  %v1248_v56 = vadd.f32 %v1247_v37, %v4490_v63  ;;  %v1430_v31 = vadd.f32 %v4865_v14, %v4857_v11  ;;  %v1947_v63 = vld [vmem:[#allocation14 + $0xe0] sm:$0xff]  ;;  %v3184_v57 = vpack.c.bf16 %v1945_v41, %v1943_v2  ;;  %v3186_v13 = vpack.c.bf16 %v1950_v3, %v1948_v50 }
 0x25e   : > { %5537 = vst [vmem:[#allocation54_spill] sm:$0xff] %v4876_v10  ;;  %v1352_v16 = vadd.f32 %v2941_v19, %v4495_v1  ;;  %v2942_v42 = vpop.f32.mrb[48].mxu0  ;;  %v1504_v5 = vmax.f32 %v4844_v26, %v4853_v17  ;;  %v1441_v2 = vadd.f32 %v4860_v4, %v4696_v51 }
 0x25f   : > { %v2943_v46 = vpop.f32.mrb[49].mxu0  ;;  %v4888_v15 = vadd.f32 %v1248_v56, %v4723_v47  ;;  %v1494_v47 = vmax.f32 %v4857_v11, %v4865_v14  ;;  %3185 = vmatpush1.bf16.msra.mxu0 %v3184_v57  ;;  %3204 = vmatpush1.bf16.msra.mxu1 %v3184_v57 }
 0x260   : > { %v4891_v38 = vadd.f32 %v1352_v16, %v4519_v53  ;;  %v2944_v44 = vadd.f32 %v2943_v46, %v2942_v42  ;;  %1469 = vadd.xlane.f32.xlu1 %v1440_v45  ;;  %1449 = vadd.xlane.f32.xlu0 %v1430_v31  ;;  %v3188_v53 = vpack.c.bf16 %v1949_v35, %v1947_v63  ;;  %v5470_v42 = vmov 0.0  }
 0x261   : > { %5538 = vst [vmem:[#allocation55_spill] sm:$0xff] %v4888_v15  ;;  %3187 = vmatprep.subr.bf16.mxu0 %v3186_v13  ;;  %2027 = vmatprep.mubr.f32.mxu0 %v5470_v42  ;;  %v5548_v15 = vld [vmem:[#allocation28_spill] sm:$0xff] }
 0x262   : > { %5539 = vst [vmem:[#allocation56_spill] sm:$0xff] %v4891_v38  ;;  %v1357_v19 = vadd.f32 %v2944_v44, %v4495_v1  ;;  %v2945_v37 = vpop.f32.mrb[50].mxu0  ;;  %3197 = vmatprep.subr.bf16.mxu1 %v3186_v13  ;;  %2051 = vmatprep.mubr.f32.mxu1 %v5470_v42  ;;  %v1505_v44 = vmax.f32 %v4696_v51, %v4860_v4 }
 0x263   : > { %v2946_v56 = vpop.f32.mrb[51].mxu0  ;;  %3189 = vmatpush1.bf16.msra.mxu0 %v3188_v53  ;;  %3205 = vmatpush1.bf16.msra.mxu1 %v3188_v53  ;;  %v1442_v13 = vadd.f32 %v4881_v6, %v4717_v30 }
 0x264   : > { %v4899_v45 = vadd.f32 %v1357_v19, %v4527_v25  ;;  %v2947_v16 = vadd.f32 %v2946_v56, %v2945_v37  ;;  %1533 = vmax.xlane.f32.xlu1 %v1504_v5  ;;  %1513 = vmax.xlane.f32.xlu0 %v1494_v47 }
 0x266   : > { %5540 = vst [vmem:[#allocation57_spill] sm:$0xff] %v4899_v45  ;;  %v1362_v31 = vadd.f32 %v2947_v16, %v4495_v1  ;;  %v2948_v41 = vpop.f32.mrb[52].mxu0 }
 0x267   : > { %v2949_v50 = vpop.f32.mrb[53].mxu0 }
 0x268   : > { %v4907_v25 = vadd.f32 %v1362_v31, %v4535_v48  ;;  %v2950_v5 = vadd.f32 %v2949_v50, %v2948_v41  ;;  %1471 = vadd.xlane.f32.xlu1 %v1441_v2 }
 0x26a   : > { %5541 = vst [vmem:[#allocation58_spill] sm:$0xff] %v4907_v25  ;;  %v1367_v3 = vadd.f32 %v2950_v5, %v4495_v1  ;;  %v2951_v46 = vpop.f32.mrb[54].mxu0 }
 0x26b   : > { %v2952_v63 = vpop.f32.mrb[55].mxu0 }
 0x26c   : > { %v4913_v35 = vadd.f32 %v1367_v3, %v4543_v39  ;;  %v2953_v57 = vadd.f32 %v2952_v63, %v2951_v46  ;;  %1535 = vmax.xlane.f32.xlu1 %v1505_v44  ;;  %v1506_v39 = vmax.f32 %v4717_v30, %v4881_v6 }
 0x26e   : > { %5542 = vst [vmem:[#allocation59_spill] sm:$0xff] %v4913_v35  ;;  %v1372_v48 = vadd.f32 %v2953_v57, %v4495_v1  ;;  %v2954_v19 = vpop.f32.mrb[56].mxu0 }
 0x26f   : > { %v2955_v37 = vpop.f32.mrb[57].mxu0 }
 0x270   : > { %v4919_v47 = vadd.f32 %v1372_v48, %v4551_v9  ;;  %v2956_v56 = vadd.f32 %v2955_v37, %v2954_v19  ;;  %1473 = vadd.xlane.f32.xlu1 %v1442_v13 }
 0x272   : > { %5543 = vst [vmem:[#allocation60_spill] sm:$0xff] %v4919_v47  ;;  %v1377_v53 = vadd.f32 %v2956_v56, %v4495_v1  ;;  %v2957_v16 = vpop.f32.mrb[58].mxu0  ;;  %v4939_v56 = vstv %s1539_s11 }
 0x273   : > { %v2958_v2 = vpop.f32.mrb[59].mxu0 }
 0x274   : > { %v4925_v31 = vadd.f32 %v1377_v53, %v4559_v18  ;;  %v2959_v41 = vadd.f32 %v2958_v2, %v2957_v16  ;;  %1537 = vmax.xlane.f32.xlu1 %v1506_v39  ;;  %v4941_v53 = vstv %s2743_s21  ;;  %v4945_v16 = vstv %s2744_s23 }
 0x276   : > { %5544 = vst [vmem:[#allocation61_spill] sm:$0xff] %v4925_v31  ;;  %v1382_v50 = vadd.f32 %v2959_v41, %v4495_v1  ;;  %v2960_v5 = vpop.f32.mrb[60].mxu0 }
 0x277   : > { %v2961_v3 = vpop.f32.mrb[61].mxu0 }
 0x278   : > { %v4929_v9 = vadd.f32 %v1382_v50, %v4570_v22  ;;  %v2962_v46 = vadd.f32 %v2961_v3, %v2960_v5  ;;  %v4951_v50 = vstv %s1591_s8  ;;  %v4953_v5 = vstv %s2745_s29 }
 0x27a   : > { %5545 = vst [vmem:[#allocation62_spill] sm:$0xff] %v4929_v9  ;;  %v1387_v44 = vadd.f32 %v2962_v46, %v4495_v1  ;;  %v2963_v63 = vpop.f32.mrb[62].mxu0 }
 0x27b   : > { %v2964_v57 = vpop.f32.mrb[63].mxu0 }
 0x27c   : > { %v4933_v13 = vadd.f32 %v1387_v44, %v4582_v34  ;;  %v2965_v48 = vadd.f32 %v2964_v57, %v2963_v63  ;;  %v4943_v34 = vstv %s2726_s4 }
 0x27e   : > { %5546 = vst [vmem:[#allocation63_spill] sm:$0xff] %v4933_v13  ;;  %v1392_v18 = vadd.f32 %v2965_v48, %v4495_v1 }
 0x280   : > { %v4937_v19 = vadd.f32 %v1392_v18, %v4597_v54 }
 0x282   : > { %5547 = vst [vmem:[#allocation64_spill] sm:$0xff] %v4937_v19 }
 0x2b1   : > { %v1444_v22 = vpop.xlane.xlu0 %1443 }
 0x2b2   : > { %v1475_v37 = vmul.f32 0.00390625, %v1444_v22 }
 0x2b4   : > { %v1541_v54 = vmul.f32 %v4939_v56, %v1475_v37  ;;  %v1707_v39 = vmul.f32 %v4941_v53, %v1475_v37 }
 0x2b5   : > { %v1508_v1 = vpop.xlane.xlu0 %1507 }
 0x2b6   : > { %v1559_v2 = vmul.f32 %v4943_v34, %v1508_v1  ;;  %v1725_v41 = vmul.f32 %v4945_v16, %v1508_v1 }
 0x2b8   : > { %v1575_v3 = vadd.f32 %v1559_v2, %v1541_v54  ;;  %v1741_v46 = vadd.f32 %v1725_v41, %v1707_v39 }
 0x2b9   : > { %v1446_v18 = vpop.xlane.xlu0 %1445 }
 0x2ba   : > { %v1593_v44 = vadd.f32 %v4951_v50, %v1575_v3  ;;  %v1759_v63 = vadd.f32 %v4953_v5, %v1741_v46 }
 0x2bc   : > { %v2727_v57 = vmul.f32 -1.442695, %v1593_v44  ;;  %v2746_v48 = vmul.f32 -1.442695, %v1759_v63 }
 0x2be   : > { %3315 = vpow2.f32 %v2727_v57 }
 0x2bf   : > { %3317 = vpow2.f32 %v2746_v48 }
 0x2c1   : > { %v1452_v22 = vpop.xlane.xlu0 %1451 }
 0x2c2   : > { %v1479_v37 = vmul.f32 0.00390625, %v1452_v22 }
 0x2c4   : > { %v1545_v42 = vmul.f32 %v4939_v56, %v1479_v37  ;;  %v1711_v13 = vmul.f32 %v4941_v53, %v1479_v37 }
 0x2c5   : > { %v1454_v1 = vpop.xlane.xlu1 %1453  ;;  %v1516_v19 = vpop.xlane.xlu0 %1515 }
 0x2c6   : > { %v1480_v9 = vmul.f32 0.00390625, %v1454_v1  ;;  %v1563_v54 = vmul.f32 %v4943_v34, %v1516_v19  ;;  %v1729_v39 = vmul.f32 %v4945_v16, %v1516_v19 }
 0x2c8   : > { %v3316_v2 = vpop.eup %3315  ;;  %v1579_v41 = vadd.f32 %v1563_v54, %v1545_v42  ;;  %v1745_v3 = vadd.f32 %v1729_v39, %v1711_v13  ;;  %v1546_v63 = vmul.f32 %v4939_v56, %v1480_v9  ;;  %v1712_v1 = vmul.f32 %v4941_v53, %v1480_v9 }
 0x2c9   : > { %v3318_v46 = vpop.eup %3317  ;;  %v1657_v44 = vadd.f32 1.0, %v3316_v2  ;;  %v1518_v57 = vpop.xlane.xlu1 %1517 }
 0x2ca   : > { %v1456_v48 = vpop.xlane.xlu0 %1455  ;;  %v1823_v22 = vadd.f32 1.0, %v3318_v46  ;;  %v1597_v31 = vadd.f32 %v4951_v50, %v1579_v41  ;;  %v1763_v47 = vadd.f32 %v4953_v5, %v1745_v3  ;;  %v1564_v37 = vmul.f32 %v4943_v34, %v1518_v57 }
 0x2cb   : > { %3319 = vrcp.f32 %v1657_v44  ;;  %v1730_v19 = vmul.f32 %v4945_v16, %v1518_v57  ;;  %v1481_v42 = vmul.f32 0.00390625, %v1456_v48 }
 0x2cc   : > { %3321 = vrcp.f32 %v1823_v22  ;;  %v2731_v13 = vmul.f32 -1.442695, %v1597_v31  ;;  %v2750_v54 = vmul.f32 -1.442695, %v1763_v47  ;;  %v1580_v39 = vadd.f32 %v1564_v37, %v1546_v63 }
 0x2cd   : > { %v1746_v2 = vadd.f32 %v1730_v19, %v1712_v1  ;;  %v1547_v35 = vmul.f32 %v4939_v56, %v1481_v42  ;;  %v1713_v46 = vmul.f32 %v4941_v53, %v1481_v42  ;;  %v1520_v41 = vpop.xlane.xlu1 %1519  ;;  %v4973_v22 = vmul.f32 0.00390625, %v1446_v18 }
 0x2ce   : > { %v1458_v25 = vpop.xlane.xlu0 %1457  ;;  %3323 = vpow2.f32 %v2731_v13  ;;  %v1598_v3 = vadd.f32 %v4951_v50, %v1580_v39  ;;  %v1565_v44 = vmul.f32 %v4943_v34, %v1520_v41  ;;  %v1731_v9 = vmul.f32 %v4945_v16, %v1520_v41 }
 0x2cf   : > { %3325 = vpow2.f32 %v2750_v54  ;;  %v1764_v57 = vadd.f32 %v4953_v5, %v1746_v2  ;;  %v1482_v31 = vmul.f32 0.00390625, %v1458_v25 }
 0x2d0   : > { %v2732_v47 = vmul.f32 -1.442695, %v1598_v3  ;;  %v1581_v63 = vadd.f32 %v1565_v44, %v1547_v35  ;;  %v1747_v48 = vadd.f32 %v1731_v9, %v1713_v46  ;;  %v4983_v44 = vmul.f32 %v4939_v56, %v4973_v22 }
 0x2d1   : > { %v2751_v37 = vmul.f32 -1.442695, %v1764_v57  ;;  %v1548_v1 = vmul.f32 %v4939_v56, %v1482_v31  ;;  %v1714_v19 = vmul.f32 %v4941_v53, %v1482_v31  ;;  %v1522_v42 = vpop.xlane.xlu1 %1521 }
 0x2d2   : > { %v1460_v13 = vpop.xlane.xlu0 %1459  ;;  %3327 = vpow2.f32 %v2732_v47  ;;  %v1599_v39 = vadd.f32 %v4951_v50, %v1581_v63  ;;  %v1765_v54 = vadd.f32 %v4953_v5, %v1747_v48  ;;  %v1566_v2 = vmul.f32 %v4943_v34, %v1522_v42 }
 0x2d3   : > { %3329 = vpow2.f32 %v2751_v37  ;;  %v1732_v25 = vmul.f32 %v4945_v16, %v1522_v42  ;;  %v1483_v35 = vmul.f32 0.00390625, %v1460_v13 }
 0x2d4   : > { %v2733_v18 = vmul.f32 -1.442695, %v1599_v39  ;;  %v2752_v46 = vmul.f32 -1.442695, %v1765_v54  ;;  %v1582_v41 = vadd.f32 %v1566_v2, %v1548_v1 }
 0x2d5   : > { %v3320_v3 = vpop.eup %3319  ;;  %v1748_v9 = vadd.f32 %v1732_v25, %v1714_v19  ;;  %v1549_v57 = vmul.f32 %v4939_v56, %v1483_v35  ;;  %v1715_v31 = vmul.f32 %v4941_v53, %v1483_v35  ;;  %v1524_v47 = vpop.xlane.xlu1 %1523 }
 0x2d6   : > { %v1462_v63 = vpop.xlane.xlu0 %1461  ;;  %v3322_v48 = vpop.eup %3321  ;;  %3331 = vpow2.f32 %v2733_v18  ;;  %v1600_v37 = vadd.f32 %v4951_v50, %v1582_v41  ;;  %v1567_v42 = vmul.f32 %v4943_v34, %v1524_v47  ;;  %v1733_v1 = vmul.f32 %v4945_v16, %v1524_v47 }
 0x2d7   : > { %3333 = vpow2.f32 %v2752_v46  ;;  %v1766_v13 = vadd.f32 %v4953_v5, %v1748_v9  ;;  %v1484_v39 = vmul.f32 0.00390625, %v1462_v63  ;;  %v1871_v19 = vmul.f32 %v3320_v3, %v4592_v52 }
 0x2d8   : > { %v3324_v54 = vpop.eup %3323  ;;  %v2734_v2 = vmul.f32 -1.442695, %v1600_v37  ;;  %v1583_v25 = vadd.f32 %v1567_v42, %v1549_v57  ;;  %v1749_v35 = vadd.f32 %v1733_v1, %v1715_v31  ;;  %v1887_v45 = vmul.f32 %v3322_v48, %v5548_v15 }
 0x2d9   : > { %v3326_v7 = vpop.eup %3325  ;;  %v1661_v18 = vadd.f32 1.0, %v3324_v54  ;;  %v2753_v38 = vmul.f32 -1.442695, %v1766_v13  ;;  %v1550_v41 = vmul.f32 %v4939_v56, %v1484_v39  ;;  %v1716_v10 = vmul.f32 %v4941_v53, %v1484_v39  ;;  %v1526_v47 = vpop.xlane.xlu1 %1525 }
 0x2da   : > { %v1464_v46 = vpop.xlane.xlu0 %1463  ;;  %v1827_v43 = vadd.f32 1.0, %v3326_v7  ;;  %3335 = vpow2.f32 %v2734_v2  ;;  %v1601_v9 = vadd.f32 %v4951_v50, %v1583_v25  ;;  %v1767_v52 = vadd.f32 %v4953_v5, %v1749_v35 }
 0x2db   : > { %3337 = vrcp.f32 %v1661_v18  ;;  %v1568_v3 = vmul.f32 %v4943_v34, %v1526_v47  ;;  %v1734_v15 = vmul.f32 %v4945_v16, %v1526_v47  ;;  %v1485_v57 = vmul.f32 0.00390625, %v1464_v46 }
 0x2dc   : > { %v3328_v31 = vpop.eup %3327  ;;  %3339 = vrcp.f32 %v1827_v43  ;;  %v2735_v63 = vmul.f32 -1.442695, %v1601_v9  ;;  %v2754_v48 = vmul.f32 -1.442695, %v1767_v52  ;;  %v1903_v37 = vadd.f32 %v1887_v45, %v1871_v19 }
 0x2dd   : > { %v3330_v42 = vpop.eup %3329  ;;  %v1662_v1 = vadd.f32 1.0, %v3328_v31  ;;  %3341 = vpow2.f32 %v2753_v38  ;;  %v1584_v7 = vadd.f32 %v1568_v3, %v1550_v41  ;;  %v1750_v13 = vadd.f32 %v1734_v15, %v1716_v10  ;;  %v1528_v39 = vpop.xlane.xlu1 %1527 }
 0x2de   : > { %v1466_v54 = vpop.xlane.xlu0 %1465  ;;  %v1828_v2 = vadd.f32 1.0, %v3330_v42  ;;  %3343 = vpow2.f32 %v2735_v63  ;;  %v1551_v25 = vmul.f32 %v4939_v56, %v1485_v57  ;;  %v1717_v35 = vmul.f32 %v4941_v53, %v1485_v57  ;;  %2028 = vmatmul.mubr.f32.vlgmr.msra.gmra.mrb[64].mxu0 %v1903_v37 }
 0x2df   : > { %3345 = vrcp.f32 %v1662_v1  ;;  %v1602_v43 = vadd.f32 %v4951_v50, %v1584_v7  ;;  %v1768_v18 = vadd.f32 %v4953_v5, %v1750_v13  ;;  %v1569_v45 = vmul.f32 %v4943_v34, %v1528_v39 }
 0x2e0   : > { %v5549_v19 = vmov 0.0   ;;  %v3332_v38 = vpop.eup %3331  ;;  %v1708_v10 = vmul.f32 %v4941_v53, %v4973_v22  ;;  %3347 = vrcp.f32 %v1828_v2  ;;  %v1735_v41 = vmul.f32 %v4945_v16, %v1528_v39 }
 0x2e1   : > { %2033 = vmatprep.mubr.f32.mxu0 %v5549_v19  ;;  %v1486_v47 = vmul.f32 0.00390625, %v1466_v54  ;;  %v3334_v46 = vpop.eup %3333  ;;  %v1663_v9 = vadd.f32 1.0, %v3332_v38  ;;  %3349 = vpow2.f32 %v2754_v48  ;;  %v2736_v52 = vmul.f32 -1.442695, %v1602_v43  ;;  %v1530_v15 = vpop.xlane.xlu1 %1529 }
 0x2e2   : > { %v2755_v3 = vmul.f32 -1.442695, %v1768_v18  ;;  %v1510_v57 = vpop.xlane.xlu0 %1509  ;;  %v1829_v31 = vadd.f32 1.0, %v3334_v46  ;;  %v1585_v63 = vadd.f32 %v1569_v45, %v1551_v25  ;;  %v1751_v37 = vadd.f32 %v1735_v41, %v1717_v35 }
 0x2e3   : > { %v1552_v42 = vmul.f32 %v4939_v56, %v1486_v47  ;;  %3351 = vrcp.f32 %v1663_v9  ;;  %v1718_v1 = vmul.f32 %v4941_v53, %v1486_v47  ;;  %v1570_v22 = vmul.f32 %v4943_v34, %v1530_v15 }
 0x2e4   : > { %v1736_v7 = vmul.f32 %v4945_v16, %v1530_v15  ;;  %v3336_v13 = vpop.eup %3335  ;;  %3353 = vrcp.f32 %v1829_v31  ;;  %v1603_v48 = vadd.f32 %v4951_v50, %v1585_v63  ;;  %v1769_v39 = vadd.f32 %v4953_v5, %v1751_v37 }
 0x2e5   : > { %v1560_v54 = vmul.f32 %v4943_v34, %v1510_v57  ;;  %v3338_v2 = vpop.eup %3337  ;;  %v1664_v25 = vadd.f32 1.0, %v3336_v13  ;;  %3355 = vpow2.f32 %v2736_v52  ;;  %v1586_v35 = vadd.f32 %v1570_v22, %v1552_v42  ;;  %v1468_v18 = vpop.xlane.xlu1 %1467 }
 0x2e6   : > { %v1752_v43 = vadd.f32 %v1736_v7, %v1718_v1  ;;  %v1448_v45 = vpop.xlane.xlu0 %1447  ;;  %v3340_v38 = vpop.eup %3339  ;;  %3357 = vpow2.f32 %v2755_v3  ;;  %v2737_v41 = vmul.f32 -1.442695, %v1603_v48  ;;  %v2756_v47 = vmul.f32 -1.442695, %v1769_v39 }
 0x2e7   : > { %v1576_v46 = vadd.f32 %v1560_v54, %v4983_v44  ;;  %v3342_v9 = vpop.eup %3341  ;;  %3359 = vrcp.f32 %v1664_v25  ;;  %v1604_v15 = vadd.f32 %v4951_v50, %v1586_v35  ;;  %v1726_v63 = vmul.f32 %v4945_v16, %v1510_v57 }
 0x2e8   : > { %v1770_v31 = vadd.f32 %v4953_v5, %v1752_v43  ;;  %v3344_v37 = vpop.eup %3343  ;;  %v1830_v52 = vadd.f32 1.0, %v3342_v9  ;;  %3361 = vpow2.f32 %v2737_v41  ;;  %v1487_v1 = vmul.f32 0.00390625, %v1468_v18 }
 0x2e9   : > { %v1594_v42 = vadd.f32 %v4951_v50, %v1576_v46  ;;  %v5020_v22 = vpop.eup %3345  ;;  %v1665_v3 = vadd.f32 1.0, %v3344_v37  ;;  %3363 = vpow2.f32 %v2756_v47  ;;  %v2738_v7 = vmul.f32 -1.442695, %v1604_v15  ;;  %v1532_v13 = vpop.xlane.xlu1 %1531 }
 0x2ea   : > { %v2757_v44 = vmul.f32 -1.442695, %v1770_v31  ;;  %v5022_v48 = vpop.eup %3347  ;;  %3365 = vrcp.f32 %v1830_v52  ;;  %v1742_v54 = vadd.f32 %v1726_v63, %v1708_v10  ;;  %v1553_v57 = vmul.f32 %v4939_v56, %v1487_v1  ;;  %v1512_v25 = vpop.xlane.xlu0 %1511 }
 0x2eb   : > { %v2728_v39 = vmul.f32 -1.442695, %v1594_v42  ;;  %v3350_v35 = vpop.eup %3349  ;;  %3367 = vrcp.f32 %v1665_v3  ;;  %v1719_v43 = vmul.f32 %v4941_v53, %v1487_v1  ;;  %v1477_v18 = vmul.f32 0.00390625, %v1448_v45 }
 0x2ec   : > { %v1571_v41 = vmul.f32 %v4943_v34, %v1532_v13  ;;  %v1831_v46 = vadd.f32 1.0, %v3350_v35  ;;  %3369 = vpow2.f32 %v2738_v7  ;;  %v1760_v47 = vadd.f32 %v4953_v5, %v1742_v54 }
 0x2ed   : > { %v1737_v9 = vmul.f32 %v4945_v16, %v1532_v13  ;;  %v5029_v15 = vpop.eup %3351  ;;  %3371 = vpow2.f32 %v2757_v44  ;;  %v1543_v10 = vmul.f32 %v4939_v56, %v1477_v18  ;;  %v1709_v31 = vmul.f32 %v4941_v53, %v1477_v18  ;;  %v1470_v37 = vpop.xlane.xlu1 %1469  ;;  %v5550_v44 = vld [vmem:[#allocation32_spill] sm:$0xff] }
 0x2ee   : > { %v1587_v63 = vadd.f32 %v1571_v41, %v1553_v57  ;;  %v5033_v52 = vpop.eup %3353  ;;  %3373 = vrcp.f32 %v1831_v46  ;;  %v2747_v45 = vmul.f32 -1.442695, %v1760_v47  ;;  %v1561_v1 = vmul.f32 %v4943_v34, %v1512_v25  ;;  %v1450_v41 = vpop.xlane.xlu0 %1449 }
 0x2ef   : > { %v1753_v42 = vadd.f32 %v1737_v9, %v1719_v43  ;;  %v3356_v3 = vpop.eup %3355  ;;  %3375 = vpow2.f32 %v2728_v39  ;;  %v1727_v13 = vmul.f32 %v4945_v16, %v1512_v25  ;;  %v1875_v54 = vmul.f32 %v3338_v2, %v5550_v44 }
 0x2f0   : > { %v1605_v7 = vadd.f32 %v4951_v50, %v1587_v63  ;;  %v3358_v35 = vpop.eup %3357  ;;  %v1666_v12 = vadd.f32 1.0, %v3356_v3  ;;  %3377 = vpow2.f32 %v2747_v45  ;;  %v1577_v18 = vadd.f32 %v1561_v1, %v1543_v10 }
 0x2f1   : > { %v1771_v57 = vadd.f32 %v4953_v5, %v1753_v42  ;;  %v5040_v46 = vpop.eup %3359  ;;  %v1832_v43 = vadd.f32 1.0, %v3358_v35  ;;  %v1743_v9 = vadd.f32 %v1727_v13, %v1709_v31  ;;  %v1891_v39 = vmul.f32 %v3340_v38, %v5551_v33  ;;  %v1534_v49 = vpop.xlane.xlu1 %1533 }
 0x2f2   : > { %v2739_v47 = vmul.f32 -1.442695, %v1605_v7  ;;  %v3362_v63 = vpop.eup %3361  ;;  %3379 = vrcp.f32 %v1666_v12  ;;  %v1595_v2 = vadd.f32 %v4951_v50, %v1577_v18  ;;  %v1488_v44 = vmul.f32 0.00390625, %v1470_v37 }
 0x2f3   : > { %v2758_v25 = vmul.f32 -1.442695, %v1771_v57  ;;  %v3364_v3 = vpop.eup %3363  ;;  %3381 = vrcp.f32 %v1832_v43  ;;  %v1667_v45 = vadd.f32 1.0, %v3362_v63  ;;  %v1761_v10 = vadd.f32 %v4953_v5, %v1743_v9  ;;  %v5553_v43 = vld [vmem:[#allocation37_spill] sm:$0xff] }
 0x2f4   : > { %v1907_v42 = vadd.f32 %v1891_v39, %v1875_v54  ;;  %v5045_v1 = vpop.eup %3365  ;;  %v1833_v35 = vadd.f32 1.0, %v3364_v3  ;;  %3383 = vpow2.f32 %v2739_v47  ;;  %v2729_v31 = vmul.f32 -1.442695, %v1595_v2  ;;  %v5552_v54 = vld [vmem:[#allocation35_spill] sm:$0xff]  ;;  %v1514_v39 = vpop.xlane.xlu0 %1513 }
 0x2f5   : > { %v1554_v33 = vmul.f32 %v4939_v56, %v1488_v44  ;;  %v5048_v38 = vpop.eup %3367  ;;  %3385 = vrcp.f32 %v1667_v45  ;;  %v2748_v12 = vmul.f32 -1.442695, %v1761_v10  ;;  %v1720_v37 = vmul.f32 %v4941_v53, %v1488_v44  ;;  %v1472_v13 = vpop.xlane.xlu1 %1471 }
 0x2f6   : > { %2052 = vmatmul.mubr.f32.vlgmr.msra.gmra.mrb[64].mxu1 %v1907_v42  ;;  %v1478_v7 = vmul.f32 0.00390625, %v1450_v41  ;;  %v3370_v57 = vpop.eup %3369  ;;  %3387 = vrcp.f32 %v1833_v35  ;;  %v1876_v18 = vmul.f32 %v5020_v22, %v5552_v54  ;;  %v1892_v47 = vmul.f32 %v5022_v48, %v5553_v43 }
 0x2f7   : > { %2057 = vmatprep.mubr.f32.mxu1 %v5549_v19  ;;  %v1572_v9 = vmul.f32 %v4943_v34, %v1534_v49  ;;  %v3372_v63 = vpop.eup %3371  ;;  %v1668_v2 = vadd.f32 1.0, %v3370_v57  ;;  %3389 = vpow2.f32 %v2758_v25  ;;  %v1738_v22 = vmul.f32 %v4945_v16, %v1534_v49 }
 0x2f8   : > { %v1544_v44 = vmul.f32 %v4939_v56, %v1478_v7  ;;  %v1710_v41 = vmul.f32 %v4941_v53, %v1478_v7  ;;  %v3374_v3 = vpop.eup %3373  ;;  %v1834_v45 = vadd.f32 1.0, %v3372_v63  ;;  %3391 = vpow2.f32 %v2729_v31  ;;  %v5554_v63 = vld [vmem:[#allocation39_spill] sm:$0xff] }
 0x2f9   : > { %v1908_v10 = vadd.f32 %v1892_v47, %v1876_v18  ;;  %v1588_v42 = vadd.f32 %v1572_v9, %v1554_v33  ;;  %v3376_v35 = vpop.eup %3375  ;;  %3393 = vrcp.f32 %v1668_v2  ;;  %v1562_v48 = vmul.f32 %v4943_v34, %v1514_v39  ;;  %v1536_v43 = vpop.xlane.xlu1 %1535 }
 0x2fa   : > { %v1728_v54 = vmul.f32 %v4945_v16, %v1514_v39  ;;  %v3378_v57 = vpop.eup %3377  ;;  %3395 = vrcp.f32 %v1834_v45  ;;  %v1658_v25 = vadd.f32 1.0, %v3376_v35  ;;  %v1877_v31 = vmul.f32 %v5029_v15, %v4686_v60  ;;  %v5555_v35 = vld [vmem:[#allocation40_spill] sm:$0xff] }
 0x2fb   : > { %2058 = vmatmul.mubr.f32.gmra.mrb[66].mxu1 %v1908_v10  ;;  %v1606_v7 = vadd.f32 %v4951_v50, %v1588_v42  ;;  %v1824_v18 = vadd.f32 1.0, %v3378_v57  ;;  %3397 = vpow2.f32 %v2748_v12  ;;  %v1754_v33 = vadd.f32 %v1738_v22, %v1720_v37 }
 0x2fc   : > { %2063 = vmatprep.mubr.f32.mxu1 %v5549_v19  ;;  %v1578_v49 = vadd.f32 %v1562_v48, %v1544_v44  ;;  %v3380_v47 = vpop.eup %3379  ;;  %3399 = vrcp.f32 %v1658_v25  ;;  %v1744_v39 = vadd.f32 %v1728_v54, %v1710_v41  ;;  %v1893_v2 = vmul.f32 %v5033_v52, %v5554_v63 }
 0x2fd   : > { %v2740_v9 = vmul.f32 -1.442695, %v1606_v7  ;;  %v3382_v45 = vpop.eup %3381  ;;  %3401 = vrcp.f32 %v1824_v18  ;;  %v1772_v10 = vadd.f32 %v4953_v5, %v1754_v33  ;;  %v1489_v60 = vmul.f32 0.00390625, %v1472_v13  ;;  %v1474_v15 = vpop.xlane.xlu1 %1473  ;;  %v5556_v18 = vld [vmem:[#allocation42_spill] sm:$0xff] }
 0x2fe   : > { %v1596_v42 = vadd.f32 %v4951_v50, %v1578_v49  ;;  %v3384_v12 = vpop.eup %3383  ;;  %v1762_v37 = vadd.f32 %v4953_v5, %v1744_v39  ;;  %v1909_v44 = vadd.f32 %v1893_v2, %v1877_v31  ;;  %v1878_v22 = vmul.f32 %v5040_v46, %v5555_v35  ;;  %v5557_v39 = vld [vmem:[#allocation44_spill] sm:$0xff] }
 0x2ff   : > { %3403 = vpow2.f32 %v2740_v9  ;;  %v3386_v41 = vpop.eup %3385  ;;  %v1669_v48 = vadd.f32 1.0, %v3384_v12  ;;  %v2759_v54 = vmul.f32 -1.442695, %v1772_v10  ;;  %v1555_v57 = vmul.f32 %v4939_v56, %v1489_v60 }
 0x300   : > { %v2730_v52 = vmul.f32 -1.442695, %v1596_v42  ;;  %v3388_v25 = vpop.eup %3387  ;;  %v2749_v7 = vmul.f32 -1.442695, %v1762_v37  ;;  %2064 = vmatmul.mubr.f32.gmra.mrb[68].mxu1 %v1909_v44  ;;  %v1721_v13 = vmul.f32 %v4941_v53, %v1489_v60  ;;  %v1894_v33 = vmul.f32 %v5045_v1, %v5556_v18 }
 0x301   : > { %v1573_v49 = vmul.f32 %v4943_v34, %v1536_v43  ;;  %v3390_v31 = vpop.eup %3389  ;;  %3405 = vrcp.f32 %v1669_v48  ;;  %2069 = vmatprep.mubr.f32.mxu1 %v5549_v19  ;;  %v1739_v46 = vmul.f32 %v4945_v16, %v1536_v43  ;;  %v1879_v9 = vmul.f32 %v5048_v38, %v4730_v36  ;;  %v1538_v12 = vpop.xlane.xlu1 %1537 }
 0x302   : > { %v1895_v63 = vmul.f32 %v3374_v3, %v5557_v39  ;;  %v3392_v2 = vpop.eup %3391  ;;  %v1835_v10 = vadd.f32 1.0, %v3390_v31  ;;  %3407 = vpow2.f32 %v2759_v54  ;;  %v1910_v42 = vadd.f32 %v1894_v33, %v1878_v22 }
 0x303   : > { %v1589_v60 = vadd.f32 %v1573_v49, %v1555_v57  ;;  %v3394_v1 = vpop.eup %3393  ;;  %v1659_v37 = vadd.f32 1.0, %v3392_v2  ;;  %3409 = vpow2.f32 %v2730_v52  ;;  %v1755_v44 = vadd.f32 %v1739_v46, %v1721_v13 }
 0x304   : > { %v1911_v35 = vadd.f32 %v1895_v63, %v1879_v9  ;;  %v3396_v48 = vpop.eup %3395  ;;  %3411 = vrcp.f32 %v1835_v10  ;;  %2070 = vmatmul.mubr.f32.gmra.mrb[70].mxu1 %v1910_v42  ;;  %v1490_v18 = vmul.f32 0.00390625, %v1474_v15  ;;  %v1880_v36 = vmul.f32 %v3380_v47, %v4745_v40 }
 0x305   : > { %v1607_v43 = vadd.f32 %v4951_v50, %v1589_v60  ;;  %v3398_v38 = vpop.eup %3397  ;;  %3413 = vrcp.f32 %v1659_v37  ;;  %v1773_v3 = vadd.f32 %v4953_v5, %v1755_v44  ;;  %2075 = vmatprep.mubr.f32.mxu1 %v5549_v19  ;;  %v1896_v22 = vmul.f32 %v3382_v45, %v4759_v32 }
 0x306   : > { %v1574_v54 = vmul.f32 %v4943_v34, %v1538_v12  ;;  %v3400_v52 = vpop.eup %3399  ;;  %v1825_v57 = vadd.f32 1.0, %v3398_v38  ;;  %3415 = vpow2.f32 %v2749_v7  ;;  %v1556_v33 = vmul.f32 %v4939_v56, %v1490_v18 }
 0x307   : > { %v2741_v13 = vmul.f32 -1.442695, %v1607_v43  ;;  %v3402_v49 = vpop.eup %3401  ;;  %v2760_v15 = vmul.f32 -1.442695, %v1773_v3  ;;  %v1722_v40 = vmul.f32 %v4941_v53, %v1490_v18  ;;  %v1912_v47 = vadd.f32 %v1896_v22, %v1880_v36 }
 0x308   : > { %v1740_v31 = vmul.f32 %v4945_v16, %v1538_v12  ;;  %3417 = vrcp.f32 %v1825_v57  ;;  %2076 = vmatmul.mubr.f32.gmra.mrb[72].mxu1 %v1911_v35  ;;  %v1590_v9 = vadd.f32 %v1574_v54, %v1556_v33  ;;  %v1881_v32 = vmul.f32 %v3386_v41, %v4764_v28 }
 0x309   : > { %v3404_v46 = vpop.eup %3403  ;;  %v1897_v34 = vmul.f32 %v3388_v25, %v4778_v58  ;;  %3419 = vpow2.f32 %v2741_v13  ;;  %2081 = vmatprep.mubr.f32.mxu1 %v5549_v19  ;;  %v1872_v7 = vmul.f32 %v3400_v52, %v4619_v23  ;;  %v1888_v16 = vmul.f32 %v3402_v49, %v4622_v27 }
 0x30a   : > { %v1670_v45 = vadd.f32 1.0, %v3404_v46  ;;  %v1756_v56 = vadd.f32 %v1740_v31, %v1722_v40  ;;  %3421 = vpow2.f32 %v2760_v15  ;;  %v1608_v53 = vadd.f32 %v4951_v50, %v1590_v9 }
 0x30b   : > { %v3406_v39 = vpop.eup %3405  ;;  %v1913_v2 = vadd.f32 %v1897_v34, %v1881_v32  ;;  %v1904_v41 = vadd.f32 %v1888_v16, %v1872_v7  ;;  %v1882_v25 = vmul.f32 %v3394_v1, %v4783_v29  ;;  %v1898_v10 = vmul.f32 %v3396_v48, %v4797_v59  ;;  %v5558_v7 = vld [vmem:[#allocation29_spill] sm:$0xff]  ;;  %v5559_v16 = vld [vmem:[#allocation30_spill] sm:$0xff] }
 0x30c   : > { %3423 = vrcp.f32 %v1670_v45  ;;  %v1774_v63 = vadd.f32 %v4953_v5, %v1756_v56  ;;  %v3408_v28 = vpop.eup %3407  ;;  %2082 = vmatmul.mubr.f32.gmra.mrb[74].mxu1 %v1912_v47  ;;  %v2742_v58 = vmul.f32 -1.442695, %v1608_v53  ;;  %v1883_v29 = vmul.f32 %v3406_v39, %v4802_v0 }
 0x30d   : > { %v3410_v42 = vpop.eup %3409  ;;  %v1836_v23 = vadd.f32 1.0, %v3408_v28  ;;  %2087 = vmatprep.mubr.f32.mxu1 %v5549_v19  ;;  %2034 = vmatmul.mubr.f32.gmra.mrb[66].mxu0 %v1904_v41  ;;  %v1914_v37 = vadd.f32 %v1898_v10, %v1882_v25  ;;  %v2762_v53 = vmul.f32 -1.442695, %v5558_v7  ;;  %v2764_v39 = vmul.f32 -1.442695, %v5559_v16  ;;  %v5564_v41 = vld [vmem:[#allocation41_spill] sm:$0xff] }
 0x30e   : > { %v2761_v60 = vmul.f32 -1.442695, %v1774_v63  ;;  %v3412_v50 = vpop.eup %3411  ;;  %v1660_v27 = vadd.f32 1.0, %v3410_v42  ;;  %3425 = vpow2.f32 %v2742_v58  ;;  %2039 = vmatprep.mubr.f32.mxu0 %v5549_v19  ;;  %v2763_v28 = vmul.f32 -1.442695, %v4756_v55  ;;  %v5563_v58 = vld [vmem:[#allocation38_spill] sm:$0xff] }
 0x30f   : > { %v3414_v12 = vpop.eup %3413  ;;  %3427 = vrcp.f32 %v1836_v23  ;;  %v1899_v59 = vmul.f32 %v3412_v50, %v4816_v21  ;;  %v2774_v25 = vmul.f32 -1.442695, %v5564_v41  ;;  %v5565_v10 = vld [vmem:[#allocation43_spill] sm:$0xff]  ;;  %v5574_v16 = vld [vmem:[#allocation56_spill] sm:$0xff] }
 0x310   : > { %v3416_v5 = vpop.eup %3415  ;;  %3429 = vrcp.f32 %v1660_v27  ;;  %2088 = vmatmul.mubr.f32.gmra.mrb[76].mxu1 %v1913_v2  ;;  %v1873_v44 = vmul.f32 %v3414_v12, %v4820_v61  ;;  %v2776_v42 = vmul.f32 -1.442695, %v5565_v10  ;;  %v5566_v27 = vld [vmem:[#allocation45_spill] sm:$0xff] }
 0x311   : > { %v1826_v1 = vadd.f32 1.0, %v3416_v5  ;;  %3431 = vpow2.f32 %v2761_v60  ;;  %2093 = vmatprep.mubr.f32.mxu1 %v5549_v19  ;;  %v1915_v38 = vadd.f32 %v1899_v59, %v1883_v29  ;;  %v2778_v55 = vmul.f32 -1.442695, %v5566_v27  ;;  %v3572_v27 = vld [vmem:[%s4245_s2] sm:$0xff] }
 0x312   : > { %v3418_v35 = vpop.eup %3417 }
 0x313   : > { %v3420_v48 = vpop.eup %3419  ;;  %3433 = vrcp.f32 %v1826_v1  ;;  %v1889_v43 = vmul.f32 %v3418_v35, %v4825_v8  ;;  %v5567_v1 = vld [vmem:[#allocation46_spill] sm:$0xff] }
 0x314   : > { %v3422_v18 = vpop.eup %3421  ;;  %v1671_v36 = vadd.f32 1.0, %v3420_v48  ;;  %2094 = vmatmul.mubr.f32.gmra.mrb[78].mxu1 %v1914_v37 }
 0x315   : > { %v1837_v22 = vadd.f32 1.0, %v3422_v18  ;;  %2099 = vmatprep.mubr.f32.mxu1 %v5549_v19  ;;  %v1905_v0 = vadd.f32 %v1889_v43, %v1873_v44  ;;  %v2780_v44 = vmul.f32 -1.442695, %v5567_v1  ;;  %v3573_v1 = vld [vmem:[%s4237_s26 + $0x8] sm:$0xff] }
 0x316   : > { %v3424_v3 = vpop.eup %3423  ;;  %3435 = vrcp.f32 %v1671_v36  ;;  %v2765_v36 = vmul.f32 -1.442695, %v4775_v24  ;;  %v2773_v24 = vmul.f32 -1.442695, %v4850_v20  ;;  %v5572_v20 = vld [vmem:[#allocation51_spill] sm:$0xff] }
 0x317   : > { %3437 = vrcp.f32 %v1837_v22  ;;  %2040 = vmatmul.mubr.f32.gmra.mrb[68].mxu0 %v1905_v0  ;;  %v1884_v61 = vmul.f32 %v3424_v3, %v4844_v26  ;;  %v2771_v22 = vmul.f32 -1.442695, %v4834_v62  ;;  %v5570_v62 = vld [vmem:[#allocation49_spill] sm:$0xff] }
 0x318   : > { %v3426_v21 = vpop.eup %3425  ;;  %2100 = vmatmul.mubr.f32.gmra.mrb[80].mxu1 %v1915_v38  ;;  %2045 = vmatprep.mubr.f32.mxu0 %v5549_v19 }
 0x319   : > { %v3428_v54 = vpop.eup %3427  ;;  %v1672_v8 = vadd.f32 1.0, %v3426_v21  ;;  %2105 = vmatprep.mubr.f32.mxu1 %v5549_v19 }
 0x31a   : > { %v3430_v52 = vpop.eup %3429  ;;  %v1900_v57 = vmul.f32 %v3428_v54, %v4853_v17  ;;  %v5568_v54 = vld [vmem:[#allocation47_spill] sm:$0xff] }
 0x31b   : > { %v3432_v13 = vpop.eup %3431  ;;  %3439 = vrcp.f32 %v1672_v8  ;;  %v1874_v49 = vmul.f32 %v3430_v52, %v4857_v11  ;;  %v2782_v8 = vmul.f32 -1.442695, %v5568_v54 }
 0x31c   : > { %v1838_v33 = vadd.f32 1.0, %v3432_v13  ;;  %v1916_v15 = vadd.f32 %v1900_v57, %v1884_v61 }
 0x31d   : > { %v3434_v40 = vpop.eup %3433 }
 0x31e   : > { %3441 = vrcp.f32 %v1838_v33  ;;  %v1890_v47 = vmul.f32 %v3434_v40, %v4865_v14  ;;  %2106 = vmatmul.mubr.f32.gmra.mrb[82].mxu1 %v1916_v15  ;;  %v5569_v33 = vld [vmem:[#allocation48_spill] sm:$0xff]  ;;  %v2784_v40 = vmul.f32 -1.442695, %v5570_v62 }
 0x31f   : > { %2111 = vmatprep.mubr.f32.mxu1 %v5549_v19  ;;  %3443 = vpow2.f32 %v2762_v53 }
 0x320   : > { %v3436_v26 = vpop.eup %3435  ;;  %v1906_v31 = vadd.f32 %v1890_v47, %v1874_v49  ;;  %3445 = vpow2.f32 %v2764_v39  ;;  %v2767_v49 = vmul.f32 -1.442695, %v5569_v33  ;;  %v2777_v39 = vmul.f32 -1.442695, %v5574_v16 }
 0x321   : > { %v3438_v46 = vpop.eup %3437  ;;  %v1885_v9 = vmul.f32 %v3436_v26, %v4696_v51  ;;  %v5560_v51 = vld [vmem:[#allocation31_spill] sm:$0xff] }
 0x322   : > { %2046 = vmatmul.mubr.f32.gmra.mrb[70].mxu0 %v1906_v31  ;;  %v1901_v17 = vmul.f32 %v3438_v46, %v4860_v4  ;;  %v2766_v63 = vmul.f32 -1.442695, %v5560_v51  ;;  %v5561_v4 = vld [vmem:[#allocation33_spill] sm:$0xff]  ;;  %v5571_v46 = vld [vmem:[#allocation50_spill] sm:$0xff] }
 0x323   : > { %v2768_v2 = vmul.f32 -1.442695, %v5561_v4  ;;  %v1951_v4 = vld [vmem:[%s5448_s9] sm:$0x3] }
 0x324   : > { %v1917_v32 = vadd.f32 %v1901_v17, %v1885_v9  ;;  %3447 = vpow2.f32 %v2766_v63  ;;  %v2769_v9 = vmul.f32 -1.442695, %v5571_v46 }
 0x325   : > { %v3440_v34 = vpop.eup %3439  ;;  %3449 = vpow2.f32 %v2768_v2 }
 0x326   : > { %2112 = vmatmul.mubr.f32.gmra.mrb[84].mxu1 %v1917_v32  ;;  %v1886_v11 = vmul.f32 %v3440_v34, %v4717_v30  ;;  %3451 = vpow2.f32 %v2763_v28  ;;  %v2786_v32 = vmul.f32 -1.442695, %v5572_v20 }
 0x327   : > { %2117 = vmatprep.mubr.f32.mxu1 %v5549_v19  ;;  %v5562_v19 = vld [vmem:[#allocation36_spill] sm:$0xff] }
 0x328   : > { %v3442_v45 = vpop.eup %3441  ;;  %v2770_v30 = vmul.f32 -1.442695, %v5562_v19 }
 0x329   : > { %v1902_v14 = vmul.f32 %v3442_v45, %v4881_v6  ;;  %v2772_v6 = vmul.f32 -1.442695, %v5563_v58  ;;  %v3444_v23 = vpop.eup %3443 }
 0x32a   : > { %3453 = vpow2.f32 %v2770_v30  ;;  %v3446_v60 = vpop.eup %3445  ;;  %v2220_v12 = vadd.f32 1.0, %v3444_v23 }
 0x32b   : > { %v1918_v56 = vadd.f32 %v1902_v14, %v1886_v11  ;;  %3455 = vpow2.f32 %v2772_v6  ;;  %v2222_v37 = vadd.f32 1.0, %v3446_v60  ;;  %v5573_v11 = vld [vmem:[#allocation54_spill] sm:$0xff]  ;;  %v5575_v6 = vld [vmem:[#allocation52_spill] sm:$0xff]  ;;  %v5576_v60 = vld [vmem:[#allocation27_spill] sm:$0xff] }
 0x32c   : > { %3457 = vpow2.f32 %v2774_v25  ;;  %v2775_v45 = vmul.f32 -1.442695, %v5573_v11  ;;  %v2788_v41 = vmul.f32 -1.442695, %v5575_v6  ;;  %v3571_v25 = vld [vmem:[%s4237_s26] sm:$0xff]  ;;  %v5582_v11 = vld [vmem:[#allocation59_spill] sm:$0xff] }
 0x32d   : > { %2118 = vmatmul.mubr.f32.gmra.mrb[86].mxu1 %v1918_v56  ;;  %3459 = vpow2.f32 %v2776_v42 }
 0x32e   : > { %v3448_v50 = vpop.eup %3447  ;;  %3461 = vpow2.f32 %v2778_v55 }
 0x32f   : > { %v3450_v5 = vpop.eup %3449  ;;  %v2224_v59 = vadd.f32 1.0, %v3448_v50  ;;  %3463 = vrcp.f32 %v2220_v12  ;;  %v5160_v50 = vrot.slane %v1951_v4, %v5576_v60 }
 0x330   : > { %v3452_v29 = vpop.eup %3451  ;;  %v2226_v48 = vadd.f32 1.0, %v3450_v5  ;;  %3465 = vrcp.f32 %v2222_v37  ;;  %v5577_v5 = vld [vmem:[#allocation57_spill] sm:$0xff] }
 0x331   : > { %v2221_v43 = vadd.f32 1.0, %v3452_v29  ;;  %3467 = vrcp.f32 %v2224_v59  ;;  %v2779_v37 = vmul.f32 -1.442695, %v5577_v5  ;;  %v5578_v29 = vld [vmem:[#allocation26_spill] sm:$0xff] }
 0x332   : > { %3469 = vpow2.f32 %v2780_v44  ;;  %v5167_v59 = vrot.slane %v1951_v4, %v5578_v29 }
 0x333   : > { %3471 = vrcp.f32 %v2226_v48 }
 0x334   : > { %v3454_v35 = vpop.eup %3453  ;;  %3473 = vrcp.f32 %v2221_v43 }
 0x335   : > { %v3456_v18 = vpop.eup %3455  ;;  %v2228_v3 = vadd.f32 1.0, %v3454_v35  ;;  %3475 = vpow2.f32 %v2765_v36  ;;  %v3574_v35 = vld [vmem:[%s4245_s2 + $0x8] sm:$0xff] }
 0x336   : > { %v3458_v38 = vpop.eup %3457  ;;  %v2230_v21 = vadd.f32 1.0, %v3456_v18  ;;  %v5579_v18 = vld [vmem:[#allocation53_spill] sm:$0xff] }
 0x337   : > { %v3460_v0 = vpop.eup %3459  ;;  %v2232_v61 = vadd.f32 1.0, %v3458_v38  ;;  %3477 = vrcp.f32 %v2228_v3  ;;  %v2790_v36 = vmul.f32 -1.442695, %v5579_v18  ;;  %v5580_v3 = vld [vmem:[#allocation55_spill] sm:$0xff]  ;;  %v3577_v18 = vld [vmem:[%s4237_s26 + $0x50] sm:$0xff] }
 0x338   : > { %v2234_v52 = vadd.f32 1.0, %v3460_v0  ;;  %3479 = vpow2.f32 %v2771_v22  ;;  %v3462_v57 = vpop.eup %3461  ;;  %v2792_v22 = vmul.f32 -1.442695, %v5580_v3  ;;  %v3578_v3 = vld [vmem:[%s4245_s2 + $0x50] sm:$0xff] }
 0x339   : > { %3481 = vrcp.f32 %v2230_v21  ;;  %v3464_v13 = vpop.eup %3463  ;;  %v2236_v26 = vadd.f32 1.0, %v3462_v57 }
 0x33a   : > { %3483 = vrcp.f32 %v2232_v61  ;;  %v5137_v15 = vpop.eup %3465  ;;  %v2316_v7 = vadd.f32 1.0, %v3464_v13  ;;  %v2380_v51 = vsub.f32 2.0, %v3464_v13 }
 0x33b   : > { %3485 = vpow2.f32 %v2782_v8  ;;  %v5140_v47 = vpop.eup %3467 }
 0x33c   : > { %3487 = vrcp.f32 %v2234_v52  ;;  %v3470_v31 = vpop.eup %3469  ;;  %v2348_v10 = vmul.f32 %v3571_v25, %v2316_v7  ;;  %v2412_v55 = vmul.f32 %v3572_v27, %v2380_v51 }
 0x33d   : > { %3489 = vpow2.f32 %v2773_v24  ;;  %v5143_v17 = vpop.eup %3471  ;;  %v2238_v56 = vadd.f32 1.0, %v3470_v31  ;;  %v5581_v31 = vld [vmem:[#allocation58_spill] sm:$0xff] }
 0x33e   : > { %3491 = vpow2.f32 %v2767_v49  ;;  %v3474_v34 = vpop.eup %3473  ;;  %v2444_v8 = vadd.f32 %v2412_v55, %v2348_v10  ;;  %v2781_v46 = vmul.f32 -1.442695, %v5581_v31 }
 0x33f   : > { %3493 = vpow2.f32 %v2784_v40  ;;  %v3476_v14 = vpop.eup %3475  ;;  %v2317_v2 = vadd.f32 1.0, %v3474_v34  ;;  %v2381_v28 = vsub.f32 2.0, %v3474_v34 }
 0x340   : > { %3495 = vrcp.f32 %v2236_v26  ;;  %v2223_v30 = vadd.f32 1.0, %v3476_v14 }
 0x341   : > { %v5147_v53 = vpop.eup %3477  ;;  %3497 = vpow2.f32 %v2769_v9  ;;  %v2349_v44 = vmul.f32 %v3573_v1, %v2317_v2  ;;  %v2413_v48 = vmul.f32 %v3574_v35, %v2381_v28 }
 0x342   : > { %v3480_v63 = vpop.eup %3479  ;;  %3499 = vpow2.f32 %v2786_v32  ;;  %v2324_v2 = vadd.f32 1.0, %v5147_v53 }
 0x343   : > { %v5153_v19 = vpop.eup %3481  ;;  %3501 = vpow2.f32 %v2775_v45  ;;  %v2229_v23 = vadd.f32 1.0, %v3480_v63  ;;  %v2445_v33 = vadd.f32 %v2413_v48, %v2349_v44  ;;  %v2783_v45 = vmul.f32 -1.442695, %v5582_v11  ;;  %v3576_v48 = vld [vmem:[%s4245_s2 + $0x40] sm:$0xff] }
 0x344   : > { %v5155_v58 = vpop.eup %3483  ;;  %3503 = vrcp.f32 %v2238_v56  ;;  %v2326_v25 = vadd.f32 1.0, %v5153_v19 }
 0x345   : > { %v3486_v42 = vpop.eup %3485  ;;  %3505 = vpow2.f32 %v2777_v39  ;;  %v2392_v60 = vsub.f32 2.0, %v5155_v58 }
 0x346   : > { %v5163_v12 = vpop.eup %3487  ;;  %3507 = vrcp.f32 %v2223_v30  ;;  %v2240_v61 = vadd.f32 1.0, %v3486_v42  ;;  %v5583_v30 = vld [vmem:[#allocation60_spill] sm:$0xff]  ;;  %v2390_v42 = vsub.f32 2.0, %v5153_v19 }
 0x347   : > { %v3490_v43 = vpop.eup %3489  ;;  %3509 = vpow2.f32 %v2788_v41  ;;  %v2785_v6 = vmul.f32 -1.442695, %v5583_v30  ;;  %v2388_v41 = vsub.f32 2.0, %v5147_v53  ;;  %v3575_v53 = vld [vmem:[%s4237_s26 + $0x40] sm:$0xff] }
 0x348   : > { %v3492_v38 = vpop.eup %3491  ;;  %3511 = vrcp.f32 %v2229_v23  ;;  %v2231_v24 = vadd.f32 1.0, %v3490_v43  ;;  %v2328_v23 = vadd.f32 1.0, %v5155_v58  ;;  %v2356_v29 = vmul.f32 %v3575_v53, %v2324_v2 }
 0x349   : > { %v3494_v21 = vpop.eup %3493  ;;  %3513 = vpow2.f32 %v2779_v37  ;;  %v2225_v62 = vadd.f32 1.0, %v3492_v38  ;;  %v2420_v43 = vmul.f32 %v3576_v48, %v2388_v41  ;;  %v2358_v58 = vmul.f32 %v3577_v18, %v2326_v25  ;;  %v3585_v41 = vld [vmem:[%s4237_s26 + $0x58] sm:$0xff] }
 0x34a   : > { %v5174_v57 = vpop.eup %3495  ;;  %3515 = vpow2.f32 %v2790_v36  ;;  %v2242_v32 = vadd.f32 1.0, %v3494_v21 }
 0x34b   : > { %v3498_v49 = vpop.eup %3497  ;;  %3517 = vpow2.f32 %v2792_v22  ;;  %v2422_v22 = vmul.f32 %v3578_v3, %v2390_v42 }
 0x34c   : > { %v3500_v26 = vpop.eup %3499  ;;  %3519 = vrcp.f32 %v2240_v61  ;;  %v2227_v56 = vadd.f32 1.0, %v3498_v49  ;;  %v3580_v61 = vld [vmem:[%s4245_s2 + $0x60] sm:$0xff] }
 0x34d   : > { %v3502_v20 = vpop.eup %3501  ;;  %3521 = vrcp.f32 %v2231_v24  ;;  %v2244_v39 = vadd.f32 1.0, %v3500_v26  ;;  %v3582_v26 = vld [vmem:[%s4245_s2 + $0x48] sm:$0xff] }
 0x34e   : > { %v5182_v34 = vpop.eup %3503  ;;  %3523 = vrcp.f32 %v2225_v62  ;;  %v2233_v7 = vadd.f32 1.0, %v3502_v20  ;;  %v3581_v62 = vld [vmem:[%s4237_s26 + $0x48] sm:$0xff]  ;;  %v2452_v20 = vadd.f32 %v2420_v43, %v2356_v29  ;;  %v3587_v43 = vld [vmem:[%s4237_s26 + $0x80] sm:$0xff] }
 0x34f   : > { %v3506_v14 = vpop.eup %3505  ;;  %3525 = vpow2.f32 %v2781_v46  ;;  %v2334_v29 = vadd.f32 1.0, %v5182_v34 }
 0x350   : > { %v5186_v16 = vpop.eup %3507  ;;  %3527 = vrcp.f32 %v2242_v32  ;;  %v2235_v63 = vadd.f32 1.0, %v3506_v14 }
 0x351   : > { %v3510_v51 = vpop.eup %3509  ;;  %3529 = vpow2.f32 %v2783_v45 }
 0x352   : > { %v3512_v4 = vpop.eup %3511  ;;  %3531 = vrcp.f32 %v2227_v56  ;;  %v2246_v55 = vadd.f32 1.0, %v3510_v51  ;;  %v3584_v51 = vld [vmem:[%s4245_s2 + $0x70] sm:$0xff] }
 0x353   : > { %v3514_v28 = vpop.eup %3513  ;;  %3533 = vrcp.f32 %v2233_v7  ;;  %v2325_v1 = vadd.f32 1.0, %v3512_v4  ;;  %v2389_v44 = vsub.f32 2.0, %v3512_v4  ;;  %v3583_v7 = vld [vmem:[%s4237_s26 + $0x70] sm:$0xff]  ;;  %v2332_v4 = vadd.f32 1.0, %v5174_v57 }
 0x354   : > { %v3516_v10 = vpop.eup %3515  ;;  %3535 = vrcp.f32 %v2244_v39  ;;  %v2237_v37 = vadd.f32 1.0, %v3514_v28 }
 0x355   : > { %v3518_v27 = vpop.eup %3517  ;;  %3537 = vrcp.f32 %v2235_v63  ;;  %v2248_v19 = vadd.f32 1.0, %v3516_v10  ;;  %v2421_v31 = vmul.f32 %v3582_v26, %v2389_v44  ;;  %v2396_v10 = vsub.f32 2.0, %v5174_v57 }
 0x356   : > { %v5195_v5 = vpop.eup %3519  ;;  %3539 = vpow2.f32 %v2785_v6  ;;  %v2250_v38 = vadd.f32 1.0, %v3518_v27  ;;  %v2364_v18 = vmul.f32 %v3587_v43, %v2332_v4 }
 0x357   : > { %v3522_v35 = vpop.eup %3521  ;;  %3541 = vrcp.f32 %v2246_v55 }
 0x358   : > { %v5200_v36 = vpop.eup %3523  ;;  %3543 = vrcp.f32 %v2237_v37  ;;  %v2327_v46 = vadd.f32 1.0, %v3522_v35  ;;  %v2391_v32 = vsub.f32 2.0, %v3522_v35  ;;  %v3586_v37 = vld [vmem:[%s4245_s2 + $0x58] sm:$0xff] }
 0x359   : > { %3545 = vrcp.f32 %v2248_v19 }
 0x35a   : > { %3547 = vrcp.f32 %v2250_v38  ;;  %v2359_v25 = vmul.f32 %v3585_v41, %v2327_v46  ;;  %v2423_v53 = vmul.f32 %v3586_v37, %v2391_v32 }
 0x3b1   : > { %v2029_v0 = vpop.f32.mrb[64].mxu0 }
 0x3b2   : > { %v2030_v54 = vadd.f32 %v2029_v0, %v5160_v50  ;;  %v2031_v52 = vpop.f32.mrb[65].mxu0  ;;  %v3579_v0 = vld [vmem:[%s4237_s26 + $0x60] sm:$0xff] }
 0x3b3   : > { %v2032_v13 = vadd.f32 %v2031_v52, %v5167_v59  ;;  %v2360_v21 = vmul.f32 %v3579_v0, %v2328_v23  ;;  %v5584_v52 = vld [vmem:[#allocation61_spill] sm:$0xff]  ;;  %v5585_v23 = vld [vmem:[#allocation62_spill] sm:$0xff] }
 0x3b4   : > { %v2476_v40 = vadd.f32 %v2444_v8, %v2030_v54  ;;  %v2424_v54 = vmul.f32 %v3580_v61, %v2392_v60  ;;  %v3526_v8 = vpop.eup %3525  ;;  %v2787_v24 = vmul.f32 -1.442695, %v5584_v52  ;;  %v2789_v60 = vmul.f32 -1.442695, %v5585_v23  ;;  %v3589_v52 = vld [vmem:[%s4237_s26 + $0x90] sm:$0xff] }
 0x3b5   : > { %v2477_v9 = vadd.f32 %v2445_v33, %v2032_v13  ;;  %v2330_v13 = vadd.f32 1.0, %v5163_v12  ;;  %v2394_v33 = vsub.f32 2.0, %v5163_v12  ;;  %v5208_v49 = vpop.eup %3527  ;;  %v2239_v45 = vadd.f32 1.0, %v3526_v8 }
 0x3b6   : > { %2508 = vst [vmem:[%s5179_s0] sm:$0xff] %v2476_v40  ;;  %v2357_v40 = vmul.f32 %v3581_v62, %v2325_v1  ;;  %v2454_v12 = vadd.f32 %v2422_v22, %v2358_v58  ;;  %v5214_v14 = vadd.f32 %v2424_v54, %v2360_v21  ;;  %3549 = vpow2.f32 %v2787_v24  ;;  %v3588_v54 = vld [vmem:[%s4245_s2 + $0x80] sm:$0xff] }
 0x3b7   : > { %2509 = vst [vmem:[%s5179_s0 + $0x8] sm:$0xff] %v2477_v9  ;;  %v3530_v9 = vpop.eup %3529  ;;  %v2362_v39 = vmul.f32 %v3583_v7, %v2330_v13  ;;  %v2426_v63 = vmul.f32 %v3584_v51, %v2394_v33  ;;  %3551 = vrcp.f32 %v2239_v45  ;;  %v2398_v58 = vsub.f32 2.0, %v5182_v34 }
 0x3b8   : > { %v5212_v11 = vpop.eup %3531  ;;  %v2241_v28 = vadd.f32 1.0, %v3530_v9  ;;  %v2453_v6 = vadd.f32 %v2421_v31, %v2357_v40  ;;  %v2455_v61 = vadd.f32 %v2423_v53, %v2359_v25  ;;  %v2428_v8 = vmul.f32 %v3588_v54, %v2396_v10  ;;  %v3590_v40 = vld [vmem:[%s4237_s26 + $0x68] sm:$0xff]  ;;  %v3599_v54 = vld [vmem:[%s4245_s2 + $0x10] sm:$0xff] }
 0x3b9   : > { %v3534_v56 = vpop.eup %3533  ;;  %v5228_v57 = vadd.f32 %v2426_v63, %v2362_v39  ;;  %v2366_v24 = vmul.f32 %v3589_v52, %v2334_v29  ;;  %v3591_v31 = vld [vmem:[%s4245_s2 + $0x68] sm:$0xff]  ;;  %v2400_v7 = vsub.f32 2.0, %v5195_v5  ;;  %v3592_v63 = vld [vmem:[%s4237_s26 + $0x78] sm:$0xff]  ;;  %v2318_v23 = vadd.f32 1.0, %v5137_v15  ;;  %v3595_v29 = vld [vmem:[%s4237_s26 + $0xa0] sm:$0xff] }
 0x3ba   : > { %v5219_v2 = vpop.eup %3535  ;;  %v2329_v44 = vadd.f32 1.0, %v3534_v56  ;;  %v2393_v35 = vsub.f32 2.0, %v3534_v56  ;;  %3553 = vrcp.f32 %v2241_v28  ;;  %v2336_v56 = vadd.f32 1.0, %v5195_v5  ;;  %v3593_v28 = vld [vmem:[%s4245_s2 + $0x78] sm:$0xff] }
 0x3bb   : > { %v3538_v42 = vpop.eup %3537  ;;  %3555 = vpow2.f32 %v2789_v60  ;;  %v2382_v5 = vsub.f32 2.0, %v5137_v15  ;;  %v5587_v60 = vld [vmem:[#allocation64_spill] sm:$0xff] }
 0x3bc   : > { %v3540_v19 = vpop.eup %3539  ;;  %v2331_v3 = vadd.f32 1.0, %v3538_v42  ;;  %v2395_v22 = vsub.f32 2.0, %v3538_v42  ;;  %v2361_v26 = vmul.f32 %v3590_v40, %v2329_v44  ;;  %v2425_v46 = vmul.f32 %v3591_v31, %v2393_v35  ;;  %v3596_v44 = vld [vmem:[%s4245_s2 + $0xa0] sm:$0xff] }
 0x3bd   : > { %v5232_v0 = vpop.eup %3541  ;;  %v2243_v34 = vadd.f32 1.0, %v3540_v19  ;;  %v2432_v35 = vmul.f32 %v3596_v44, %v2400_v7  ;;  %v2320_v44 = vadd.f32 1.0, %v5140_v47 }
 0x3be   : > { %v3544_v13 = vpop.eup %3543  ;;  %v2363_v4 = vmul.f32 %v3592_v63, %v2331_v3  ;;  %v2457_v53 = vadd.f32 %v2425_v46, %v2361_v26  ;;  %v3597_v3 = vld [vmem:[%s4237_s26 + $0x88] sm:$0xff] }
 0x3bf   : > { %v5241_v9 = vpop.eup %3545  ;;  %v2333_v42 = vadd.f32 1.0, %v3544_v13  ;;  %3557 = vrcp.f32 %v2243_v34  ;;  %v3600_v34 = vld [vmem:[%s4245_s2 + $0x88] sm:$0xff] }
 0x3c0   : > { %v5247_v39 = vpop.eup %3547 }
 0x3c1   : > { %v3550_v25 = vpop.eup %3549 }
 0x3c2   : > { %v3552_v19 = vpop.eup %3551  ;;  %v2245_v15 = vadd.f32 1.0, %v3550_v25 }
 0x3c3   : > { %v2335_v31 = vadd.f32 1.0, %v3552_v19  ;;  %v2399_v46 = vsub.f32 2.0, %v3552_v19 }
 0x3c4   : > { %v3554_v52 = vpop.eup %3553 }
 0x3c5   : > { %v2401_v63 = vsub.f32 2.0, %v3554_v52 }
 0x3c9   : > { %v2053_v30 = vpop.f32.mrb[64].mxu1 }
 0x3ca   : > { %v2054_v27 = vadd.f32 %v2053_v30, %v5160_v50  ;;  %v2055_v55 = vpop.f32.mrb[65].mxu1  ;;  %v2427_v30 = vmul.f32 %v3593_v28, %v2395_v22  ;;  %v2365_v22 = vmul.f32 %v3597_v3, %v2333_v42 }
 0x3cb   : > { %v2056_v1 = vadd.f32 %v2055_v55, %v5167_v59  ;;  %v2397_v55 = vsub.f32 2.0, %v3544_v13 }
 0x3cc   : > { %v2484_v48 = vadd.f32 %v2452_v20, %v2054_v27  ;;  %v5586_v20 = vld [vmem:[#allocation63_spill] sm:$0xff]  ;;  %v2793_v27 = vmul.f32 -1.442695, %v5587_v60  ;;  %v3603_v60 = vld [vmem:[%s4237_s26 + $0xb0] sm:$0xff] }
 0x3cd   : > { %v2485_v38 = vadd.f32 %v2453_v6, %v2056_v1  ;;  %v2791_v32 = vmul.f32 -1.442695, %v5586_v20  ;;  %v3594_v6 = vld [vmem:[%s4245_s2 + $0x90] sm:$0xff]  ;;  %v2368_v1 = vmul.f32 %v3595_v29, %v2336_v56  ;;  %v2319_v56 = vadd.f32 1.0, %v5186_v16  ;;  %v3605_v29 = vld [vmem:[%s4237_s26 + $0x18] sm:$0xff] }
 0x3ce   : > { %2516 = vst [vmem:[%s5179_s0 + $0x40] sm:$0xff] %v2484_v48  ;;  %v2059_v21 = vpop.f32.mrb[66].mxu1  ;;  %v2430_v41 = vmul.f32 %v3594_v6, %v2398_v58 }
 0x3cf   : > { %2517 = vst [vmem:[%s5179_s0 + $0x48] sm:$0xff] %v2485_v38  ;;  %v2060_v33 = vadd.f32 %v2059_v21, %v5160_v50  ;;  %v2061_v62 = vpop.f32.mrb[67].mxu1  ;;  %3559 = vpow2.f32 %v2791_v32  ;;  %v3598_v21 = vld [vmem:[%s4237_s26 + $0x10] sm:$0xff]  ;;  %v5271_v20 = vadd.f32 %v2432_v35, %v2368_v1  ;;  %v2351_v1 = vmul.f32 %v3605_v29, %v2319_v56 }
 0x3d0   : > { %v2062_v45 = vadd.f32 %v2061_v62, %v5167_v59  ;;  %v5262_v58 = vadd.f32 %v2430_v41, %v2366_v24  ;;  %3561 = vpow2.f32 %v2793_v27  ;;  %v2338_v62 = vadd.f32 1.0, %v5208_v49  ;;  %v3556_v24 = vpop.eup %3555 }
 0x3d1   : > { %v2486_v51 = vadd.f32 %v2454_v12, %v2060_v33  ;;  %v5256_v12 = vadd.f32 %v2428_v8, %v2364_v18  ;;  %v2459_v18 = vadd.f32 %v2427_v30, %v2363_v4  ;;  %v2414_v8 = vmul.f32 %v3599_v54, %v2382_v5 }
 0x3d2   : > { %v2487_v10 = vadd.f32 %v2455_v61, %v2062_v45  ;;  %v2350_v61 = vmul.f32 %v3598_v21, %v2318_v23  ;;  %v2429_v33 = vmul.f32 %v3600_v34, %v2397_v55  ;;  %3563 = vrcp.f32 %v2245_v15  ;;  %v3602_v23 = vld [vmem:[%s4245_s2 + $0x98] sm:$0xff]  ;;  %v3606_v15 = vld [vmem:[%s4237_s26 + $0xa8] sm:$0xff] }
 0x3d3   : > { %2518 = vst [vmem:[%s5179_s0 + $0x50] sm:$0xff] %v2486_v51  ;;  %v2065_v37 = vpop.f32.mrb[68].mxu1  ;;  %v2337_v51 = vadd.f32 1.0, %v3554_v52  ;;  %v2383_v4 = vsub.f32 2.0, %v5186_v16  ;;  %v2247_v28 = vadd.f32 1.0, %v3556_v24  ;;  %v2431_v5 = vmul.f32 %v3602_v23, %v2399_v46  ;;  %v3558_v16 = vpop.eup %3557  ;;  %v3613_v23 = vld [vmem:[%s4245_s2 + $0xc0] sm:$0xff] }
 0x3d4   : > { %2519 = vst [vmem:[%s5179_s0 + $0x58] sm:$0xff] %v2487_v10  ;;  %v2066_v48 = vadd.f32 %v2065_v37, %v5160_v50  ;;  %v2067_v43 = vpop.f32.mrb[69].mxu1  ;;  %v2461_v6 = vadd.f32 %v2429_v33, %v2365_v22  ;;  %v5281_v41 = vadd.f32 %v2414_v8, %v2350_v61  ;;  %v3601_v10 = vld [vmem:[%s4237_s26 + $0x98] sm:$0xff]  ;;  %v5286_v27 = vmul.f32 %v3603_v60, %v2338_v62  ;;  %v3604_v37 = vld [vmem:[%s4245_s2 + $0xb0] sm:$0xff] }
 0x3d5   : > { %v2068_v38 = vadd.f32 %v2067_v43, %v5167_v59  ;;  %v2367_v42 = vmul.f32 %v3601_v10, %v2335_v31  ;;  %v3607_v43 = vld [vmem:[%s4245_s2 + $0xa8] sm:$0xff]  ;;  %3565 = vrcp.f32 %v2247_v28  ;;  %v2384_v21 = vsub.f32 2.0, %v5140_v47  ;;  %v3611_v28 = vld [vmem:[%s4237_s26 + $0xc0] sm:$0xff]  ;;  %v3612_v10 = vld [vmem:[%s4237_s26 + $0xb8] sm:$0xff] }
 0x3d6   : > { %v2488_v13 = vadd.f32 %v5214_v14, %v2066_v48  ;;  %v2402_v14 = vsub.f32 2.0, %v5208_v49  ;;  %v2369_v48 = vmul.f32 %v3606_v15, %v2337_v51  ;;  %v2340_v61 = vadd.f32 1.0, %v5219_v2 }
 0x3d7   : > { %v2489_v40 = vadd.f32 %v2457_v53, %v2068_v38  ;;  %v2071_v26 = vpop.f32.mrb[70].mxu1  ;;  %v3608_v38 = vld [vmem:[%s4245_s2 + $0x18] sm:$0xff]  ;;  %v2463_v52 = vadd.f32 %v2431_v5, %v2367_v42  ;;  %v2404_v34 = vsub.f32 2.0, %v5219_v2  ;;  %v2321_v2 = vadd.f32 1.0, %v5200_v36 }
 0x3d8   : > { %2520 = vst [vmem:[%s5179_s0 + $0x60] sm:$0xff] %v2488_v13  ;;  %v2072_v32 = vadd.f32 %v2071_v26, %v5160_v50  ;;  %v2073_v45 = vpop.f32.mrb[71].mxu1  ;;  %v5291_v53 = vmul.f32 %v3604_v37, %v2402_v14  ;;  %v2415_v3 = vmul.f32 %v3608_v38, %v2383_v4  ;;  %v2339_v13 = vadd.f32 1.0, %v3558_v16  ;;  %v3609_v26 = vld [vmem:[%s4237_s26 + $0x20] sm:$0xff]  ;;  %v3615_v38 = vld [vmem:[%s4237_s26 + $0x28] sm:$0xff] }
 0x3d9   : > { %2521 = vst [vmem:[%s5179_s0 + $0x68] sm:$0xff] %v2489_v40  ;;  %v2074_v7 = vadd.f32 %v2073_v45, %v5167_v59  ;;  %v3560_v35 = vpop.eup %3559  ;;  %v2352_v31 = vmul.f32 %v3609_v26, %v2320_v44  ;;  %v2436_v5 = vmul.f32 %v3613_v23, %v2404_v34  ;;  %v2385_v37 = vsub.f32 2.0, %v5200_v36 }
 0x3da   : > { %v2490_v30 = vadd.f32 %v5228_v57, %v2072_v32  ;;  %v3562_v33 = vpop.eup %3561  ;;  %v2249_v62 = vadd.f32 1.0, %v3560_v35  ;;  %v2447_v45 = vadd.f32 %v2415_v3, %v2351_v1  ;;  %v2371_v42 = vmul.f32 %v3612_v10, %v2339_v13  ;;  %v3617_v13 = vld [vmem:[%s4237_s26 + $0xc8] sm:$0xff]  ;;  %v3620_v10 = vld [vmem:[%s4245_s2 + $0xd0] sm:$0xff] }
 0x3db   : > { %v2491_v49 = vadd.f32 %v2459_v18, %v2074_v7  ;;  %v2077_v25 = vpop.f32.mrb[72].mxu1  ;;  %v2433_v18 = vmul.f32 %v3607_v43, %v2401_v63  ;;  %v3610_v63 = vld [vmem:[%s4245_s2 + $0x20] sm:$0xff]  ;;  %v2353_v3 = vmul.f32 %v3615_v38, %v2321_v2  ;;  %v2406_v26 = vsub.f32 2.0, %v5232_v0 }
 0x3dc   : > { %2522 = vst [vmem:[%s5179_s0 + $0x70] sm:$0xff] %v2490_v30  ;;  %v2078_v57 = vadd.f32 %v2077_v25, %v5160_v50  ;;  %v2079_v55 = vpop.f32.mrb[73].mxu1  ;;  %v3564_v14 = vpop.eup %3563  ;;  %v2416_v4 = vmul.f32 %v3610_v63, %v2384_v21  ;;  %v2372_v30 = vmul.f32 %v3611_v28, %v2340_v61  ;;  %3567 = vrcp.f32 %v2249_v62 }
 0x3dd   : > { %2523 = vst [vmem:[%s5179_s0 + $0x78] sm:$0xff] %v2491_v49  ;;  %v2080_v19 = vadd.f32 %v2079_v55, %v5167_v59  ;;  %v2465_v46 = vadd.f32 %v2433_v18, %v2369_v48  ;;  %v2341_v44 = vadd.f32 1.0, %v3564_v14  ;;  %v2405_v35 = vsub.f32 2.0, %v3564_v14 }
 0x3de   : > { %v2492_v22 = vadd.f32 %v5256_v12, %v2078_v57  ;;  %v2403_v12 = vsub.f32 2.0, %v3558_v16  ;;  %v3614_v57 = vld [vmem:[%s4245_s2 + $0xb8] sm:$0xff]  ;;  %v2448_v43 = vadd.f32 %v2416_v4, %v2352_v31  ;;  %v2468_v18 = vadd.f32 %v2436_v5, %v2372_v30 }
 0x3df   : > { %v2493_v54 = vadd.f32 %v2461_v6, %v2080_v19  ;;  %v2083_v8 = vpop.f32.mrb[74].mxu1  ;;  %v2251_v19 = vadd.f32 1.0, %v3562_v33  ;;  %v2373_v34 = vmul.f32 %v3617_v13, %v2341_v44  ;;  %v3618_v33 = vld [vmem:[%s4245_s2 + $0xc8] sm:$0xff]  ;;  %v2387_v28 = vsub.f32 2.0, %v5212_v11  ;;  %v3621_v5 = vld [vmem:[%s4237_s26 + $0xd8] sm:$0xff]  ;;  %v3627_v13 = vld [vmem:[%s4237_s26 + $0xe0] sm:$0xff] }
 0x3e0   : > { %2524 = vst [vmem:[%s5179_s0 + $0x80] sm:$0xff] %v2492_v22  ;;  %v2084_v24 = vadd.f32 %v2083_v8, %v5160_v50  ;;  %v2085_v40 = vpop.f32.mrb[75].mxu1  ;;  %v2035_v32 = vpop.f32.mrb[66].mxu0  ;;  %v2435_v55 = vmul.f32 %v3614_v57, %v2403_v12  ;;  %v2322_v8 = vadd.f32 1.0, %v5143_v17  ;;  %v2437_v62 = vmul.f32 %v3618_v33, %v2405_v35  ;;  %v3625_v44 = vld [vmem:[%s4237_s26 + $0x38] sm:$0xff] }
 0x3e1   : > { %2525 = vst [vmem:[%s5179_s0 + $0x88] sm:$0xff] %v2493_v54  ;;  %v2086_v47 = vadd.f32 %v2085_v40, %v5167_v59  ;;  %v2036_v7 = vadd.f32 %v2035_v32, %v5160_v50  ;;  %v2037_v51 = vpop.f32.mrb[67].mxu0  ;;  %v3566_v22 = vpop.eup %3565  ;;  %3569 = vrcp.f32 %v2251_v19  ;;  %v2342_v12 = vadd.f32 1.0, %v5232_v0  ;;  %v3626_v19 = vld [vmem:[%s4245_s2 + $0x38] sm:$0xff] }
 0x3e2   : > { %v2494_v56 = vadd.f32 %v5262_v58, %v2084_v24  ;;  %v2038_v25 = vadd.f32 %v2037_v51, %v5167_v59  ;;  %v2343_v32 = vadd.f32 1.0, %v3566_v22  ;;  %v2323_v0 = vadd.f32 1.0, %v5212_v11  ;;  %v3623_v11 = vld [vmem:[%s4237_s26 + $0x30] sm:$0xff] }
 0x3e3   : > { %v2495_v6 = vadd.f32 %v2463_v52, %v2086_v47  ;;  %v2089_v49 = vpop.f32.mrb[76].mxu1  ;;  %v2478_v16 = vadd.f32 %v5281_v41, %v2036_v7  ;;  %v2466_v41 = vadd.f32 %v5291_v53, %v5286_v27  ;;  %v2386_v27 = vsub.f32 2.0, %v5143_v17 }
 0x3e4   : > { %2526 = vst [vmem:[%s5179_s0 + $0x90] sm:$0xff] %v2494_v56  ;;  %v2090_v58 = vadd.f32 %v2089_v49, %v5160_v50  ;;  %v2091_v60 = vpop.f32.mrb[77].mxu1  ;;  %v2479_v1 = vadd.f32 %v2447_v45, %v2038_v25  ;;  %v2467_v52 = vadd.f32 %v2435_v55, %v2371_v42  ;;  %v2407_v45 = vsub.f32 2.0, %v3566_v22  ;;  %v3619_v49 = vld [vmem:[%s4237_s26 + $0xd0] sm:$0xff] }
 0x3e5   : > { %2527 = vst [vmem:[%s5179_s0 + $0x98] sm:$0xff] %v2495_v6  ;;  %v2092_v29 = vadd.f32 %v2091_v60, %v5167_v59  ;;  %2510 = vst [vmem:[%s5179_s0 + $0x10] sm:$0xff] %v2478_v16  ;;  %v2469_v4 = vadd.f32 %v2437_v62, %v2373_v34  ;;  %v2374_v25 = vmul.f32 %v3619_v49, %v2342_v12  ;;  %v3622_v60 = vld [vmem:[%s4245_s2 + $0xd8] sm:$0xff]  ;;  %v3628_v34 = vld [vmem:[%s4245_s2 + $0xe0] sm:$0xff] }
 0x3e6   : > { %v2496_v15 = vadd.f32 %v5271_v20, %v2090_v58  ;;  %2511 = vst [vmem:[%s5179_s0 + $0x18] sm:$0xff] %v2479_v1  ;;  %v3616_v20 = vld [vmem:[%s4245_s2 + $0x28] sm:$0xff]  ;;  %v2438_v42 = vmul.f32 %v3620_v10, %v2406_v26  ;;  %v2375_v58 = vmul.f32 %v3621_v5, %v2343_v32  ;;  %v2439_v16 = vmul.f32 %v3622_v60, %v2407_v45  ;;  %v3568_v57 = vpop.eup %3567 }
 0x3e7   : > { %v2497_v48 = vadd.f32 %v2465_v46, %v2092_v29  ;;  %v2095_v36 = vpop.f32.mrb[78].mxu1  ;;  %v2417_v54 = vmul.f32 %v3616_v20, %v2385_v37  ;;  %v2354_v55 = vmul.f32 %v3623_v11, %v2322_v8  ;;  %v3624_v37 = vld [vmem:[%s4245_s2 + $0x30] sm:$0xff]  ;;  %v2355_v35 = vmul.f32 %v3625_v44, %v2323_v0  ;;  %v3630_v26 = vld [vmem:[%s4245_s2 + $0xe8] sm:$0xff] }
 0x3e8   : > { %2528 = vst [vmem:[%s5179_s0 + $0xa0] sm:$0xff] %v2496_v15  ;;  %v2096_v21 = vadd.f32 %v2095_v36, %v5160_v50  ;;  %v2097_v61 = vpop.f32.mrb[79].mxu1  ;;  %v2418_v29 = vmul.f32 %v3624_v37, %v2386_v27  ;;  %v2419_v15 = vmul.f32 %v3626_v19, %v2387_v28  ;;  %v2345_v22 = vadd.f32 1.0, %v3568_v57 }
 0x3e9   : > { %2529 = vst [vmem:[%s5179_s0 + $0xa8] sm:$0xff] %v2497_v48  ;;  %v2098_v53 = vadd.f32 %v2097_v61, %v5167_v59  ;;  %v2449_v56 = vadd.f32 %v2417_v54, %v2353_v3  ;;  %v2470_v48 = vadd.f32 %v2438_v42, %v2374_v25  ;;  %v2471_v3 = vadd.f32 %v2439_v16, %v2375_v58  ;;  %v3633_v25 = vld [vmem:[%s4237_s26 + $0xf8] sm:$0xff] }
 0x3ea   : > { %v2498_v24 = vadd.f32 %v2466_v41, %v2096_v21  ;;  %v2041_v40 = vpop.f32.mrb[68].mxu0  ;;  %v2409_v21 = vsub.f32 2.0, %v3568_v57  ;;  %v2346_v32 = vadd.f32 1.0, %v5247_v39  ;;  %v2410_v45 = vsub.f32 2.0, %v5247_v39  ;;  %v3631_v39 = vld [vmem:[%s4237_s26 + $0xf0] sm:$0xff]  ;;  %v3634_v42 = vld [vmem:[%s4245_s2 + $0xf8] sm:$0xff] }
 0x3eb   : > { %v2499_v31 = vadd.f32 %v2467_v52, %v2098_v53  ;;  %v2042_v17 = vadd.f32 %v2041_v40, %v5160_v50  ;;  %v2101_v47 = vpop.f32.mrb[80].mxu1  ;;  %v2043_v46 = vpop.f32.mrb[69].mxu0  ;;  %v2450_v53 = vadd.f32 %v2418_v29, %v2354_v55  ;;  %v3629_v40 = vld [vmem:[%s4237_s26 + $0xe8] sm:$0xff] }
 0x3ec   : > { %2530 = vst [vmem:[%s5179_s0 + $0xb0] sm:$0xff] %v2498_v24  ;;  %v2102_v2 = vadd.f32 %v2101_v47, %v5160_v50  ;;  %v2044_v14 = vadd.f32 %v2043_v46, %v5167_v59  ;;  %v2103_v7 = vpop.f32.mrb[81].mxu1  ;;  %v3570_v61 = vpop.eup %3569  ;;  %v2451_v24 = vadd.f32 %v2419_v15, %v2355_v35  ;;  %v2377_v12 = vmul.f32 %v3629_v40, %v2345_v22 }
 0x3ed   : > { %2531 = vst [vmem:[%s5179_s0 + $0xb8] sm:$0xff] %v2499_v31  ;;  %v2480_v51 = vadd.f32 %v2448_v43, %v2042_v17  ;;  %v2104_v63 = vadd.f32 %v2103_v7, %v5167_v59  ;;  %v2344_v43 = vadd.f32 1.0, %v5241_v9  ;;  %v2441_v31 = vmul.f32 %v3630_v26, %v2409_v21 }
 0x3ee   : > { %v2500_v30 = vadd.f32 %v2468_v18, %v2102_v2  ;;  %v2481_v6 = vadd.f32 %v2449_v56, %v2044_v14  ;;  %v2408_v18 = vsub.f32 2.0, %v5241_v9  ;;  %v2347_v7 = vadd.f32 1.0, %v3570_v61 }
 0x3ef   : > { %2512 = vst [vmem:[%s5179_s0 + $0x20] sm:$0xff] %v2480_v51  ;;  %v2501_v23 = vadd.f32 %v2469_v4, %v2104_v63  ;;  %v2376_v9 = vmul.f32 %v3627_v13, %v2344_v43  ;;  %v2411_v0 = vsub.f32 2.0, %v3570_v61  ;;  %v2473_v63 = vadd.f32 %v2441_v31, %v2377_v12 }
 0x3f0   : > { %2532 = vst [vmem:[%s5179_s0 + $0xc0] sm:$0xff] %v2500_v30  ;;  %2513 = vst [vmem:[%s5179_s0 + $0x28] sm:$0xff] %v2481_v6  ;;  %v2440_v33 = vmul.f32 %v3628_v34, %v2408_v18  ;;  %v2378_v30 = vmul.f32 %v3631_v39, %v2346_v32  ;;  %v3632_v6 = vld [vmem:[%s4245_s2 + $0xf0] sm:$0xff]  ;;  %v2379_v10 = vmul.f32 %v3633_v25, %v2347_v7  ;;  %s5392_s2 = scalar_lea.hbm %s5588_s17, %s2805_s22 }
 0x3f1   : > { %2533 = vst [vmem:[%s5179_s0 + $0xc8] sm:$0xff] %v2501_v23  ;;  %v2107_v1 = vpop.f32.mrb[82].mxu1  ;;  %v2442_v49 = vmul.f32 %v3632_v6, %v2410_v45  ;;  %v2443_v23 = vmul.f32 %v3634_v42, %v2411_v0 }
 0x3f2   : > { %v2108_v41 = vadd.f32 %v2107_v1, %v5160_v50  ;;  %v2109_v36 = vpop.f32.mrb[83].mxu1  ;;  %v2472_v14 = vadd.f32 %v2440_v33, %v2376_v9 }
 0x3f3   : > { %v2110_v38 = vadd.f32 %v2109_v36, %v5167_v59  ;;  %v2474_v60 = vadd.f32 %v2442_v49, %v2378_v30  ;;  %v2475_v11 = vadd.f32 %v2443_v23, %v2379_v10 }
 0x3f4   : > { %v2502_v20 = vadd.f32 %v2470_v48, %v2108_v41 }
 0x3f5   : > { %v2047_v54 = vpop.f32.mrb[70].mxu0  ;;  %v2503_v8 = vadd.f32 %v2471_v3, %v2110_v38 }
 0x3f6   : > { %v2048_v27 = vadd.f32 %v2047_v54, %v5160_v50  ;;  %2534 = vst [vmem:[%s5179_s0 + $0xd0] sm:$0xff] %v2502_v20  ;;  %v2049_v52 = vpop.f32.mrb[71].mxu0 }
 0x3f7   : > { %v2050_v62 = vadd.f32 %v2049_v52, %v5167_v59  ;;  %2535 = vst [vmem:[%s5179_s0 + $0xd8] sm:$0xff] %v2503_v8 }
 0x3f8   : > { %v2482_v17 = vadd.f32 %v2450_v53, %v2048_v27 }
 0x3f9   : > { %v2483_v47 = vadd.f32 %v2451_v24, %v2050_v62  ;;  %v2113_v46 = vpop.f32.mrb[84].mxu1 }
 0x3fa   : > { %2514 = vst [vmem:[%s5179_s0 + $0x30] sm:$0xff] %v2482_v17  ;;  %v2114_v2 = vadd.f32 %v2113_v46, %v5160_v50  ;;  %v2115_v56 = vpop.f32.mrb[85].mxu1 }
 0x3fb   : > { %2515 = vst [vmem:[%s5179_s0 + $0x38] sm:$0xff] %v2483_v47  ;;  %v2116_v51 = vadd.f32 %v2115_v56, %v5167_v59 }
 0x3fc   : > { %v2504_v4 = vadd.f32 %v2472_v14, %v2114_v2 }
 0x3fd   : > { %v2505_v28 = vadd.f32 %v2473_v63, %v2116_v51 }
 0x3fe   : > { %2536 = vst [vmem:[%s5179_s0 + $0xe0] sm:$0xff] %v2504_v4 }
 0x3ff   : > { %2537 = vst [vmem:[%s5179_s0 + $0xe8] sm:$0xff] %v2505_v28 }
 0x400   : > { %v2119_v5 = vpop.f32.mrb[86].mxu1 }
 0x401   : > { %v2120_v58 = vadd.f32 %v2119_v5, %v5160_v50  ;;  %v2121_v16 = vpop.f32.mrb[87].mxu1 }
 0x402   : > { %v2122_v57 = vadd.f32 %v2121_v16, %v5167_v59 }
 0x403   : > { %v2506_v55 = vadd.f32 %v2474_v60, %v2120_v58 }
 0x404   : > { %v2507_v37 = vadd.f32 %v2475_v11, %v2122_v57 }
 0x405   : > { %2538 = vst [vmem:[%s5179_s0 + $0xf0] sm:$0xff] %v2506_v55 }
 0x406   : > { %2539 = vst [vmem:[%s5179_s0 + $0xf8] sm:$0xff] %v2507_v37 }
 0x407   : > { %3822 = shalt.err (!%p3819_p3)
}
 0x408   : > { %s3823_s11 = scalar_lea.hbm %s5392_s2, 4096  ;;  %s3827_s23 = scalar_lea.hbm %s5588_s17, 16384 }
 0x409   : > { %p3824_p2 = scmp.ne.s32.totalorder %s5392_s2, %s3823_s11  ;;  %p3828_p6 = scmp.lt.u32.totalorder %s5392_s2, %s5588_s17 }
 0x40a   : > { %p3829_p5 = scmp.lt.u32.totalorder %s3827_s23, %s3823_s11  ;;  %p3831_p8 = scmp.lt.u32.totalorder %s3823_s11, %s5392_s2 }
 0x40b   : > { %p3825_p4 = pnand %p3824_p2, %p5589_p10 }
 0x40c   : > { %p3830_p12 = por %p3829_p5, %p3828_p6 }
 0x40d   : > { %p3826_p9 = pneg %p3825_p4 }
 0x40e   : > { %p3832_p11 = por %p3831_p8, %p3830_p12 }
 0x410   : > { %p3833_p1 = pnand %p3832_p11, %p3826_p9 }
 0x412   : > { %3836 = shalt.err (!%p3833_p1)
}
 0x413   : > { %s3914_s30 = smov 256   ;;  %s3915_s27 = smov 16  }
 0x414   : > { %3230 = dma.vmem_to_hbm [thread:$0]  (%p5589_p10), %s5394_s28, 4096, %s5392_s2, %s2541_s19, %s3914_s30, %s3914_s30, %s3915_s27  }
 0x415 PF: > { %p3270_p13 = scmp.ge.s32.totalorder %s3899_s16, 2  ;;  %s2570_s0 = sand.u32 1, %s3887_s13  }
 0x416   : > { %p5590_p7 = scmp.ne.s32.totalorder %s5493_s10, 0  ;;  %s2571_s22 = scalar_lea.sflag [#allocation4], %s2570_s0 }
 0x418   : > { %p3256_p0 = pnand %p3270_p13, %p5590_p7 }
 0x41a   : > { %3882 = dma.done.wait (!%p3256_p0), %s2571_s22, 4096  }
 0x41b   : > { %3884 = vsyncadd (!%p3256_p0), %s2571_s22, 4294963200  ;;  %s5591_s26 = sld [smem:[#allocation24_spill]]  ;;  %s5592_s15 = sld [smem:[#allocation25_spill]] }
 0x41c   : > { %p29_p3 = scmp.ge.s32.totalorder %s4113_s25, 6   ;;  %s5593_s13 = smov %s3891_s14 }
 0x41d   : > { %s5595_s16 = smov %s4113_s25 }
 0x41e   :  { %31 = sbr.rel (!%p29_p3) target bundleno = 18 (0x12), region = 139 }
 0x421   : > { %s5594_s14 = smov %s5591_s26 }
 0x425   :  { %2576 = vsyncpa [#allocation3], 1 }
 0x426   :  { %2578 = vsyncpa [#allocation3 + $0x1], 1 }
 0x427   :  { %2579 = vsyncpa [#allocation7], 1 }
 0x428   :  { %2581 = vsyncpa [#allocation7 + $0x1], 1 }
 0x429   :  { %2582 = vsyncpa [#allocation10], 1 }
 0x42a   :  { %2583 = vsyncpa [#allocation4], 1 }
 0x42b   :  { %2585 = vsyncpa [#allocation4 + $0x1], 1 }
 0x42c   :  { %2586 = vsyncpa [#allocation5], 1 }
 0x42d   :  { %2588 = vsyncpa [#allocation5 + $0x1], 1 }
 0x42e   :  { %2589 = vsyncpa [#allocation13], 1 }

</bundles_post_ra>
